<compile_context>
chip_gen: v5e
topology: v5e:2x2
jax: 0.10.0
libtpu: 0.0.40
codegen_flags: <defaults>
</compile_context>

<pallas_src>
import math
import functools

import jax
import jax.numpy as jnp
from jax.experimental import pallas as pl
from jax.experimental.pallas import tpu as pltpu


# ---------------------------------------------------------------------------
# In-kernel math helpers (operate on loaded values, everything stays in vregs)
# ---------------------------------------------------------------------------

def _layernorm(x, gamma, beta, eps=1e-5):
    mu = jnp.mean(x, axis=-1, keepdims=True)
    xc = x - mu
    var = jnp.mean(xc * xc, axis=-1, keepdims=True)
    return xc * jax.lax.rsqrt(var + eps) * gamma + beta


def _mha_core(q, k, v, wo, bo, nhead):
    """q: (Lq, D) (already scaled via the pre-scaled Wq), k/v: (Lk, D),
    wo: (D, D), bo: (1, D).  Per-head softmax attention with the output
    projection accumulated head-by-head (no in-kernel concat / 3-D transpose)."""
    D = q.shape[-1]
    dh = D // nhead
    out = None
    for h in range(nhead):
        sl = slice(h * dh, (h + 1) * dh)
        s = jnp.dot(q[:, sl], k[:, sl].T, preferred_element_type=jnp.float32)
        s = s - jnp.max(s, axis=-1, keepdims=True)
        e = jnp.exp(s)
        p = e * pl.reciprocal(jnp.sum(e, axis=-1, keepdims=True), approx=True)
        oh = jnp.dot(p, v[:, sl], preferred_element_type=jnp.float32)
        contrib = jnp.dot(oh, wo[sl, :], preferred_element_type=jnp.float32)
        out = contrib if out is None else out + contrib
    return out + bo


# ---------------------------------------------------------------------------
# Fused Pallas kernels
# ---------------------------------------------------------------------------

def _encoder_layer_kernel(x_ref, wqkv_ref, bqkv_ref, wo_ref, bo_ref,
                          g1_ref, be1_ref, w1_ref, b1_ref, w2_ref, b2_ref,
                          g2_ref, be2_ref, o_ref, *, nhead):
    x = x_ref[0]                                             # (S, D)
    D = x.shape[-1]
    # self-attention (merged QKV projection)
    qkv = jnp.dot(x, wqkv_ref[...], preferred_element_type=jnp.float32) + bqkv_ref[...]
    a = _mha_core(qkv[:, :D], qkv[:, D:2 * D], qkv[:, 2 * D:],
                  wo_ref[...], bo_ref[...], nhead)
    y = _layernorm(x + a, g1_ref[...], be1_ref[...])
    # feed-forward (intermediate stays in vregs/VMEM)
    h = jnp.maximum(
        jnp.dot(y, w1_ref[...], preferred_element_type=jnp.float32) + b1_ref[...], 0.0)
    z = jnp.dot(h, w2_ref[...], preferred_element_type=jnp.float32) + b2_ref[...]
    o_ref[0] = _layernorm(y + z, g2_ref[...], be2_ref[...])


def _decoder_layer_kernel(y_ref, mem_ref,
                          s_wqkv_ref, s_bqkv_ref, s_wo_ref, s_bo_ref, g1_ref, be1_ref,
                          c_wq_ref, c_bq_ref, c_wkv_ref, c_bkv_ref, c_wo_ref, c_bo_ref,
                          g2_ref, be2_ref,
                          w1_ref, b1_ref, w2_ref, b2_ref, g3_ref, be3_ref,
                          o_ref, *, nhead):
    # TODO(synk): only the mask=None forward path is implemented (no causal tgt_mask).
    y = y_ref[0]                                             # (T, D)
    m = mem_ref[0]                                           # (S, D)
    D = y.shape[-1]
    # self-attention
    qkv = jnp.dot(y, s_wqkv_ref[...], preferred_element_type=jnp.float32) + s_bqkv_ref[...]
    a = _mha_core(qkv[:, :D], qkv[:, D:2 * D], qkv[:, 2 * D:],
                  s_wo_ref[...], s_bo_ref[...], nhead)
    y1 = _layernorm(y + a, g1_ref[...], be1_ref[...])
    # cross-attention (merged KV projection of memory)
    q = jnp.dot(y1, c_wq_ref[...], preferred_element_type=jnp.float32) + c_bq_ref[...]
    kv = jnp.dot(m, c_wkv_ref[...], preferred_element_type=jnp.float32) + c_bkv_ref[...]
    c = _mha_core(q, kv[:, :D], kv[:, D:], c_wo_ref[...], c_bo_ref[...], nhead)
    y2 = _layernorm(y1 + c, g2_ref[...], be2_ref[...])
    # feed-forward
    h = jnp.maximum(
        jnp.dot(y2, w1_ref[...], preferred_element_type=jnp.float32) + b1_ref[...], 0.0)
    z = jnp.dot(h, w2_ref[...], preferred_element_type=jnp.float32) + b2_ref[...]
    o_ref[0] = _layernorm(y2 + z, g3_ref[...], be3_ref[...])


def _layernorm_kernel(x_ref, g_ref, b_ref, o_ref):
    o_ref[...] = _layernorm(x_ref[...], g_ref[...], b_ref[...])


def _final_kernel(y_ref, g_ref, b_ref, w_ref, bb_ref, o_ref):
    y = _layernorm(y_ref[...], g_ref[...], b_ref[...])
    o_ref[...] = jnp.dot(y, w_ref[...], preferred_element_type=jnp.float32) + bb_ref[...]


# ---------------------------------------------------------------------------
# pallas_call wrappers
# ---------------------------------------------------------------------------

def _rep_spec(arr):
    # full-array (weight) block, same block index for every grid step -> stays resident
    return pl.BlockSpec(arr.shape, lambda b: (0, 0))


ENC_WEIGHT_KEYS = ("wqkv", "bqkv", "wo", "bo", "g1", "be1",
                   "w1", "b1", "w2", "b2", "g2", "be2")

DEC_WEIGHT_KEYS = ("s_wqkv", "s_bqkv", "s_wo", "s_bo", "g1", "be1",
                   "c_wq", "c_bq", "c_wkv", "c_bkv", "c_wo", "c_bo", "g2", "be2",
                   "w1", "b1", "w2", "b2", "g3", "be3")


def encoder_layer_pallas(x, p, nhead):
    """x: (B, S, D) -> (B, S, D). One fused kernel per layer, grid over batch."""
    B, S, D = x.shape
    weights = [p[k] for k in ENC_WEIGHT_KEYS]
    return pl.pallas_call(
        functools.partial(_encoder_layer_kernel, nhead=nhead),
        out_shape=jax.ShapeDtypeStruct((B, S, D), jnp.float32),
        grid=(B,),
        in_specs=[pl.BlockSpec((1, S, D), lambda b: (b, 0, 0))]
                 + [_rep_spec(w) for w in weights],
        out_specs=pl.BlockSpec((1, S, D), lambda b: (b, 0, 0)),
        compiler_params=pltpu.CompilerParams(dimension_semantics=("parallel",)),
    )(x, *weights)


def decoder_layer_pallas(y, memory, p, nhead):
    """y: (B, T, D), memory: (B, S, D) -> (B, T, D)."""
    B, T, D = y.shape
    S = memory.shape[1]
    weights = [p[k] for k in DEC_WEIGHT_KEYS]
    return pl.pallas_call(
        functools.partial(_decoder_layer_kernel, nhead=nhead),
        out_shape=jax.ShapeDtypeStruct((B, T, D), jnp.float32),
        grid=(B,),
        in_specs=[pl.BlockSpec((1, T, D), lambda b: (b, 0, 0)),
                  pl.BlockSpec((1, S, D), lambda b: (b, 0, 0))]
                 + [_rep_spec(w) for w in weights],
        out_specs=pl.BlockSpec((1, T, D), lambda b: (b, 0, 0)),
        compiler_params=pltpu.CompilerParams(dimension_semantics=("parallel",)),
    )(y, memory, *weights)


def layernorm_pallas(x2d, gamma, beta):
    """x2d: (N, D), gamma/beta: (1, D)."""
    N, D = x2d.shape
    return pl.pallas_call(
        _layernorm_kernel,
        out_shape=jax.ShapeDtypeStruct((N, D), jnp.float32),
        grid=(1,),
        in_specs=[pl.BlockSpec((N, D), lambda i: (0, 0)),
                  pl.BlockSpec((1, D), lambda i: (0, 0)),
                  pl.BlockSpec((1, D), lambda i: (0, 0))],
        out_specs=pl.BlockSpec((N, D), lambda i: (0, 0)),
    )(x2d, gamma, beta)


def final_head_pallas(y2d, gamma, beta, w, b):
    """Fused decoder-final LayerNorm + output projection.  w: (D, Vpad), Vpad % 128 == 0."""
    N, D = y2d.shape
    Vp = w.shape[1]
    return pl.pallas_call(
        _final_kernel,
        out_shape=jax.ShapeDtypeStruct((N, Vp), jnp.float32),
        grid=(1,),
        in_specs=[pl.BlockSpec((N, D), lambda i: (0, 0)),
                  pl.BlockSpec((1, D), lambda i: (0, 0)),
                  pl.BlockSpec((1, D), lambda i: (0, 0)),
                  pl.BlockSpec((D, Vp), lambda i: (0, 0)),
                  pl.BlockSpec((1, Vp), lambda i: (0, 0))],
        out_specs=pl.BlockSpec((N, Vp), lambda i: (0, 0)),
    )(y2d, gamma, beta, w, b)


# ---------------------------------------------------------------------------
# Model forward (plain-JAX glue around the fused kernels)
# ---------------------------------------------------------------------------

def positional_encoding(max_len, d_model):
    position = jnp.arange(max_len, dtype=jnp.float32)[:, None]
    div_term = jnp.exp(
        jnp.arange(0, d_model, 2, dtype=jnp.float32) * (-math.log(10000.0) / d_model))
    pe = jnp.zeros((max_len, d_model), jnp.float32)
    pe = pe.at[:, 0::2].set(jnp.sin(position * div_term))
    pe = pe.at[:, 1::2].set(jnp.cos(position * div_term))
    return pe  # (max_len, d_model)


def my_transformer_forward(params, src_ids, importance, tgt_ids, cfg):
    """src_ids/importance: int32 (S, B); tgt_ids: int32 (T, B) -> (T, B, target_vocab)."""
    D = cfg["d_model"]
    H = cfg["nhead"]
    V = cfg["target_vocab"]
    sqrt_d = math.sqrt(D)
    pe = params["pe"]

    S, B = src_ids.shape
    T = tgt_ids.shape[0]

    # source embedding + positional encoding + importance embedding (JAX glue)
    src = jnp.take(params["source_embedding"], src_ids, axis=0)         # (S, B, D)
    src = src * sqrt_d + pe[:S][:, None, :]
    src = src + jnp.take(params["importance_embedding"], importance, axis=0)
    x = jnp.transpose(src, (1, 0, 2))                                   # (B, S, D)

    # encoder stack (one fused kernel per layer) + final encoder norm
    for lp in params["encoder_layers"]:
        x = encoder_layer_pallas(x, lp, H)
    memory = layernorm_pallas(x.reshape(B * S, D),
                              params["encoder_norm_g"],
                              params["encoder_norm_b"]).reshape(B, S, D)

    # target embedding + positional encoding
    tgt = jnp.take(params["target_embedding"], tgt_ids, axis=0)         # (T, B, D)
    tgt = tgt * sqrt_d + pe[:T][:, None, :]
    y = jnp.transpose(tgt, (1, 0, 2))                                   # (B, T, D)

    # decoder stack (one fused kernel per layer)
    for lp in params["decoder_layers"]:
        y = decoder_layer_pallas(y, memory, lp, H)

    # fused decoder final norm + output projection (lane-padded to 128)
    out = final_head_pallas(y.reshape(B * T, D),
                            params["decoder_norm_g"], params["decoder_norm_b"],
                            params["out_w"], params["out_b"])            # (B*T, Vpad)
    out = out[:, :V].reshape(B, T, V)
    return jnp.transpose(out, (1, 0, 2))                                 # (T, B, V)


# ---------------------------------------------------------------------------
# Deterministic parameter init, stored in kernel-ready (pre-fused) layout
# ---------------------------------------------------------------------------

def init_params(key, cfg):
    D = cfg["d_model"]
    dff = cfg["dim_feedforward"]
    H = cfg["nhead"]
    scale = 1.0 / math.sqrt(D // H)           # folded into Wq / bq
    V = cfg["target_vocab"]
    Vp = ((V + 127) // 128) * 128             # lane-pad the output projection

    keys = iter(jax.random.split(key, 512))

    def xavier(shape):  # torch convention: shape = (fan_out, fan_in)
        fan_out, fan_in = shape
        bound = math.sqrt(6.0 / (fan_in + fan_out))
        return jax.random.uniform(next(keys), shape, jnp.float32, -bound, bound)

    zeros = lambda n: jnp.zeros((1, n), jnp.float32)
    ones = lambda n: jnp.ones((1, n), jnp.float32)

    def self_attn():
        wq = xavier((D, D)).T * scale
        wk = xavier((D, D)).T
        wv = xavier((D, D)).T
        return dict(wqkv=jnp.concatenate([wq, wk, wv], axis=1),   # (D, 3D)
                    bqkv=zeros(3 * D),
                    wo=xavier((D, D)).T, bo=zeros(D))

    def enc_layer():
        a = self_attn()
        return dict(
            wqkv=a["wqkv"], bqkv=a["bqkv"], wo=a["wo"], bo=a["bo"],
            g1=ones(D), be1=zeros(D),
            w1=xavier((dff, D)).T, b1=zeros(dff),
            w2=xavier((D, dff)).T, b2=zeros(D),
            g2=ones(D), be2=zeros(D),
        )

    def dec_layer():
        a = self_attn()
        c_wq = xavier((D, D)).T * scale
        c_wk = xavier((D, D)).T
        c_wv = xavier((D, D)).T
        return dict(
            s_wqkv=a["wqkv"], s_bqkv=a["bqkv"], s_wo=a["wo"], s_bo=a["bo"],
            g1=ones(D), be1=zeros(D),
            c_wq=c_wq, c_bq=zeros(D),
            c_wkv=jnp.concatenate([c_wk, c_wv], axis=1), c_bkv=zeros(2 * D),
            c_wo=xavier((D, D)).T, c_bo=zeros(D),
            g2=ones(D), be2=zeros(D),
            w1=xavier((dff, D)).T, b1=zeros(dff),
            w2=xavier((D, dff)).T, b2=zeros(D),
            g3=ones(D), be3=zeros(D),
        )

    out_w = jnp.zeros((D, Vp), jnp.float32).at[:, :V].set(xavier((V, D)).T)

    return dict(
        source_embedding=xavier((cfg["source_vocab"], D)),
        target_embedding=xavier((cfg["target_vocab"], D)),
        importance_embedding=xavier((2, D)),
        encoder_layers=[enc_layer() for _ in range(cfg["num_encoder_layers"])],
        encoder_norm_g=ones(D), encoder_norm_b=zeros(D),
        decoder_layers=[dec_layer() for _ in range(cfg["num_decoder_layers"])],
        decoder_norm_g=ones(D), decoder_norm_b=zeros(D),
        out_w=out_w, out_b=jnp.zeros((1, Vp), jnp.float32),
        pe=positional_encoding(cfg["max_len"], D),
    )


# ---------------------------------------------------------------------------
# Main
# ---------------------------------------------------------------------------

if __name__ == "__main__":
    cfg = dict(
        d_model=32,
        nhead=4,
        num_encoder_layers=2,
        num_decoder_layers=2,
        dim_feedforward=64,
        source_vocab=120,
        target_vocab=120,
        max_len=64,
    )

    key = jax.random.PRNGKey(0)
    k_param, k_src, k_imp, k_tgt = jax.random.split(key, 4)
    params = init_params(k_param, cfg)

    S, T, B = 8, 8, 2
    src = jax.random.randint(k_src, (S, B), 0, cfg["source_vocab"], dtype=jnp.int32)
    importance = jax.random.randint(k_imp, (S, B), 0, 2, dtype=jnp.int32)
    tgt = jax.random.randint(k_tgt, (T, B), 0, cfg["target_vocab"], dtype=jnp.int32)

    fwd = jax.jit(functools.partial(my_transformer_forward, cfg=cfg))
    out = fwd(params, src, importance, tgt)
    jax.block_until_ready(out)

    assert out.shape == (T, B, cfg["target_vocab"])
    assert out.dtype == jnp.float32
    assert bool(jnp.all(jnp.isfinite(out)))
    print("KERNEL_OK")
</pallas_src>

<mosaic_0001>
module attributes {stable_mosaic.version = 11 : i64} {
  func.func @_layernorm_kernel(%arg0: i32, %arg1: memref<16x32xf32, #tpu.memory_space<vmem>>, %arg2: memref<1x32xf32, #tpu.memory_space<vmem>>, %arg3: memref<1x32xf32, #tpu.memory_space<vmem>>, %arg4: memref<16x32xf32, #tpu.memory_space<vmem>>) attributes {dimension_semantics = [#tpu.dimension_semantics<arbitrary>], iteration_bounds = array<i64: 1>, scalar_prefetch = 0 : i64, scratch_operands = 0 : i64, tpu.core_type = #tpu.core_type<tc>, window_params = [{pipeline_mode = #tpu.pipeline_mode<synchronous>, transform_indices = @transform_0, window_bounds = array<i64: 16, 32>}, {pipeline_mode = #tpu.pipeline_mode<synchronous>, transform_indices = @transform_1, window_bounds = array<i64: 1, 32>}, {pipeline_mode = #tpu.pipeline_mode<synchronous>, transform_indices = @transform_2, window_bounds = array<i64: 1, 32>}, {pipeline_mode = #tpu.pipeline_mode<synchronous>, transform_indices = @transform_3, window_bounds = array<i64: 16, 32>}]} {
    %c0 = arith.constant 0 : index
    %c0_0 = arith.constant 0 : index
    %0 = vector.load %arg1[%c0, %c0_0] : memref<16x32xf32, #tpu.memory_space<vmem>>, vector<16x32xf32>
    %c0_1 = arith.constant 0 : index
    %c0_2 = arith.constant 0 : index
    %1 = vector.load %arg2[%c0_1, %c0_2] : memref<1x32xf32, #tpu.memory_space<vmem>>, vector<1x32xf32>
    %c0_3 = arith.constant 0 : index
    %c0_4 = arith.constant 0 : index
    %2 = vector.load %arg3[%c0_3, %c0_4] : memref<1x32xf32, #tpu.memory_space<vmem>>, vector<1x32xf32>
    %cst = arith.constant dense<0.000000e+00> : vector<16xf32>
    %3 = vector.multi_reduction <add>, %0, %cst [1] : vector<16x32xf32> to vector<16xf32>
    %4 = vector.shape_cast %3 : vector<16xf32> to vector<16x1xf32>
    %cst_5 = arith.constant 3.200000e+01 : f32
    %5 = vector.broadcast %cst_5 : f32 to vector<16x1xf32>
    %6 = arith.divf %4, %5 : vector<16x1xf32>
    %7 = vector.broadcast %6 : vector<16x1xf32> to vector<16x32xf32>
    %8 = arith.subf %0, %7 : vector<16x32xf32>
    %9 = arith.mulf %8, %8 : vector<16x32xf32>
    %cst_6 = arith.constant dense<0.000000e+00> : vector<16xf32>
    %10 = vector.multi_reduction <add>, %9, %cst_6 [1] : vector<16x32xf32> to vector<16xf32>
    %11 = vector.shape_cast %10 : vector<16xf32> to vector<16x1xf32>
    %cst_7 = arith.constant 3.200000e+01 : f32
    %12 = vector.broadcast %cst_7 : f32 to vector<16x1xf32>
    %13 = arith.divf %11, %12 : vector<16x1xf32>
    %cst_8 = arith.constant 9.99999974E-6 : f32
    %14 = vector.broadcast %cst_8 : f32 to vector<16x1xf32>
    %15 = arith.addf %13, %14 : vector<16x1xf32>
    %16 = math.rsqrt %15 : vector<16x1xf32>
    %17 = vector.broadcast %16 : vector<16x1xf32> to vector<16x32xf32>
    %18 = arith.mulf %8, %17 : vector<16x32xf32>
    %19 = vector.broadcast %1 : vector<1x32xf32> to vector<16x32xf32>
    %20 = arith.mulf %18, %19 : vector<16x32xf32>
    %21 = vector.broadcast %2 : vector<1x32xf32> to vector<16x32xf32>
    %22 = arith.addf %20, %21 : vector<16x32xf32>
    %c0_9 = arith.constant 0 : index
    %c0_10 = arith.constant 0 : index
    %23 = vector.load %arg4[%c0_9, %c0_10] : memref<16x32xf32, #tpu.memory_space<vmem>>, vector<16x32xf32>
    tpu.vector_store %arg4[%c0_9, %c0_10], %22 {strides = array<i32>} : memref<16x32xf32, #tpu.memory_space<vmem>>, vector<16x32xf32>,
    return
  }
  func.func @transform_0(%arg0: i32) -> (i32, i32) {
    %c0_i32 = arith.constant 0 : i32
    %c0_i32_0 = arith.constant 0 : i32
    %c0_i32_1 = arith.constant 0 : i32
    return %c0_i32, %c0_i32_0 : i32, i32
  }
  func.func @transform_1(%arg0: i32) -> (i32, i32) {
    %c0_i32 = arith.constant 0 : i32
    %c0_i32_0 = arith.constant 0 : i32
    %c0_i32_1 = arith.constant 0 : i32
    return %c0_i32, %c0_i32_0 : i32, i32
  }
  func.func @transform_2(%arg0: i32) -> (i32, i32) {
    %c0_i32 = arith.constant 0 : i32
    %c0_i32_0 = arith.constant 0 : i32
    %c0_i32_1 = arith.constant 0 : i32
    return %c0_i32, %c0_i32_0 : i32, i32
  }
  func.func @transform_3(%arg0: i32) -> (i32, i32) {
    %c0_i32 = arith.constant 0 : i32
    %c0_i32_0 = arith.constant 0 : i32
    %c0_i32_1 = arith.constant 0 : i32
    return %c0_i32, %c0_i32_0 : i32, i32
  }
}

module attributes {stable_mosaic.version = 11 : i64} {
  func.func @_encoder_layer_kernel(%arg0: i32, %arg1: memref<1x8x32xf32, #tpu.memory_space<vmem>>, %arg2: memref<32x96xf32, #tpu.memory_space<vmem>>, %arg3: memref<1x96xf32, #tpu.memory_space<vmem>>, %arg4: memref<32x32xf32, #tpu.memory_space<vmem>>, %arg5: memref<1x32xf32, #tpu.memory_space<vmem>>, %arg6: memref<1x32xf32, #tpu.memory_space<vmem>>, %arg7: memref<1x32xf32, #tpu.memory_space<vmem>>, %arg8: memref<32x64xf32, #tpu.memory_space<vmem>>, %arg9: memref<1x64xf32, #tpu.memory_space<vmem>>, %arg10: memref<64x32xf32, #tpu.memory_space<vmem>>, %arg11: memref<1x32xf32, #tpu.memory_space<vmem>>, %arg12: memref<1x32xf32, #tpu.memory_space<vmem>>, %arg13: memref<1x32xf32, #tpu.memory_space<vmem>>, %arg14: memref<1x8x32xf32, #tpu.memory_space<vmem>>) attributes {dimension_semantics = [#tpu.dimension_semantics<parallel>], iteration_bounds = array<i64: 2>, scalar_prefetch = 0 : i64, scratch_operands = 0 : i64, tpu.core_type = #tpu.core_type<tc>, window_params = [{transform_indices = @transform_0, window_bounds = array<i64: 1, 8, 32>}, {pipeline_mode = #tpu.pipeline_mode<synchronous>, transform_indices = @transform_1, window_bounds = array<i64: 32, 96>}, {pipeline_mode = #tpu.pipeline_mode<synchronous>, transform_indices = @transform_2, window_bounds = array<i64: 1, 96>}, {pipeline_mode = #tpu.pipeline_mode<synchronous>, transform_indices = @transform_3, window_bounds = array<i64: 32, 32>}, {pipeline_mode = #tpu.pipeline_mode<synchronous>, transform_indices = @transform_4, window_bounds = array<i64: 1, 32>}, {pipeline_mode = #tpu.pipeline_mode<synchronous>, transform_indices = @transform_5, window_bounds = array<i64: 1, 32>}, {pipeline_mode = #tpu.pipeline_mode<synchronous>, transform_indices = @transform_6, window_bounds = array<i64: 1, 32>}, {pipeline_mode = #tpu.pipeline_mode<synchronous>, transform_indices = @transform_7, window_bounds = array<i64: 32, 64>}, {pipeline_mode = #tpu.pipeline_mode<synchronous>, transform_indices = @transform_8, window_bounds = array<i64: 1, 64>}, {pipeline_mode = #tpu.pipeline_mode<synchronous>, transform_indices = @transform_9, window_bounds = array<i64: 64, 32>}, {pipeline_mode = #tpu.pipeline_mode<synchronous>, transform_indices = @transform_10, window_bounds = array<i64: 1, 32>}, {pipeline_mode = #tpu.pipeline_mode<synchronous>, transform_indices = @transform_11, window_bounds = array<i64: 1, 32>}, {pipeline_mode = #tpu.pipeline_mode<synchronous>, transform_indices = @transform_12, window_bounds = array<i64: 1, 32>}, {transform_indices = @transform_13, window_bounds = array<i64: 1, 8, 32>}]} {
    %c0 = arith.constant 0 : index
    %c0_0 = arith.constant 0 : index
    %c0_1 = arith.constant 0 : index
    %0 = vector.load %arg1[%c0, %c0_0, %c0_1] : memref<1x8x32xf32, #tpu.memory_space<vmem>>, vector<1x8x32xf32>
    %1 = vector.shape_cast %0 : vector<1x8x32xf32> to vector<8x32xf32>
    %c0_2 = arith.constant 0 : index
    %c0_3 = arith.constant 0 : index
    %2 = vector.load %arg2[%c0_2, %c0_3] : memref<32x96xf32, #tpu.memory_space<vmem>>, vector<32x96xf32>
    %cst = arith.constant dense<0.000000e+00> : vector<8x96xf32>
    %3 = tpu.matmul %1, %2, %cst {dimension_numbers = #tpu.dot_dimension_numbers<[1], [0], [0], [1], [0, 0, 1, 1], [], []>} : vector<8x32xf32>, vector<32x96xf32>, vector<8x96xf32> -> vector<8x96xf32>
    %c0_4 = arith.constant 0 : index
    %c0_5 = arith.constant 0 : index
    %4 = vector.load %arg3[%c0_4, %c0_5] : memref<1x96xf32, #tpu.memory_space<vmem>>, vector<1x96xf32>
    %5 = vector.broadcast %4 : vector<1x96xf32> to vector<8x96xf32>
    %6 = arith.addf %3, %5 : vector<8x96xf32>
    %7 = vector.extract_strided_slice %6 {offsets = [0, 0], sizes = [8, 32], strides = [1, 1]} : vector<8x96xf32> to vector<8x32xf32>
    %8 = vector.extract_strided_slice %6 {offsets = [0, 32], sizes = [8, 32], strides = [1, 1]} : vector<8x96xf32> to vector<8x32xf32>
    %9 = vector.extract_strided_slice %6 {offsets = [0, 64], sizes = [8, 32], strides = [1, 1]} : vector<8x96xf32> to vector<8x32xf32>
    %c0_6 = arith.constant 0 : index
    %c0_7 = arith.constant 0 : index
    %10 = vector.load %arg4[%c0_6, %c0_7] : memref<32x32xf32, #tpu.memory_space<vmem>>, vector<32x32xf32>
    %c0_8 = arith.constant 0 : index
    %c0_9 = arith.constant 0 : index
    %11 = vector.load %arg5[%c0_8, %c0_9] : memref<1x32xf32, #tpu.memory_space<vmem>>, vector<1x32xf32>
    %12 = vector.extract_strided_slice %7 {offsets = [0, 0], sizes = [8, 8], strides = [1, 1]} : vector<8x32xf32> to vector<8x8xf32>
    %13 = vector.extract_strided_slice %8 {offsets = [0, 0], sizes = [8, 8], strides = [1, 1]} : vector<8x32xf32> to vector<8x8xf32>
    %14 = tpu.transpose %13, [1, 0] : vector<8x8xf32> -> vector<8x8xf32>
    %cst_10 = arith.constant dense<0.000000e+00> : vector<8x8xf32>
    %15 = tpu.matmul %12, %14, %cst_10 {dimension_numbers = #tpu.dot_dimension_numbers<[1], [0], [0], [1], [0, 0, 1, 1], [], []>} : vector<8x8xf32>, vector<8x8xf32>, vector<8x8xf32> -> vector<8x8xf32>
    %cst_11 = arith.constant dense<0xFF800000> : vector<8xf32>
    %16 = vector.multi_reduction <maximumf>, %15, %cst_11 [1] : vector<8x8xf32> to vector<8xf32>
    %17 = vector.shape_cast %16 : vector<8xf32> to vector<8x1xf32>
    %18 = vector.broadcast %17 : vector<8x1xf32> to vector<8x8xf32>
    %19 = arith.subf %15, %18 : vector<8x8xf32>
    %20 = math.exp %19 : vector<8x8xf32>
    %cst_12 = arith.constant dense<0.000000e+00> : vector<8xf32>
    %21 = vector.multi_reduction <add>, %20, %cst_12 [1] : vector<8x8xf32> to vector<8xf32>
    %22 = vector.shape_cast %21 : vector<8xf32> to vector<8x1xf32>
    %23 = tpu.reciprocal %22 {approx = true} : vector<8x1xf32> -> vector<8x1xf32>
    %24 = vector.broadcast %23 : vector<8x1xf32> to vector<8x8xf32>
    %25 = arith.mulf %20, %24 : vector<8x8xf32>
    %26 = vector.extract_strided_slice %9 {offsets = [0, 0], sizes = [8, 8], strides = [1, 1]} : vector<8x32xf32> to vector<8x8xf32>
    %cst_13 = arith.constant dense<0.000000e+00> : vector<8x8xf32>
    %27 = tpu.matmul %25, %26, %cst_13 {dimension_numbers = #tpu.dot_dimension_numbers<[1], [0], [0], [1], [0, 0, 1, 1], [], []>} : vector<8x8xf32>, vector<8x8xf32>, vector<8x8xf32> -> vector<8x8xf32>
    %28 = vector.extract_strided_slice %10 {offsets = [0, 0], sizes = [8, 32], strides = [1, 1]} : vector<32x32xf32> to vector<8x32xf32>
    %cst_14 = arith.constant dense<0.000000e+00> : vector<8x32xf32>
    %29 = tpu.matmul %27, %28, %cst_14 {dimension_numbers = #tpu.dot_dimension_numbers<[1], [0], [0], [1], [0, 0, 1, 1], [], []>} : vector<8x8xf32>, vector<8x32xf32>, vector<8x32xf32> -> vector<8x32xf32>
    %30 = vector.extract_strided_slice %7 {offsets = [0, 8], sizes = [8, 8], strides = [1, 1]} : vector<8x32xf32> to vector<8x8xf32>
    %31 = vector.extract_strided_slice %8 {offsets = [0, 8], sizes = [8, 8], strides = [1, 1]} : vector<8x32xf32> to vector<8x8xf32>
    %32 = tpu.transpose %31, [1, 0] : vector<8x8xf32> -> vector<8x8xf32>
    %cst_15 = arith.constant dense<0.000000e+00> : vector<8x8xf32>
    %33 = tpu.matmul %30, %32, %cst_15 {dimension_numbers = #tpu.dot_dimension_numbers<[1], [0], [0], [1], [0, 0, 1, 1], [], []>} : vector<8x8xf32>, vector<8x8xf32>, vector<8x8xf32> -> vector<8x8xf32>
    %cst_16 = arith.constant dense<0xFF800000> : vector<8xf32>
    %34 = vector.multi_reduction <maximumf>, %33, %cst_16 [1] : vector<8x8xf32> to vector<8xf32>
    %35 = vector.shape_cast %34 : vector<8xf32> to vector<8x1xf32>
    %36 = vector.broadcast %35 : vector<8x1xf32> to vector<8x8xf32>
    %37 = arith.subf %33, %36 : vector<8x8xf32>
    %38 = math.exp %37 : vector<8x8xf32>
    %cst_17 = arith.constant dense<0.000000e+00> : vector<8xf32>
    %39 = vector.multi_reduction <add>, %38, %cst_17 [1] : vector<8x8xf32> to vector<8xf32>
    %40 = vector.shape_cast %39 : vector<8xf32> to vector<8x1xf32>
    %41 = tpu.reciprocal %40 {approx = true} : vector<8x1xf32> -> vector<8x1xf32>
    %42 = vector.broadcast %41 : vector<8x1xf32> to vector<8x8xf32>
    %43 = arith.mulf %38, %42 : vector<8x8xf32>
    %44 = vector.extract_strided_slice %9 {offsets = [0, 8], sizes = [8, 8], strides = [1, 1]} : vector<8x32xf32> to vector<8x8xf32>
    %cst_18 = arith.constant dense<0.000000e+00> : vector<8x8xf32>
    %45 = tpu.matmul %43, %44, %cst_18 {dimension_numbers = #tpu.dot_dimension_numbers<[1], [0], [0], [1], [0, 0, 1, 1], [], []>} : vector<8x8xf32>, vector<8x8xf32>, vector<8x8xf32> -> vector<8x8xf32>
    %46 = vector.extract_strided_slice %10 {offsets = [8, 0], sizes = [8, 32], strides = [1, 1]} : vector<32x32xf32> to vector<8x32xf32>
    %cst_19 = arith.constant dense<0.000000e+00> : vector<8x32xf32>
    %47 = tpu.matmul %45, %46, %cst_19 {dimension_numbers = #tpu.dot_dimension_numbers<[1], [0], [0], [1], [0, 0, 1, 1], [], []>} : vector<8x8xf32>, vector<8x32xf32>, vector<8x32xf32> -> vector<8x32xf32>
    %48 = arith.addf %29, %47 : vector<8x32xf32>
    %49 = vector.extract_strided_slice %7 {offsets = [0, 16], sizes = [8, 8], strides = [1, 1]} : vector<8x32xf32> to vector<8x8xf32>
    %50 = vector.extract_strided_slice %8 {offsets = [0, 16], sizes = [8, 8], strides = [1, 1]} : vector<8x32xf32> to vector<8x8xf32>
    %51 = tpu.transpose %50, [1, 0] : vector<8x8xf32> -> vector<8x8xf32>
    %cst_20 = arith.constant dense<0.000000e+00> : vector<8x8xf32>
    %52 = tpu.matmul %49, %51, %cst_20 {dimension_numbers = #tpu.dot_dimension_numbers<[1], [0], [0], [1], [0, 0, 1, 1], [], []>} : vector<8x8xf32>, vector<8x8xf32>, vector<8x8xf32> -> vector<8x8xf32>
    %cst_21 = arith.constant dense<0xFF800000> : vector<8xf32>
    %53 = vector.multi_reduction <maximumf>, %52, %cst_21 [1] : vector<8x8xf32> to vector<8xf32>
    %54 = vector.shape_cast %53 : vector<8xf32> to vector<8x1xf32>
    %55 = vector.broadcast %54 : vector<8x1xf32> to vector<8x8xf32>
    %56 = arith.subf %52, %55 : vector<8x8xf32>
    %57 = math.exp %56 : vector<8x8xf32>
    %cst_22 = arith.constant dense<0.000000e+00> : vector<8xf32>
    %58 = vector.multi_reduction <add>, %57, %cst_22 [1] : vector<8x8xf32> to vector<8xf32>
    %59 = vector.shape_cast %58 : vector<8xf32> to vector<8x1xf32>
    %60 = tpu.reciprocal %59 {approx = true} : vector<8x1xf32> -> vector<8x1xf32>
    %61 = vector.broadcast %60 : vector<8x1xf32> to vector<8x8xf32>
    %62 = arith.mulf %57, %61 : vector<8x8xf32>
    %63 = vector.extract_strided_slice %9 {offsets = [0, 16], sizes = [8, 8], strides = [1, 1]} : vector<8x32xf32> to vector<8x8xf32>
    %cst_23 = arith.constant dense<0.000000e+00> : vector<8x8xf32>
    %64 = tpu.matmul %62, %63, %cst_23 {dimension_numbers = #tpu.dot_dimension_numbers<[1], [0], [0], [1], [0, 0, 1, 1], [], []>} : vector<8x8xf32>, vector<8x8xf32>, vector<8x8xf32> -> vector<8x8xf32>
    %65 = vector.extract_strided_slice %10 {offsets = [16, 0], sizes = [8, 32], strides = [1, 1]} : vector<32x32xf32> to vector<8x32xf32>
    %cst_24 = arith.constant dense<0.000000e+00> : vector<8x32xf32>
    %66 = tpu.matmul %64, %65, %cst_24 {dimension_numbers = #tpu.dot_dimension_numbers<[1], [0], [0], [1], [0, 0, 1, 1], [], []>} : vector<8x8xf32>, vector<8x32xf32>, vector<8x32xf32> -> vector<8x32xf32>
    %67 = arith.addf %48, %66 : vector<8x32xf32>
    %68 = vector.extract_strided_slice %7 {offsets = [0, 24], sizes = [8, 8], strides = [1, 1]} : vector<8x32xf32> to vector<8x8xf32>
    %69 = vector.extract_strided_slice %8 {offsets = [0, 24], sizes = [8, 8], strides = [1, 1]} : vector<8x32xf32> to vector<8x8xf32>
    %70 = tpu.transpose %69, [1, 0] : vector<8x8xf32> -> vector<8x8xf32>
    %cst_25 = arith.constant dense<0.000000e+00> : vector<8x8xf32>
    %71 = tpu.matmul %68, %70, %cst_25 {dimension_numbers = #tpu.dot_dimension_numbers<[1], [0], [0], [1], [0, 0, 1, 1], [], []>} : vector<8x8xf32>, vector<8x8xf32>, vector<8x8xf32> -> vector<8x8xf32>
    %cst_26 = arith.constant dense<0xFF800000> : vector<8xf32>
    %72 = vector.multi_reduction <maximumf>, %71, %cst_26 [1] : vector<8x8xf32> to vector<8xf32>
    %73 = vector.shape_cast %72 : vector<8xf32> to vector<8x1xf32>
    %74 = vector.broadcast %73 : vector<8x1xf32> to vector<8x8xf32>
    %75 = arith.subf %71, %74 : vector<8x8xf32>
    %76 = math.exp %75 : vector<8x8xf32>
    %cst_27 = arith.constant dense<0.000000e+00> : vector<8xf32>
    %77 = vector.multi_reduction <add>, %76, %cst_27 [1] : vector<8x8xf32> to vector<8xf32>
    %78 = vector.shape_cast %77 : vector<8xf32> to vector<8x1xf32>
    %79 = tpu.reciprocal %78 {approx = true} : vector<8x1xf32> -> vector<8x1xf32>
    %80 = vector.broadcast %79 : vector<8x1xf32> to vector<8x8xf32>
    %81 = arith.mulf %76, %80 : vector<8x8xf32>
    %82 = vector.extract_strided_slice %9 {offsets = [0, 24], sizes = [8, 8], strides = [1, 1]} : vector<8x32xf32> to vector<8x8xf32>
    %cst_28 = arith.constant dense<0.000000e+00> : vector<8x8xf32>
    %83 = tpu.matmul %81, %82, %cst_28 {dimension_numbers = #tpu.dot_dimension_numbers<[1], [0], [0], [1], [0, 0, 1, 1], [], []>} : vector<8x8xf32>, vector<8x8xf32>, vector<8x8xf32> -> vector<8x8xf32>
    %84 = vector.extract_strided_slice %10 {offsets = [24, 0], sizes = [8, 32], strides = [1, 1]} : vector<32x32xf32> to vector<8x32xf32>
    %cst_29 = arith.constant dense<0.000000e+00> : vector<8x32xf32>
    %85 = tpu.matmul %83, %84, %cst_29 {dimension_numbers = #tpu.dot_dimension_numbers<[1], [0], [0], [1], [0, 0, 1, 1], [], []>} : vector<8x8xf32>, vector<8x32xf32>, vector<8x32xf32> -> vector<8x32xf32>
    %86 = arith.addf %67, %85 : vector<8x32xf32>
    %87 = vector.broadcast %11 : vector<1x32xf32> to vector<8x32xf32>
    %88 = arith.addf %86, %87 : vector<8x32xf32>
    %89 = arith.addf %1, %88 : vector<8x32xf32>
    %c0_30 = arith.constant 0 : index
    %c0_31 = arith.constant 0 : index
    %90 = vector.load %arg6[%c0_30, %c0_31] : memref<1x32xf32, #tpu.memory_space<vmem>>, vector<1x32xf32>
    %c0_32 = arith.constant 0 : index
    %c0_33 = arith.constant 0 : index
    %91 = vector.load %arg7[%c0_32, %c0_33] : memref<1x32xf32, #tpu.memory_space<vmem>>, vector<1x32xf32>
    %cst_34 = arith.constant dense<0.000000e+00> : vector<8xf32>
    %92 = vector.multi_reduction <add>, %89, %cst_34 [1] : vector<8x32xf32> to vector<8xf32>
    %93 = vector.shape_cast %92 : vector<8xf32> to vector<8x1xf32>
    %cst_35 = arith.constant 3.200000e+01 : f32
    %94 = vector.broadcast %cst_35 : f32 to vector<8x1xf32>
    %95 = arith.divf %93, %94 : vector<8x1xf32>
    %96 = vector.broadcast %95 : vector<8x1xf32> to vector<8x32xf32>
    %97 = arith.subf %89, %96 : vector<8x32xf32>
    %98 = arith.mulf %97, %97 : vector<8x32xf32>
    %cst_36 = arith.constant dense<0.000000e+00> : vector<8xf32>
    %99 = vector.multi_reduction <add>, %98, %cst_36 [1] : vector<8x32xf32> to vector<8xf32>
    %100 = vector.shape_cast %99 : vector<8xf32> to vector<8x1xf32>
    %cst_37 = arith.constant 3.200000e+01 : f32
    %101 = vector.broadcast %cst_37 : f32 to vector<8x1xf32>
    %102 = arith.divf %100, %101 : vector<8x1xf32>
    %cst_38 = arith.constant 9.99999974E-6 : f32
    %103 = vector.broadcast %cst_38 : f32 to vector<8x1xf32>
    %104 = arith.addf %102, %103 : vector<8x1xf32>
    %105 = math.rsqrt %104 : vector<8x1xf32>
    %106 = vector.broadcast %105 : vector<8x1xf32> to vector<8x32xf32>
    %107 = arith.mulf %97, %106 : vector<8x32xf32>
    %108 = vector.broadcast %90 : vector<1x32xf32> to vector<8x32xf32>
    %109 = arith.mulf %107, %108 : vector<8x32xf32>
    %110 = vector.broadcast %91 : vector<1x32xf32> to vector<8x32xf32>
    %111 = arith.addf %109, %110 : vector<8x32xf32>
    %c0_39 = arith.constant 0 : index
    %c0_40 = arith.constant 0 : index
    %112 = vector.load %arg8[%c0_39, %c0_40] : memref<32x64xf32, #tpu.memory_space<vmem>>, vector<32x64xf32>
    %cst_41 = arith.constant dense<0.000000e+00> : vector<8x64xf32>
    %113 = tpu.matmul %111, %112, %cst_41 {dimension_numbers = #tpu.dot_dimension_numbers<[1], [0], [0], [1], [0, 0, 1, 1], [], []>} : vector<8x32xf32>, vector<32x64xf32>, vector<8x64xf32> -> vector<8x64xf32>
    %c0_42 = arith.constant 0 : index
    %c0_43 = arith.constant 0 : index
    %114 = vector.load %arg9[%c0_42, %c0_43] : memref<1x64xf32, #tpu.memory_space<vmem>>, vector<1x64xf32>
    %115 = vector.broadcast %114 : vector<1x64xf32> to vector<8x64xf32>
    %116 = arith.addf %113, %115 : vector<8x64xf32>
    %cst_44 = arith.constant 0.000000e+00 : f32
    %117 = vector.broadcast %cst_44 : f32 to vector<8x64xf32>
    %118 = arith.maximumf %116, %117 : vector<8x64xf32>
    %c0_45 = arith.constant 0 : index
    %c0_46 = arith.constant 0 : index
    %119 = vector.load %arg10[%c0_45, %c0_46] : memref<64x32xf32, #tpu.memory_space<vmem>>, vector<64x32xf32>
    %cst_47 = arith.constant dense<0.000000e+00> : vector<8x32xf32>
    %120 = tpu.matmul %118, %119, %cst_47 {dimension_numbers = #tpu.dot_dimension_numbers<[1], [0], [0], [1], [0, 0, 1, 1], [], []>} : vector<8x64xf32>, vector<64x32xf32>, vector<8x32xf32> -> vector<8x32xf32>
    %c0_48 = arith.constant 0 : index
    %c0_49 = arith.constant 0 : index
    %121 = vector.load %arg11[%c0_48, %c0_49] : memref<1x32xf32, #tpu.memory_space<vmem>>, vector<1x32xf32>
    %122 = vector.broadcast %121 : vector<1x32xf32> to vector<8x32xf32>
    %123 = arith.addf %120, %122 : vector<8x32xf32>
    %124 = arith.addf %111, %123 : vector<8x32xf32>
    %c0_50 = arith.constant 0 : index
    %c0_51 = arith.constant 0 : index
    %125 = vector.load %arg12[%c0_50, %c0_51] : memref<1x32xf32, #tpu.memory_space<vmem>>, vector<1x32xf32>
    %c0_52 = arith.constant 0 : index
    %c0_53 = arith.constant 0 : index
    %126 = vector.load %arg13[%c0_52, %c0_53] : memref<1x32xf32, #tpu.memory_space<vmem>>, vector<1x32xf32>
    %cst_54 = arith.constant dense<0.000000e+00> : vector<8xf32>
    %127 = vector.multi_reduction <add>, %124, %cst_54 [1] : vector<8x32xf32> to vector<8xf32>
    %128 = vector.shape_cast %127 : vector<8xf32> to vector<8x1xf32>
    %cst_55 = arith.constant 3.200000e+01 : f32
    %129 = vector.broadcast %cst_55 : f32 to vector<8x1xf32>
    %130 = arith.divf %128, %129 : vector<8x1xf32>
    %131 = vector.broadcast %130 : vector<8x1xf32> to vector<8x32xf32>
    %132 = arith.subf %124, %131 : vector<8x32xf32>
    %133 = arith.mulf %132, %132 : vector<8x32xf32>
    %cst_56 = arith.constant dense<0.000000e+00> : vector<8xf32>
    %134 = vector.multi_reduction <add>, %133, %cst_56 [1] : vector<8x32xf32> to vector<8xf32>
    %135 = vector.shape_cast %134 : vector<8xf32> to vector<8x1xf32>
    %cst_57 = arith.constant 3.200000e+01 : f32
    %136 = vector.broadcast %cst_57 : f32 to vector<8x1xf32>
    %137 = arith.divf %135, %136 : vector<8x1xf32>
    %cst_58 = arith.constant 9.99999974E-6 : f32
    %138 = vector.broadcast %cst_58 : f32 to vector<8x1xf32>
    %139 = arith.addf %137, %138 : vector<8x1xf32>
    %140 = math.rsqrt %139 : vector<8x1xf32>
    %141 = vector.broadcast %140 : vector<8x1xf32> to vector<8x32xf32>
    %142 = arith.mulf %132, %141 : vector<8x32xf32>
    %143 = vector.broadcast %125 : vector<1x32xf32> to vector<8x32xf32>
    %144 = arith.mulf %142, %143 : vector<8x32xf32>
    %145 = vector.broadcast %126 : vector<1x32xf32> to vector<8x32xf32>
    %146 = arith.addf %144, %145 : vector<8x32xf32>
    %c0_59 = arith.constant 0 : index
    %c0_60 = arith.constant 0 : index
    %c0_61 = arith.constant 0 : index
    %147 = vector.load %arg14[%c0_59, %c0_60, %c0_61] : memref<1x8x32xf32, #tpu.memory_space<vmem>>, vector<1x8x32xf32>
    %148 = vector.shape_cast %147 : vector<1x8x32xf32> to vector<8x32xf32>
    %149 = vector.shape_cast %146 : vector<8x32xf32> to vector<1x8x32xf32>
    tpu.vector_store %arg14[%c0_59, %c0_60, %c0_61], %149 {strides = array<i32>} : memref<1x8x32xf32, #tpu.memory_space<vmem>>, vector<1x8x32xf32>,
    return
  }
  func.func @transform_0(%arg0: i32) -> (i32, i32, i32) {
    %c0_i32 = arith.constant 0 : i32
    %c0_i32_0 = arith.constant 0 : i32
    %c0_i32_1 = arith.constant 0 : i32
    return %arg0, %c0_i32, %c0_i32_0 : i32, i32, i32
  }
  func.func @transform_1(%arg0: i32) -> (i32, i32) {
    %c0_i32 = arith.constant 0 : i32
    %c0_i32_0 = arith.constant 0 : i32
    %c0_i32_1 = arith.constant 0 : i32
    return %c0_i32, %c0_i32_0 : i32, i32
  }
  func.func @transform_2(%arg0: i32) -> (i32, i32) {
    %c0_i32 = arith.constant 0 : i32
    %c0_i32_0 = arith.constant 0 : i32
    %c0_i32_1 = arith.constant 0 : i32
    return %c0_i32, %c0_i32_0 : i32, i32
  }
  func.func @transform_3(%arg0: i32) -> (i32, i32) {
    %c0_i32 = arith.constant 0 : i32
    %c0_i32_0 = arith.constant 0 : i32
    %c0_i32_1 = arith.constant 0 : i32
    return %c0_i32, %c0_i32_0 : i32, i32
  }
  func.func @transform_4(%arg0: i32) -> (i32, i32) {
    %c0_i32 = arith.constant 0 : i32
    %c0_i32_0 = arith.constant 0 : i32
    %c0_i32_1 = arith.constant 0 : i32
    return %c0_i32, %c0_i32_0 : i32, i32
  }
  func.func @transform_5(%arg0: i32) -> (i32, i32) {
    %c0_i32 = arith.constant 0 : i32
    %c0_i32_0 = arith.constant 0 : i32
    %c0_i32_1 = arith.constant 0 : i32
    return %c0_i32, %c0_i32_0 : i32, i32
  }
  func.func @transform_6(%arg0: i32) -> (i32, i32) {
    %c0_i32 = arith.constant 0 : i32
    %c0_i32_0 = arith.constant 0 : i32
    %c0_i32_1 = arith.constant 0 : i32
    return %c0_i32, %c0_i32_0 : i32, i32
  }
  func.func @transform_7(%arg0: i32) -> (i32, i32) {
    %c0_i32 = arith.constant 0 : i32
    %c0_i32_0 = arith.constant 0 : i32
    %c0_i32_1 = arith.constant 0 : i32
    return %c0_i32, %c0_i32_0 : i32, i32
  }
  func.func @transform_8(%arg0: i32) -> (i32, i32) {
    %c0_i32 = arith.constant 0 : i32
    %c0_i32_0 = arith.constant 0 : i32
    %c0_i32_1 = arith.constant 0 : i32
    return %c0_i32, %c0_i32_0 : i32, i32
  }
  func.func @transform_9(%arg0: i32) -> (i32, i32) {
    %c0_i32 = arith.constant 0 : i32
    %c0_i32_0 = arith.constant 0 : i32
    %c0_i32_1 = arith.constant 0 : i32
    return %c0_i32, %c0_i32_0 : i32, i32
  }
  func.func @transform_10(%arg0: i32) -> (i32, i32) {
    %c0_i32 = arith.constant 0 : i32
    %c0_i32_0 = arith.constant 0 : i32
    %c0_i32_1 = arith.constant 0 : i32
    return %c0_i32, %c0_i32_0 : i32, i32
  }
  func.func @transform_11(%arg0: i32) -> (i32, i32) {
    %c0_i32 = arith.constant 0 : i32
    %c0_i32_0 = arith.constant 0 : i32
    %c0_i32_1 = arith.constant 0 : i32
    return %c0_i32, %c0_i32_0 : i32, i32
  }
  func.func @transform_12(%arg0: i32) -> (i32, i32) {
    %c0_i32 = arith.constant 0 : i32
    %c0_i32_0 = arith.constant 0 : i32
    %c0_i32_1 = arith.constant 0 : i32
    return %c0_i32, %c0_i32_0 : i32, i32
  }
  func.func @transform_13(%arg0: i32) -> (i32, i32, i32) {
    %c0_i32 = arith.constant 0 : i32
    %c0_i32_0 = arith.constant 0 : i32
    %c0_i32_1 = arith.constant 0 : i32
    return %arg0, %c0_i32, %c0_i32_0 : i32, i32, i32
  }
}

module attributes {stable_mosaic.version = 11 : i64} {
  func.func @_final_kernel(%arg0: i32, %arg1: memref<16x32xf32, #tpu.memory_space<vmem>>, %arg2: memref<1x32xf32, #tpu.memory_space<vmem>>, %arg3: memref<1x32xf32, #tpu.memory_space<vmem>>, %arg4: memref<32x128xf32, #tpu.memory_space<vmem>>, %arg5: memref<1x128xf32, #tpu.memory_space<vmem>>, %arg6: memref<16x128xf32, #tpu.memory_space<vmem>>) attributes {dimension_semantics = [#tpu.dimension_semantics<arbitrary>], iteration_bounds = array<i64: 1>, scalar_prefetch = 0 : i64, scratch_operands = 0 : i64, tpu.core_type = #tpu.core_type<tc>, window_params = [{pipeline_mode = #tpu.pipeline_mode<synchronous>, transform_indices = @transform_0, window_bounds = array<i64: 16, 32>}, {pipeline_mode = #tpu.pipeline_mode<synchronous>, transform_indices = @transform_1, window_bounds = array<i64: 1, 32>}, {pipeline_mode = #tpu.pipeline_mode<synchronous>, transform_indices = @transform_2, window_bounds = array<i64: 1, 32>}, {pipeline_mode = #tpu.pipeline_mode<synchronous>, transform_indices = @transform_3, window_bounds = array<i64: 32, 128>}, {pipeline_mode = #tpu.pipeline_mode<synchronous>, transform_indices = @transform_4, window_bounds = array<i64: 1, 128>}, {pipeline_mode = #tpu.pipeline_mode<synchronous>, transform_indices = @transform_5, window_bounds = array<i64: 16, 128>}]} {
    %c0 = arith.constant 0 : index
    %c0_0 = arith.constant 0 : index
    %0 = vector.load %arg1[%c0, %c0_0] : memref<16x32xf32, #tpu.memory_space<vmem>>, vector<16x32xf32>
    %c0_1 = arith.constant 0 : index
    %c0_2 = arith.constant 0 : index
    %1 = vector.load %arg2[%c0_1, %c0_2] : memref<1x32xf32, #tpu.memory_space<vmem>>, vector<1x32xf32>
    %c0_3 = arith.constant 0 : index
    %c0_4 = arith.constant 0 : index
    %2 = vector.load %arg3[%c0_3, %c0_4] : memref<1x32xf32, #tpu.memory_space<vmem>>, vector<1x32xf32>
    %cst = arith.constant dense<0.000000e+00> : vector<16xf32>
    %3 = vector.multi_reduction <add>, %0, %cst [1] : vector<16x32xf32> to vector<16xf32>
    %4 = vector.shape_cast %3 : vector<16xf32> to vector<16x1xf32>
    %cst_5 = arith.constant 3.200000e+01 : f32
    %5 = vector.broadcast %cst_5 : f32 to vector<16x1xf32>
    %6 = arith.divf %4, %5 : vector<16x1xf32>
    %7 = vector.broadcast %6 : vector<16x1xf32> to vector<16x32xf32>
    %8 = arith.subf %0, %7 : vector<16x32xf32>
    %9 = arith.mulf %8, %8 : vector<16x32xf32>
    %cst_6 = arith.constant dense<0.000000e+00> : vector<16xf32>
    %10 = vector.multi_reduction <add>, %9, %cst_6 [1] : vector<16x32xf32> to vector<16xf32>
    %11 = vector.shape_cast %10 : vector<16xf32> to vector<16x1xf32>
    %cst_7 = arith.constant 3.200000e+01 : f32
    %12 = vector.broadcast %cst_7 : f32 to vector<16x1xf32>
    %13 = arith.divf %11, %12 : vector<16x1xf32>
    %cst_8 = arith.constant 9.99999974E-6 : f32
    %14 = vector.broadcast %cst_8 : f32 to vector<16x1xf32>
    %15 = arith.addf %13, %14 : vector<16x1xf32>
    %16 = math.rsqrt %15 : vector<16x1xf32>
    %17 = vector.broadcast %16 : vector<16x1xf32> to vector<16x32xf32>
    %18 = arith.mulf %8, %17 : vector<16x32xf32>
    %19 = vector.broadcast %1 : vector<1x32xf32> to vector<16x32xf32>
    %20 = arith.mulf %18, %19 : vector<16x32xf32>
    %21 = vector.broadcast %2 : vector<1x32xf32> to vector<16x32xf32>
    %22 = arith.addf %20, %21 : vector<16x32xf32>
    %c0_9 = arith.constant 0 : index
    %c0_10 = arith.constant 0 : index
    %23 = vector.load %arg4[%c0_9, %c0_10] : memref<32x128xf32, #tpu.memory_space<vmem>>, vector<32x128xf32>
    %cst_11 = arith.constant dense<0.000000e+00> : vector<16x128xf32>
    %24 = tpu.matmul %22, %23, %cst_11 {dimension_numbers = #tpu.dot_dimension_numbers<[1], [0], [0], [1], [0, 0, 1, 1], [], []>} : vector<16x32xf32>, vector<32x128xf32>, vector<16x128xf32> -> vector<16x128xf32>
    %c0_12 = arith.constant 0 : index
    %c0_13 = arith.constant 0 : index
    %25 = vector.load %arg5[%c0_12, %c0_13] : memref<1x128xf32, #tpu.memory_space<vmem>>, vector<1x128xf32>
    %26 = vector.broadcast %25 : vector<1x128xf32> to vector<16x128xf32>
    %27 = arith.addf %24, %26 : vector<16x128xf32>
    %c0_14 = arith.constant 0 : index
    %c0_15 = arith.constant 0 : index
    %28 = vector.load %arg6[%c0_14, %c0_15] : memref<16x128xf32, #tpu.memory_space<vmem>>, vector<16x128xf32>
    tpu.vector_store %arg6[%c0_14, %c0_15], %27 {strides = array<i32>} : memref<16x128xf32, #tpu.memory_space<vmem>>, vector<16x128xf32>,
    return
  }
  func.func @transform_0(%arg0: i32) -> (i32, i32) {
    %c0_i32 = arith.constant 0 : i32
    %c0_i32_0 = arith.constant 0 : i32
    %c0_i32_1 = arith.constant 0 : i32
    return %c0_i32, %c0_i32_0 : i32, i32
  }
  func.func @transform_1(%arg0: i32) -> (i32, i32) {
    %c0_i32 = arith.constant 0 : i32
    %c0_i32_0 = arith.constant 0 : i32
    %c0_i32_1 = arith.constant 0 : i32
    return %c0_i32, %c0_i32_0 : i32, i32
  }
  func.func @transform_2(%arg0: i32) -> (i32, i32) {
    %c0_i32 = arith.constant 0 : i32
    %c0_i32_0 = arith.constant 0 : i32
    %c0_i32_1 = arith.constant 0 : i32
    return %c0_i32, %c0_i32_0 : i32, i32
  }
  func.func @transform_3(%arg0: i32) -> (i32, i32) {
    %c0_i32 = arith.constant 0 : i32
    %c0_i32_0 = arith.constant 0 : i32
    %c0_i32_1 = arith.constant 0 : i32
    return %c0_i32, %c0_i32_0 : i32, i32
  }
  func.func @transform_4(%arg0: i32) -> (i32, i32) {
    %c0_i32 = arith.constant 0 : i32
    %c0_i32_0 = arith.constant 0 : i32
    %c0_i32_1 = arith.constant 0 : i32
    return %c0_i32, %c0_i32_0 : i32, i32
  }
  func.func @transform_5(%arg0: i32) -> (i32, i32) {
    %c0_i32 = arith.constant 0 : i32
    %c0_i32_0 = arith.constant 0 : i32
    %c0_i32_1 = arith.constant 0 : i32
    return %c0_i32, %c0_i32_0 : i32, i32
  }
}

module attributes {stable_mosaic.version = 11 : i64} {
  func.func @_decoder_layer_kernel(%arg0: i32, %arg1: memref<1x8x32xf32, #tpu.memory_space<vmem>>, %arg2: memref<1x8x32xf32, #tpu.memory_space<vmem>>, %arg3: memref<32x96xf32, #tpu.memory_space<vmem>>, %arg4: memref<1x96xf32, #tpu.memory_space<vmem>>, %arg5: memref<32x32xf32, #tpu.memory_space<vmem>>, %arg6: memref<1x32xf32, #tpu.memory_space<vmem>>, %arg7: memref<1x32xf32, #tpu.memory_space<vmem>>, %arg8: memref<1x32xf32, #tpu.memory_space<vmem>>, %arg9: memref<32x32xf32, #tpu.memory_space<vmem>>, %arg10: memref<1x32xf32, #tpu.memory_space<vmem>>, %arg11: memref<32x64xf32, #tpu.memory_space<vmem>>, %arg12: memref<1x64xf32, #tpu.memory_space<vmem>>, %arg13: memref<32x32xf32, #tpu.memory_space<vmem>>, %arg14: memref<1x32xf32, #tpu.memory_space<vmem>>, %arg15: memref<1x32xf32, #tpu.memory_space<vmem>>, %arg16: memref<1x32xf32, #tpu.memory_space<vmem>>, %arg17: memref<32x64xf32, #tpu.memory_space<vmem>>, %arg18: memref<1x64xf32, #tpu.memory_space<vmem>>, %arg19: memref<64x32xf32, #tpu.memory_space<vmem>>, %arg20: memref<1x32xf32, #tpu.memory_space<vmem>>, %arg21: memref<1x32xf32, #tpu.memory_space<vmem>>, %arg22: memref<1x32xf32, #tpu.memory_space<vmem>>, %arg23: memref<1x8x32xf32, #tpu.memory_space<vmem>>) attributes {dimension_semantics = [#tpu.dimension_semantics<parallel>], iteration_bounds = array<i64: 2>, scalar_prefetch = 0 : i64, scratch_operands = 0 : i64, tpu.core_type = #tpu.core_type<tc>, window_params = [{transform_indices = @transform_0, window_bounds = array<i64: 1, 8, 32>}, {transform_indices = @transform_1, window_bounds = array<i64: 1, 8, 32>}, {pipeline_mode = #tpu.pipeline_mode<synchronous>, transform_indices = @transform_2, window_bounds = array<i64: 32, 96>}, {pipeline_mode = #tpu.pipeline_mode<synchronous>, transform_indices = @transform_3, window_bounds = array<i64: 1, 96>}, {pipeline_mode = #tpu.pipeline_mode<synchronous>, transform_indices = @transform_4, window_bounds = array<i64: 32, 32>}, {pipeline_mode = #tpu.pipeline_mode<synchronous>, transform_indices = @transform_5, window_bounds = array<i64: 1, 32>}, {pipeline_mode = #tpu.pipeline_mode<synchronous>, transform_indices = @transform_6, window_bounds = array<i64: 1, 32>}, {pipeline_mode = #tpu.pipeline_mode<synchronous>, transform_indices = @transform_7, window_bounds = array<i64: 1, 32>}, {pipeline_mode = #tpu.pipeline_mode<synchronous>, transform_indices = @transform_8, window_bounds = array<i64: 32, 32>}, {pipeline_mode = #tpu.pipeline_mode<synchronous>, transform_indices = @transform_9, window_bounds = array<i64: 1, 32>}, {pipeline_mode = #tpu.pipeline_mode<synchronous>, transform_indices = @transform_10, window_bounds = array<i64: 32, 64>}, {pipeline_mode = #tpu.pipeline_mode<synchronous>, transform_indices = @transform_11, window_bounds = array<i64: 1, 64>}, {pipeline_mode = #tpu.pipeline_mode<synchronous>, transform_indices = @transform_12, window_bounds = array<i64: 32, 32>}, {pipeline_mode = #tpu.pipeline_mode<synchronous>, transform_indices = @transform_13, window_bounds = array<i64: 1, 32>}, {pipeline_mode = #tpu.pipeline_mode<synchronous>, transform_indices = @transform_14, window_bounds = array<i64: 1, 32>}, {pipeline_mode = #tpu.pipeline_mode<synchronous>, transform_indices = @transform_15, window_bounds = array<i64: 1, 32>}, {pipeline_mode = #tpu.pipeline_mode<synchronous>, transform_indices = @transform_16, window_bounds = array<i64: 32, 64>}, {pipeline_mode = #tpu.pipeline_mode<synchronous>, transform_indices = @transform_17, window_bounds = array<i64: 1, 64>}, {pipeline_mode = #tpu.pipeline_mode<synchronous>, transform_indices = @transform_18, window_bounds = array<i64: 64, 32>}, {pipeline_mode = #tpu.pipeline_mode<synchronous>, transform_indices = @transform_19, window_bounds = array<i64: 1, 32>}, {pipeline_mode = #tpu.pipeline_mode<synchronous>, transform_indices = @transform_20, window_bounds = array<i64: 1, 32>}, {pipeline_mode = #tpu.pipeline_mode<synchronous>, transform_indices = @transform_21, window_bounds = array<i64: 1, 32>}, {transform_indices = @transform_22, window_bounds = array<i64: 1, 8, 32>}]} {
    %c0 = arith.constant 0 : index
    %c0_0 = arith.constant 0 : index
    %c0_1 = arith.constant 0 : index
    %0 = vector.load %arg1[%c0, %c0_0, %c0_1] : memref<1x8x32xf32, #tpu.memory_space<vmem>>, vector<1x8x32xf32>
    %1 = vector.shape_cast %0 : vector<1x8x32xf32> to vector<8x32xf32>
    %c0_2 = arith.constant 0 : index
    %c0_3 = arith.constant 0 : index
    %c0_4 = arith.constant 0 : index
    %2 = vector.load %arg2[%c0_2, %c0_3, %c0_4] : memref<1x8x32xf32, #tpu.memory_space<vmem>>, vector<1x8x32xf32>
    %3 = vector.shape_cast %2 : vector<1x8x32xf32> to vector<8x32xf32>
    %c0_5 = arith.constant 0 : index
    %c0_6 = arith.constant 0 : index
    %4 = vector.load %arg3[%c0_5, %c0_6] : memref<32x96xf32, #tpu.memory_space<vmem>>, vector<32x96xf32>
    %cst = arith.constant dense<0.000000e+00> : vector<8x96xf32>
    %5 = tpu.matmul %1, %4, %cst {dimension_numbers = #tpu.dot_dimension_numbers<[1], [0], [0], [1], [0, 0, 1, 1], [], []>} : vector<8x32xf32>, vector<32x96xf32>, vector<8x96xf32> -> vector<8x96xf32>
    %c0_7 = arith.constant 0 : index
    %c0_8 = arith.constant 0 : index
    %6 = vector.load %arg4[%c0_7, %c0_8] : memref<1x96xf32, #tpu.memory_space<vmem>>, vector<1x96xf32>
    %7 = vector.broadcast %6 : vector<1x96xf32> to vector<8x96xf32>
    %8 = arith.addf %5, %7 : vector<8x96xf32>
    %9 = vector.extract_strided_slice %8 {offsets = [0, 0], sizes = [8, 32], strides = [1, 1]} : vector<8x96xf32> to vector<8x32xf32>
    %10 = vector.extract_strided_slice %8 {offsets = [0, 32], sizes = [8, 32], strides = [1, 1]} : vector<8x96xf32> to vector<8x32xf32>
    %11 = vector.extract_strided_slice %8 {offsets = [0, 64], sizes = [8, 32], strides = [1, 1]} : vector<8x96xf32> to vector<8x32xf32>
    %c0_9 = arith.constant 0 : index
    %c0_10 = arith.constant 0 : index
    %12 = vector.load %arg5[%c0_9, %c0_10] : memref<32x32xf32, #tpu.memory_space<vmem>>, vector<32x32xf32>
    %c0_11 = arith.constant 0 : index
    %c0_12 = arith.constant 0 : index
    %13 = vector.load %arg6[%c0_11, %c0_12] : memref<1x32xf32, #tpu.memory_space<vmem>>, vector<1x32xf32>
    %14 = vector.extract_strided_slice %9 {offsets = [0, 0], sizes = [8, 8], strides = [1, 1]} : vector<8x32xf32> to vector<8x8xf32>
    %15 = vector.extract_strided_slice %10 {offsets = [0, 0], sizes = [8, 8], strides = [1, 1]} : vector<8x32xf32> to vector<8x8xf32>
    %16 = tpu.transpose %15, [1, 0] : vector<8x8xf32> -> vector<8x8xf32>
    %cst_13 = arith.constant dense<0.000000e+00> : vector<8x8xf32>
    %17 = tpu.matmul %14, %16, %cst_13 {dimension_numbers = #tpu.dot_dimension_numbers<[1], [0], [0], [1], [0, 0, 1, 1], [], []>} : vector<8x8xf32>, vector<8x8xf32>, vector<8x8xf32> -> vector<8x8xf32>
    %cst_14 = arith.constant dense<0xFF800000> : vector<8xf32>
    %18 = vector.multi_reduction <maximumf>, %17, %cst_14 [1] : vector<8x8xf32> to vector<8xf32>
    %19 = vector.shape_cast %18 : vector<8xf32> to vector<8x1xf32>
    %20 = vector.broadcast %19 : vector<8x1xf32> to vector<8x8xf32>
    %21 = arith.subf %17, %20 : vector<8x8xf32>
    %22 = math.exp %21 : vector<8x8xf32>
    %cst_15 = arith.constant dense<0.000000e+00> : vector<8xf32>
    %23 = vector.multi_reduction <add>, %22, %cst_15 [1] : vector<8x8xf32> to vector<8xf32>
    %24 = vector.shape_cast %23 : vector<8xf32> to vector<8x1xf32>
    %25 = tpu.reciprocal %24 {approx = true} : vector<8x1xf32> -> vector<8x1xf32>
    %26 = vector.broadcast %25 : vector<8x1xf32> to vector<8x8xf32>
    %27 = arith.mulf %22, %26 : vector<8x8xf32>
    %28 = vector.extract_strided_slice %11 {offsets = [0, 0], sizes = [8, 8], strides = [1, 1]} : vector<8x32xf32> to vector<8x8xf32>
    %cst_16 = arith.constant dense<0.000000e+00> : vector<8x8xf32>
    %29 = tpu.matmul %27, %28, %cst_16 {dimension_numbers = #tpu.dot_dimension_numbers<[1], [0], [0], [1], [0, 0, 1, 1], [], []>} : vector<8x8xf32>, vector<8x8xf32>, vector<8x8xf32> -> vector<8x8xf32>
    %30 = vector.extract_strided_slice %12 {offsets = [0, 0], sizes = [8, 32], strides = [1, 1]} : vector<32x32xf32> to vector<8x32xf32>
    %cst_17 = arith.constant dense<0.000000e+00> : vector<8x32xf32>
    %31 = tpu.matmul %29, %30, %cst_17 {dimension_numbers = #tpu.dot_dimension_numbers<[1], [0], [0], [1], [0, 0, 1, 1], [], []>} : vector<8x8xf32>, vector<8x32xf32>, vector<8x32xf32> -> vector<8x32xf32>
    %32 = vector.extract_strided_slice %9 {offsets = [0, 8], sizes = [8, 8], strides = [1, 1]} : vector<8x32xf32> to vector<8x8xf32>
    %33 = vector.extract_strided_slice %10 {offsets = [0, 8], sizes = [8, 8], strides = [1, 1]} : vector<8x32xf32> to vector<8x8xf32>
    %34 = tpu.transpose %33, [1, 0] : vector<8x8xf32> -> vector<8x8xf32>
    %cst_18 = arith.constant dense<0.000000e+00> : vector<8x8xf32>
    %35 = tpu.matmul %32, %34, %cst_18 {dimension_numbers = #tpu.dot_dimension_numbers<[1], [0], [0], [1], [0, 0, 1, 1], [], []>} : vector<8x8xf32>, vector<8x8xf32>, vector<8x8xf32> -> vector<8x8xf32>
    %cst_19 = arith.constant dense<0xFF800000> : vector<8xf32>
    %36 = vector.multi_reduction <maximumf>, %35, %cst_19 [1] : vector<8x8xf32> to vector<8xf32>
    %37 = vector.shape_cast %36 : vector<8xf32> to vector<8x1xf32>
    %38 = vector.broadcast %37 : vector<8x1xf32> to vector<8x8xf32>
    %39 = arith.subf %35, %38 : vector<8x8xf32>
    %40 = math.exp %39 : vector<8x8xf32>
    %cst_20 = arith.constant dense<0.000000e+00> : vector<8xf32>
    %41 = vector.multi_reduction <add>, %40, %cst_20 [1] : vector<8x8xf32> to vector<8xf32>
    %42 = vector.shape_cast %41 : vector<8xf32> to vector<8x1xf32>
    %43 = tpu.reciprocal %42 {approx = true} : vector<8x1xf32> -> vector<8x1xf32>
    %44 = vector.broadcast %43 : vector<8x1xf32> to vector<8x8xf32>
    %45 = arith.mulf %40, %44 : vector<8x8xf32>
    %46 = vector.extract_strided_slice %11 {offsets = [0, 8], sizes = [8, 8], strides = [1, 1]} : vector<8x32xf32> to vector<8x8xf32>
    %cst_21 = arith.constant dense<0.000000e+00> : vector<8x8xf32>
    %47 = tpu.matmul %45, %46, %cst_21 {dimension_numbers = #tpu.dot_dimension_numbers<[1], [0], [0], [1], [0, 0, 1, 1], [], []>} : vector<8x8xf32>, vector<8x8xf32>, vector<8x8xf32> -> vector<8x8xf32>
    %48 = vector.extract_strided_slice %12 {offsets = [8, 0], sizes = [8, 32], strides = [1, 1]} : vector<32x32xf32> to vector<8x32xf32>
    %cst_22 = arith.constant dense<0.000000e+00> : vector<8x32xf32>
    %49 = tpu.matmul %47, %48, %cst_22 {dimension_numbers = #tpu.dot_dimension_numbers<[1], [0], [0], [1], [0, 0, 1, 1], [], []>} : vector<8x8xf32>, vector<8x32xf32>, vector<8x32xf32> -> vector<8x32xf32>
    %50 = arith.addf %31, %49 : vector<8x32xf32>
    %51 = vector.extract_strided_slice %9 {offsets = [0, 16], sizes = [8, 8], strides = [1, 1]} : vector<8x32xf32> to vector<8x8xf32>
    %52 = vector.extract_strided_slice %10 {offsets = [0, 16], sizes = [8, 8], strides = [1, 1]} : vector<8x32xf32> to vector<8x8xf32>
    %53 = tpu.transpose %52, [1, 0] : vector<8x8xf32> -> vector<8x8xf32>
    %cst_23 = arith.constant dense<0.000000e+00> : vector<8x8xf32>
    %54 = tpu.matmul %51, %53, %cst_23 {dimension_numbers = #tpu.dot_dimension_numbers<[1], [0], [0], [1], [0, 0, 1, 1], [], []>} : vector<8x8xf32>, vector<8x8xf32>, vector<8x8xf32> -> vector<8x8xf32>
    %cst_24 = arith.constant dense<0xFF800000> : vector<8xf32>
    %55 = vector.multi_reduction <maximumf>, %54, %cst_24 [1] : vector<8x8xf32> to vector<8xf32>
    %56 = vector.shape_cast %55 : vector<8xf32> to vector<8x1xf32>
    %57 = vector.broadcast %56 : vector<8x1xf32> to vector<8x8xf32>
    %58 = arith.subf %54, %57 : vector<8x8xf32>
    %59 = math.exp %58 : vector<8x8xf32>
    %cst_25 = arith.constant dense<0.000000e+00> : vector<8xf32>
    %60 = vector.multi_reduction <add>, %59, %cst_25 [1] : vector<8x8xf32> to vector<8xf32>
    %61 = vector.shape_cast %60 : vector<8xf32> to vector<8x1xf32>
    %62 = tpu.reciprocal %61 {approx = true} : vector<8x1xf32> -> vector<8x1xf32>
    %63 = vector.broadcast %62 : vector<8x1xf32> to vector<8x8xf32>
    %64 = arith.mulf %59, %63 : vector<8x8xf32>
    %65 = vector.extract_strided_slice %11 {offsets = [0, 16], sizes = [8, 8], strides = [1, 1]} : vector<8x32xf32> to vector<8x8xf32>
    %cst_26 = arith.constant dense<0.000000e+00> : vector<8x8xf32>
    %66 = tpu.matmul %64, %65, %cst_26 {dimension_numbers = #tpu.dot_dimension_numbers<[1], [0], [0], [1], [0, 0, 1, 1], [], []>} : vector<8x8xf32>, vector<8x8xf32>, vector<8x8xf32> -> vector<8x8xf32>
    %67 = vector.extract_strided_slice %12 {offsets = [16, 0], sizes = [8, 32], strides = [1, 1]} : vector<32x32xf32> to vector<8x32xf32>
    %cst_27 = arith.constant dense<0.000000e+00> : vector<8x32xf32>
    %68 = tpu.matmul %66, %67, %cst_27 {dimension_numbers = #tpu.dot_dimension_numbers<[1], [0], [0], [1], [0, 0, 1, 1], [], []>} : vector<8x8xf32>, vector<8x32xf32>, vector<8x32xf32> -> vector<8x32xf32>
    %69 = arith.addf %50, %68 : vector<8x32xf32>
    %70 = vector.extract_strided_slice %9 {offsets = [0, 24], sizes = [8, 8], strides = [1, 1]} : vector<8x32xf32> to vector<8x8xf32>
    %71 = vector.extract_strided_slice %10 {offsets = [0, 24], sizes = [8, 8], strides = [1, 1]} : vector<8x32xf32> to vector<8x8xf32>
    %72 = tpu.transpose %71, [1, 0] : vector<8x8xf32> -> vector<8x8xf32>
    %cst_28 = arith.constant dense<0.000000e+00> : vector<8x8xf32>
    %73 = tpu.matmul %70, %72, %cst_28 {dimension_numbers = #tpu.dot_dimension_numbers<[1], [0], [0], [1], [0, 0, 1, 1], [], []>} : vector<8x8xf32>, vector<8x8xf32>, vector<8x8xf32> -> vector<8x8xf32>
    %cst_29 = arith.constant dense<0xFF800000> : vector<8xf32>
    %74 = vector.multi_reduction <maximumf>, %73, %cst_29 [1] : vector<8x8xf32> to vector<8xf32>
    %75 = vector.shape_cast %74 : vector<8xf32> to vector<8x1xf32>
    %76 = vector.broadcast %75 : vector<8x1xf32> to vector<8x8xf32>
    %77 = arith.subf %73, %76 : vector<8x8xf32>
    %78 = math.exp %77 : vector<8x8xf32>
    %cst_30 = arith.constant dense<0.000000e+00> : vector<8xf32>
    %79 = vector.multi_reduction <add>, %78, %cst_30 [1] : vector<8x8xf32> to vector<8xf32>
    %80 = vector.shape_cast %79 : vector<8xf32> to vector<8x1xf32>
    %81 = tpu.reciprocal %80 {approx = true} : vector<8x1xf32> -> vector<8x1xf32>
    %82 = vector.broadcast %81 : vector<8x1xf32> to vector<8x8xf32>
    %83 = arith.mulf %78, %82 : vector<8x8xf32>
    %84 = vector.extract_strided_slice %11 {offsets = [0, 24], sizes = [8, 8], strides = [1, 1]} : vector<8x32xf32> to vector<8x8xf32>
    %cst_31 = arith.constant dense<0.000000e+00> : vector<8x8xf32>
    %85 = tpu.matmul %83, %84, %cst_31 {dimension_numbers = #tpu.dot_dimension_numbers<[1], [0], [0], [1], [0, 0, 1, 1], [], []>} : vector<8x8xf32>, vector<8x8xf32>, vector<8x8xf32> -> vector<8x8xf32>
    %86 = vector.extract_strided_slice %12 {offsets = [24, 0], sizes = [8, 32], strides = [1, 1]} : vector<32x32xf32> to vector<8x32xf32>
    %cst_32 = arith.constant dense<0.000000e+00> : vector<8x32xf32>
    %87 = tpu.matmul %85, %86, %cst_32 {dimension_numbers = #tpu.dot_dimension_numbers<[1], [0], [0], [1], [0, 0, 1, 1], [], []>} : vector<8x8xf32>, vector<8x32xf32>, vector<8x32xf32> -> vector<8x32xf32>
    %88 = arith.addf %69, %87 : vector<8x32xf32>
    %89 = vector.broadcast %13 : vector<1x32xf32> to vector<8x32xf32>
    %90 = arith.addf %88, %89 : vector<8x32xf32>
    %91 = arith.addf %1, %90 : vector<8x32xf32>
    %c0_33 = arith.constant 0 : index
    %c0_34 = arith.constant 0 : index
    %92 = vector.load %arg7[%c0_33, %c0_34] : memref<1x32xf32, #tpu.memory_space<vmem>>, vector<1x32xf32>
    %c0_35 = arith.constant 0 : index
    %c0_36 = arith.constant 0 : index
    %93 = vector.load %arg8[%c0_35, %c0_36] : memref<1x32xf32, #tpu.memory_space<vmem>>, vector<1x32xf32>
    %cst_37 = arith.constant dense<0.000000e+00> : vector<8xf32>
    %94 = vector.multi_reduction <add>, %91, %cst_37 [1] : vector<8x32xf32> to vector<8xf32>
    %95 = vector.shape_cast %94 : vector<8xf32> to vector<8x1xf32>
    %cst_38 = arith.constant 3.200000e+01 : f32
    %96 = vector.broadcast %cst_38 : f32 to vector<8x1xf32>
    %97 = arith.divf %95, %96 : vector<8x1xf32>
    %98 = vector.broadcast %97 : vector<8x1xf32> to vector<8x32xf32>
    %99 = arith.subf %91, %98 : vector<8x32xf32>
    %100 = arith.mulf %99, %99 : vector<8x32xf32>
    %cst_39 = arith.constant dense<0.000000e+00> : vector<8xf32>
    %101 = vector.multi_reduction <add>, %100, %cst_39 [1] : vector<8x32xf32> to vector<8xf32>
    %102 = vector.shape_cast %101 : vector<8xf32> to vector<8x1xf32>
    %cst_40 = arith.constant 3.200000e+01 : f32
    %103 = vector.broadcast %cst_40 : f32 to vector<8x1xf32>
    %104 = arith.divf %102, %103 : vector<8x1xf32>
    %cst_41 = arith.constant 9.99999974E-6 : f32
    %105 = vector.broadcast %cst_41 : f32 to vector<8x1xf32>
    %106 = arith.addf %104, %105 : vector<8x1xf32>
    %107 = math.rsqrt %106 : vector<8x1xf32>
    %108 = vector.broadcast %107 : vector<8x1xf32> to vector<8x32xf32>
    %109 = arith.mulf %99, %108 : vector<8x32xf32>
    %110 = vector.broadcast %92 : vector<1x32xf32> to vector<8x32xf32>
    %111 = arith.mulf %109, %110 : vector<8x32xf32>
    %112 = vector.broadcast %93 : vector<1x32xf32> to vector<8x32xf32>
    %113 = arith.addf %111, %112 : vector<8x32xf32>
    %c0_42 = arith.constant 0 : index
    %c0_43 = arith.constant 0 : index
    %114 = vector.load %arg9[%c0_42, %c0_43] : memref<32x32xf32, #tpu.memory_space<vmem>>, vector<32x32xf32>
    %cst_44 = arith.constant dense<0.000000e+00> : vector<8x32xf32>
    %115 = tpu.matmul %113, %114, %cst_44 {dimension_numbers = #tpu.dot_dimension_numbers<[1], [0], [0], [1], [0, 0, 1, 1], [], []>} : vector<8x32xf32>, vector<32x32xf32>, vector<8x32xf32> -> vector<8x32xf32>
    %c0_45 = arith.constant 0 : index
    %c0_46 = arith.constant 0 : index
    %116 = vector.load %arg10[%c0_45, %c0_46] : memref<1x32xf32, #tpu.memory_space<vmem>>, vector<1x32xf32>
    %117 = vector.broadcast %116 : vector<1x32xf32> to vector<8x32xf32>
    %118 = arith.addf %115, %117 : vector<8x32xf32>
    %c0_47 = arith.constant 0 : index
    %c0_48 = arith.constant 0 : index
    %119 = vector.load %arg11[%c0_47, %c0_48] : memref<32x64xf32, #tpu.memory_space<vmem>>, vector<32x64xf32>
    %cst_49 = arith.constant dense<0.000000e+00> : vector<8x64xf32>
    %120 = tpu.matmul %3, %119, %cst_49 {dimension_numbers = #tpu.dot_dimension_numbers<[1], [0], [0], [1], [0, 0, 1, 1], [], []>} : vector<8x32xf32>, vector<32x64xf32>, vector<8x64xf32> -> vector<8x64xf32>
    %c0_50 = arith.constant 0 : index
    %c0_51 = arith.constant 0 : index
    %121 = vector.load %arg12[%c0_50, %c0_51] : memref<1x64xf32, #tpu.memory_space<vmem>>, vector<1x64xf32>
    %122 = vector.broadcast %121 : vector<1x64xf32> to vector<8x64xf32>
    %123 = arith.addf %120, %122 : vector<8x64xf32>
    %124 = vector.extract_strided_slice %123 {offsets = [0, 0], sizes = [8, 32], strides = [1, 1]} : vector<8x64xf32> to vector<8x32xf32>
    %125 = vector.extract_strided_slice %123 {offsets = [0, 32], sizes = [8, 32], strides = [1, 1]} : vector<8x64xf32> to vector<8x32xf32>
    %c0_52 = arith.constant 0 : index
    %c0_53 = arith.constant 0 : index
    %126 = vector.load %arg13[%c0_52, %c0_53] : memref<32x32xf32, #tpu.memory_space<vmem>>, vector<32x32xf32>
    %c0_54 = arith.constant 0 : index
    %c0_55 = arith.constant 0 : index
    %127 = vector.load %arg14[%c0_54, %c0_55] : memref<1x32xf32, #tpu.memory_space<vmem>>, vector<1x32xf32>
    %128 = vector.extract_strided_slice %118 {offsets = [0, 0], sizes = [8, 8], strides = [1, 1]} : vector<8x32xf32> to vector<8x8xf32>
    %129 = vector.extract_strided_slice %124 {offsets = [0, 0], sizes = [8, 8], strides = [1, 1]} : vector<8x32xf32> to vector<8x8xf32>
    %130 = tpu.transpose %129, [1, 0] : vector<8x8xf32> -> vector<8x8xf32>
    %cst_56 = arith.constant dense<0.000000e+00> : vector<8x8xf32>
    %131 = tpu.matmul %128, %130, %cst_56 {dimension_numbers = #tpu.dot_dimension_numbers<[1], [0], [0], [1], [0, 0, 1, 1], [], []>} : vector<8x8xf32>, vector<8x8xf32>, vector<8x8xf32> -> vector<8x8xf32>
    %cst_57 = arith.constant dense<0xFF800000> : vector<8xf32>
    %132 = vector.multi_reduction <maximumf>, %131, %cst_57 [1] : vector<8x8xf32> to vector<8xf32>
    %133 = vector.shape_cast %132 : vector<8xf32> to vector<8x1xf32>
    %134 = vector.broadcast %133 : vector<8x1xf32> to vector<8x8xf32>
    %135 = arith.subf %131, %134 : vector<8x8xf32>
    %136 = math.exp %135 : vector<8x8xf32>
    %cst_58 = arith.constant dense<0.000000e+00> : vector<8xf32>
    %137 = vector.multi_reduction <add>, %136, %cst_58 [1] : vector<8x8xf32> to vector<8xf32>
    %138 = vector.shape_cast %137 : vector<8xf32> to vector<8x1xf32>
    %139 = tpu.reciprocal %138 {approx = true} : vector<8x1xf32> -> vector<8x1xf32>
    %140 = vector.broadcast %139 : vector<8x1xf32> to vector<8x8xf32>
    %141 = arith.mulf %136, %140 : vector<8x8xf32>
    %142 = vector.extract_strided_slice %125 {offsets = [0, 0], sizes = [8, 8], strides = [1, 1]} : vector<8x32xf32> to vector<8x8xf32>
    %cst_59 = arith.constant dense<0.000000e+00> : vector<8x8xf32>
    %143 = tpu.matmul %141, %142, %cst_59 {dimension_numbers = #tpu.dot_dimension_numbers<[1], [0], [0], [1], [0, 0, 1, 1], [], []>} : vector<8x8xf32>, vector<8x8xf32>, vector<8x8xf32> -> vector<8x8xf32>
    %144 = vector.extract_strided_slice %126 {offsets = [0, 0], sizes = [8, 32], strides = [1, 1]} : vector<32x32xf32> to vector<8x32xf32>
    %cst_60 = arith.constant dense<0.000000e+00> : vector<8x32xf32>
    %145 = tpu.matmul %143, %144, %cst_60 {dimension_numbers = #tpu.dot_dimension_numbers<[1], [0], [0], [1], [0, 0, 1, 1], [], []>} : vector<8x8xf32>, vector<8x32xf32>, vector<8x32xf32> -> vector<8x32xf32>
    %146 = vector.extract_strided_slice %118 {offsets = [0, 8], sizes = [8, 8], strides = [1, 1]} : vector<8x32xf32> to vector<8x8xf32>
    %147 = vector.extract_strided_slice %124 {offsets = [0, 8], sizes = [8, 8], strides = [1, 1]} : vector<8x32xf32> to vector<8x8xf32>
    %148 = tpu.transpose %147, [1, 0] : vector<8x8xf32> -> vector<8x8xf32>
    %cst_61 = arith.constant dense<0.000000e+00> : vector<8x8xf32>
    %149 = tpu.matmul %146, %148, %cst_61 {dimension_numbers = #tpu.dot_dimension_numbers<[1], [0], [0], [1], [0, 0, 1, 1], [], []>} : vector<8x8xf32>, vector<8x8xf32>, vector<8x8xf32> -> vector<8x8xf32>
    %cst_62 = arith.constant dense<0xFF800000> : vector<8xf32>
    %150 = vector.multi_reduction <maximumf>, %149, %cst_62 [1] : vector<8x8xf32> to vector<8xf32>
    %151 = vector.shape_cast %150 : vector<8xf32> to vector<8x1xf32>
    %152 = vector.broadcast %151 : vector<8x1xf32> to vector<8x8xf32>
    %153 = arith.subf %149, %152 : vector<8x8xf32>
    %154 = math.exp %153 : vector<8x8xf32>
    %cst_63 = arith.constant dense<0.000000e+00> : vector<8xf32>
    %155 = vector.multi_reduction <add>, %154, %cst_63 [1] : vector<8x8xf32> to vector<8xf32>
    %156 = vector.shape_cast %155 : vector<8xf32> to vector<8x1xf32>
    %157 = tpu.reciprocal %156 {approx = true} : vector<8x1xf32> -> vector<8x1xf32>
    %158 = vector.broadcast %157 : vector<8x1xf32> to vector<8x8xf32>
    %159 = arith.mulf %154, %158 : vector<8x8xf32>
    %160 = vector.extract_strided_slice %125 {offsets = [0, 8], sizes = [8, 8], strides = [1, 1]} : vector<8x32xf32> to vector<8x8xf32>
    %cst_64 = arith.constant dense<0.000000e+00> : vector<8x8xf32>
    %161 = tpu.matmul %159, %160, %cst_64 {dimension_numbers = #tpu.dot_dimension_numbers<[1], [0], [0], [1], [0, 0, 1, 1], [], []>} : vector<8x8xf32>, vector<8x8xf32>, vector<8x8xf32> -> vector<8x8xf32>
    %162 = vector.extract_strided_slice %126 {offsets = [8, 0], sizes = [8, 32], strides = [1, 1]} : vector<32x32xf32> to vector<8x32xf32>
    %cst_65 = arith.constant dense<0.000000e+00> : vector<8x32xf32>
    %163 = tpu.matmul %161, %162, %cst_65 {dimension_numbers = #tpu.dot_dimension_numbers<[1], [0], [0], [1], [0, 0, 1, 1], [], []>} : vector<8x8xf32>, vector<8x32xf32>, vector<8x32xf32> -> vector<8x32xf32>
    %164 = arith.addf %145, %163 : vector<8x32xf32>
    %165 = vector.extract_strided_slice %118 {offsets = [0, 16], sizes = [8, 8], strides = [1, 1]} : vector<8x32xf32> to vector<8x8xf32>
    %166 = vector.extract_strided_slice %124 {offsets = [0, 16], sizes = [8, 8], strides = [1, 1]} : vector<8x32xf32> to vector<8x8xf32>
    %167 = tpu.transpose %166, [1, 0] : vector<8x8xf32> -> vector<8x8xf32>
    %cst_66 = arith.constant dense<0.000000e+00> : vector<8x8xf32>
    %168 = tpu.matmul %165, %167, %cst_66 {dimension_numbers = #tpu.dot_dimension_numbers<[1], [0], [0], [1], [0, 0, 1, 1], [], []>} : vector<8x8xf32>, vector<8x8xf32>, vector<8x8xf32> -> vector<8x8xf32>
    %cst_67 = arith.constant dense<0xFF800000> : vector<8xf32>
    %169 = vector.multi_reduction <maximumf>, %168, %cst_67 [1] : vector<8x8xf32> to vector<8xf32>
    %170 = vector.shape_cast %169 : vector<8xf32> to vector<8x1xf32>
    %171 = vector.broadcast %170 : vector<8x1xf32> to vector<8x8xf32>
    %172 = arith.subf %168, %171 : vector<8x8xf32>
    %173 = math.exp %172 : vector<8x8xf32>
    %cst_68 = arith.constant dense<0.000000e+00> : vector<8xf32>
    %174 = vector.multi_reduction <add>, %173, %cst_68 [1] : vector<8x8xf32> to vector<8xf32>
    %175 = vector.shape_cast %174 : vector<8xf32> to vector<8x1xf32>
    %176 = tpu.reciprocal %175 {approx = true} : vector<8x1xf32> -> vector<8x1xf32>
    %177 = vector.broadcast %176 : vector<8x1xf32> to vector<8x8xf32>
    %178 = arith.mulf %173, %177 : vector<8x8xf32>
    %179 = vector.extract_strided_slice %125 {offsets = [0, 16], sizes = [8, 8], strides = [1, 1]} : vector<8x32xf32> to vector<8x8xf32>
    %cst_69 = arith.constant dense<0.000000e+00> : vector<8x8xf32>
    %180 = tpu.matmul %178, %179, %cst_69 {dimension_numbers = #tpu.dot_dimension_numbers<[1], [0], [0], [1], [0, 0, 1, 1], [], []>} : vector<8x8xf32>, vector<8x8xf32>, vector<8x8xf32> -> vector<8x8xf32>
    %181 = vector.extract_strided_slice %126 {offsets = [16, 0], sizes = [8, 32], strides = [1, 1]} : vector<32x32xf32> to vector<8x32xf32>
    %cst_70 = arith.constant dense<0.000000e+00> : vector<8x32xf32>
    %182 = tpu.matmul %180, %181, %cst_70 {dimension_numbers = #tpu.dot_dimension_numbers<[1], [0], [0], [1], [0, 0, 1, 1], [], []>} : vector<8x8xf32>, vector<8x32xf32>, vector<8x32xf32> -> vector<8x32xf32>
    %183 = arith.addf %164, %182 : vector<8x32xf32>
    %184 = vector.extract_strided_slice %118 {offsets = [0, 24], sizes = [8, 8], strides = [1, 1]} : vector<8x32xf32> to vector<8x8xf32>
    %185 = vector.extract_strided_slice %124 {offsets = [0, 24], sizes = [8, 8], strides = [1, 1]} : vector<8x32xf32> to vector<8x8xf32>
    %186 = tpu.transpose %185, [1, 0] : vector<8x8xf32> -> vector<8x8xf32>
    %cst_71 = arith.constant dense<0.000000e+00> : vector<8x8xf32>
    %187 = tpu.matmul %184, %186, %cst_71 {dimension_numbers = #tpu.dot_dimension_numbers<[1], [0], [0], [1], [0, 0, 1, 1], [], []>} : vector<8x8xf32>, vector<8x8xf32>, vector<8x8xf32> -> vector<8x8xf32>
    %cst_72 = arith.constant dense<0xFF800000> : vector<8xf32>
    %188 = vector.multi_reduction <maximumf>, %187, %cst_72 [1] : vector<8x8xf32> to vector<8xf32>
    %189 = vector.shape_cast %188 : vector<8xf32> to vector<8x1xf32>
    %190 = vector.broadcast %189 : vector<8x1xf32> to vector<8x8xf32>
    %191 = arith.subf %187, %190 : vector<8x8xf32>
    %192 = math.exp %191 : vector<8x8xf32>
    %cst_73 = arith.constant dense<0.000000e+00> : vector<8xf32>
    %193 = vector.multi_reduction <add>, %192, %cst_73 [1] : vector<8x8xf32> to vector<8xf32>
    %194 = vector.shape_cast %193 : vector<8xf32> to vector<8x1xf32>
    %195 = tpu.reciprocal %194 {approx = true} : vector<8x1xf32> -> vector<8x1xf32>
    %196 = vector.broadcast %195 : vector<8x1xf32> to vector<8x8xf32>
    %197 = arith.mulf %192, %196 : vector<8x8xf32>
    %198 = vector.extract_strided_slice %125 {offsets = [0, 24], sizes = [8, 8], strides = [1, 1]} : vector<8x32xf32> to vector<8x8xf32>
    %cst_74 = arith.constant dense<0.000000e+00> : vector<8x8xf32>
    %199 = tpu.matmul %197, %198, %cst_74 {dimension_numbers = #tpu.dot_dimension_numbers<[1], [0], [0], [1], [0, 0, 1, 1], [], []>} : vector<8x8xf32>, vector<8x8xf32>, vector<8x8xf32> -> vector<8x8xf32>
    %200 = vector.extract_strided_slice %126 {offsets = [24, 0], sizes = [8, 32], strides = [1, 1]} : vector<32x32xf32> to vector<8x32xf32>
    %cst_75 = arith.constant dense<0.000000e+00> : vector<8x32xf32>
    %201 = tpu.matmul %199, %200, %cst_75 {dimension_numbers = #tpu.dot_dimension_numbers<[1], [0], [0], [1], [0, 0, 1, 1], [], []>} : vector<8x8xf32>, vector<8x32xf32>, vector<8x32xf32> -> vector<8x32xf32>
    %202 = arith.addf %183, %201 : vector<8x32xf32>
    %203 = vector.broadcast %127 : vector<1x32xf32> to vector<8x32xf32>
    %204 = arith.addf %202, %203 : vector<8x32xf32>
    %205 = arith.addf %113, %204 : vector<8x32xf32>
    %c0_76 = arith.constant 0 : index
    %c0_77 = arith.constant 0 : index
    %206 = vector.load %arg15[%c0_76, %c0_77] : memref<1x32xf32, #tpu.memory_space<vmem>>, vector<1x32xf32>
    %c0_78 = arith.constant 0 : index
    %c0_79 = arith.constant 0 : index
    %207 = vector.load %arg16[%c0_78, %c0_79] : memref<1x32xf32, #tpu.memory_space<vmem>>, vector<1x32xf32>
    %cst_80 = arith.constant dense<0.000000e+00> : vector<8xf32>
    %208 = vector.multi_reduction <add>, %205, %cst_80 [1] : vector<8x32xf32> to vector<8xf32>
    %209 = vector.shape_cast %208 : vector<8xf32> to vector<8x1xf32>
    %cst_81 = arith.constant 3.200000e+01 : f32
    %210 = vector.broadcast %cst_81 : f32 to vector<8x1xf32>
    %211 = arith.divf %209, %210 : vector<8x1xf32>
    %212 = vector.broadcast %211 : vector<8x1xf32> to vector<8x32xf32>
    %213 = arith.subf %205, %212 : vector<8x32xf32>
    %214 = arith.mulf %213, %213 : vector<8x32xf32>
    %cst_82 = arith.constant dense<0.000000e+00> : vector<8xf32>
    %215 = vector.multi_reduction <add>, %214, %cst_82 [1] : vector<8x32xf32> to vector<8xf32>
    %216 = vector.shape_cast %215 : vector<8xf32> to vector<8x1xf32>
    %cst_83 = arith.constant 3.200000e+01 : f32
    %217 = vector.broadcast %cst_83 : f32 to vector<8x1xf32>
    %218 = arith.divf %216, %217 : vector<8x1xf32>
    %cst_84 = arith.constant 9.99999974E-6 : f32
    %219 = vector.broadcast %cst_84 : f32 to vector<8x1xf32>
    %220 = arith.addf %218, %219 : vector<8x1xf32>
    %221 = math.rsqrt %220 : vector<8x1xf32>
    %222 = vector.broadcast %221 : vector<8x1xf32> to vector<8x32xf32>
    %223 = arith.mulf %213, %222 : vector<8x32xf32>
    %224 = vector.broadcast %206 : vector<1x32xf32> to vector<8x32xf32>
    %225 = arith.mulf %223, %224 : vector<8x32xf32>
    %226 = vector.broadcast %207 : vector<1x32xf32> to vector<8x32xf32>
    %227 = arith.addf %225, %226 : vector<8x32xf32>
    %c0_85 = arith.constant 0 : index
    %c0_86 = arith.constant 0 : index
    %228 = vector.load %arg17[%c0_85, %c0_86] : memref<32x64xf32, #tpu.memory_space<vmem>>, vector<32x64xf32>
    %cst_87 = arith.constant dense<0.000000e+00> : vector<8x64xf32>
    %229 = tpu.matmul %227, %228, %cst_87 {dimension_numbers = #tpu.dot_dimension_numbers<[1], [0], [0], [1], [0, 0, 1, 1], [], []>} : vector<8x32xf32>, vector<32x64xf32>, vector<8x64xf32> -> vector<8x64xf32>
    %c0_88 = arith.constant 0 : index
    %c0_89 = arith.constant 0 : index
    %230 = vector.load %arg18[%c0_88, %c0_89] : memref<1x64xf32, #tpu.memory_space<vmem>>, vector<1x64xf32>
    %231 = vector.broadcast %230 : vector<1x64xf32> to vector<8x64xf32>
    %232 = arith.addf %229, %231 : vector<8x64xf32>
    %cst_90 = arith.constant 0.000000e+00 : f32
    %233 = vector.broadcast %cst_90 : f32 to vector<8x64xf32>
    %234 = arith.maximumf %232, %233 : vector<8x64xf32>
    %c0_91 = arith.constant 0 : index
    %c0_92 = arith.constant 0 : index
    %235 = vector.load %arg19[%c0_91, %c0_92] : memref<64x32xf32, #tpu.memory_space<vmem>>, vector<64x32xf32>
    %cst_93 = arith.constant dense<0.000000e+00> : vector<8x32xf32>
    %236 = tpu.matmul %234, %235, %cst_93 {dimension_numbers = #tpu.dot_dimension_numbers<[1], [0], [0], [1], [0, 0, 1, 1], [], []>} : vector<8x64xf32>, vector<64x32xf32>, vector<8x32xf32> -> vector<8x32xf32>
    %c0_94 = arith.constant 0 : index
    %c0_95 = arith.constant 0 : index
    %237 = vector.load %arg20[%c0_94, %c0_95] : memref<1x32xf32, #tpu.memory_space<vmem>>, vector<1x32xf32>
    %238 = vector.broadcast %237 : vector<1x32xf32> to vector<8x32xf32>
    %239 = arith.addf %236, %238 : vector<8x32xf32>
    %240 = arith.addf %227, %239 : vector<8x32xf32>
    %c0_96 = arith.constant 0 : index
    %c0_97 = arith.constant 0 : index
    %241 = vector.load %arg21[%c0_96, %c0_97] : memref<1x32xf32, #tpu.memory_space<vmem>>, vector<1x32xf32>
    %c0_98 = arith.constant 0 : index
    %c0_99 = arith.constant 0 : index
    %242 = vector.load %arg22[%c0_98, %c0_99] : memref<1x32xf32, #tpu.memory_space<vmem>>, vector<1x32xf32>
    %cst_100 = arith.constant dense<0.000000e+00> : vector<8xf32>
    %243 = vector.multi_reduction <add>, %240, %cst_100 [1] : vector<8x32xf32> to vector<8xf32>
    %244 = vector.shape_cast %243 : vector<8xf32> to vector<8x1xf32>
    %cst_101 = arith.constant 3.200000e+01 : f32
    %245 = vector.broadcast %cst_101 : f32 to vector<8x1xf32>
    %246 = arith.divf %244, %245 : vector<8x1xf32>
    %247 = vector.broadcast %246 : vector<8x1xf32> to vector<8x32xf32>
    %248 = arith.subf %240, %247 : vector<8x32xf32>
    %249 = arith.mulf %248, %248 : vector<8x32xf32>
    %cst_102 = arith.constant dense<0.000000e+00> : vector<8xf32>
    %250 = vector.multi_reduction <add>, %249, %cst_102 [1] : vector<8x32xf32> to vector<8xf32>
    %251 = vector.shape_cast %250 : vector<8xf32> to vector<8x1xf32>
    %cst_103 = arith.constant 3.200000e+01 : f32
    %252 = vector.broadcast %cst_103 : f32 to vector<8x1xf32>
    %253 = arith.divf %251, %252 : vector<8x1xf32>
    %cst_104 = arith.constant 9.99999974E-6 : f32
    %254 = vector.broadcast %cst_104 : f32 to vector<8x1xf32>
    %255 = arith.addf %253, %254 : vector<8x1xf32>
    %256 = math.rsqrt %255 : vector<8x1xf32>
    %257 = vector.broadcast %256 : vector<8x1xf32> to vector<8x32xf32>
    %258 = arith.mulf %248, %257 : vector<8x32xf32>
    %259 = vector.broadcast %241 : vector<1x32xf32> to vector<8x32xf32>
    %260 = arith.mulf %258, %259 : vector<8x32xf32>
    %261 = vector.broadcast %242 : vector<1x32xf32> to vector<8x32xf32>
    %262 = arith.addf %260, %261 : vector<8x32xf32>
    %c0_105 = arith.constant 0 : index
    %c0_106 = arith.constant 0 : index
    %c0_107 = arith.constant 0 : index
    %263 = vector.load %arg23[%c0_105, %c0_106, %c0_107] : memref<1x8x32xf32, #tpu.memory_space<vmem>>, vector<1x8x32xf32>
    %264 = vector.shape_cast %263 : vector<1x8x32xf32> to vector<8x32xf32>
    %265 = vector.shape_cast %262 : vector<8x32xf32> to vector<1x8x32xf32>
    tpu.vector_store %arg23[%c0_105, %c0_106, %c0_107], %265 {strides = array<i32>} : memref<1x8x32xf32, #tpu.memory_space<vmem>>, vector<1x8x32xf32>,
    return
  }
  func.func @transform_0(%arg0: i32) -> (i32, i32, i32) {
    %c0_i32 = arith.constant 0 : i32
    %c0_i32_0 = arith.constant 0 : i32
    %c0_i32_1 = arith.constant 0 : i32
    return %arg0, %c0_i32, %c0_i32_0 : i32, i32, i32
  }
  func.func @transform_1(%arg0: i32) -> (i32, i32, i32) {
    %c0_i32 = arith.constant 0 : i32
    %c0_i32_0 = arith.constant 0 : i32
    %c0_i32_1 = arith.constant 0 : i32
    return %arg0, %c0_i32, %c0_i32_0 : i32, i32, i32
  }
  func.func @transform_2(%arg0: i32) -> (i32, i32) {
    %c0_i32 = arith.constant 0 : i32
    %c0_i32_0 = arith.constant 0 : i32
    %c0_i32_1 = arith.constant 0 : i32
    return %c0_i32, %c0_i32_0 : i32, i32
  }
  func.func @transform_3(%arg0: i32) -> (i32, i32) {
    %c0_i32 = arith.constant 0 : i32
    %c0_i32_0 = arith.constant 0 : i32
    %c0_i32_1 = arith.constant 0 : i32
    return %c0_i32, %c0_i32_0 : i32, i32
  }
  func.func @transform_4(%arg0: i32) -> (i32, i32) {
    %c0_i32 = arith.constant 0 : i32
    %c0_i32_0 = arith.constant 0 : i32
    %c0_i32_1 = arith.constant 0 : i32
    return %c0_i32, %c0_i32_0 : i32, i32
  }
  func.func @transform_5(%arg0: i32) -> (i32, i32) {
    %c0_i32 = arith.constant 0 : i32
    %c0_i32_0 = arith.constant 0 : i32
    %c0_i32_1 = arith.constant 0 : i32
    return %c0_i32, %c0_i32_0 : i32, i32
  }
  func.func @transform_6(%arg0: i32) -> (i32, i32) {
    %c0_i32 = arith.constant 0 : i32
    %c0_i32_0 = arith.constant 0 : i32
    %c0_i32_1 = arith.constant 0 : i32
    return %c0_i32, %c0_i32_0 : i32, i32
  }
  func.func @transform_7(%arg0: i32) -> (i32, i32) {
    %c0_i32 = arith.constant 0 : i32
    %c0_i32_0 = arith.constant 0 : i32
    %c0_i32_1 = arith.constant 0 : i32
    return %c0_i32, %c0_i32_0 : i32, i32
  }
  func.func @transform_8(%arg0: i32) -> (i32, i32) {
    %c0_i32 = arith.constant 0 : i32
    %c0_i32_0 = arith.constant 0 : i32
    %c0_i32_1 = arith.constant 0 : i32
    return %c0_i32, %c0_i32_0 : i32, i32
  }
  func.func @transform_9(%arg0: i32) -> (i32, i32) {
    %c0_i32 = arith.constant 0 : i32
    %c0_i32_0 = arith.constant 0 : i32
    %c0_i32_1 = arith.constant 0 : i32
    return %c0_i32, %c0_i32_0 : i32, i32
  }
  func.func @transform_10(%arg0: i32) -> (i32, i32) {
    %c0_i32 = arith.constant 0 : i32
    %c0_i32_0 = arith.constant 0 : i32
    %c0_i32_1 = arith.constant 0 : i32
    return %c0_i32, %c0_i32_0 : i32, i32
  }
  func.func @transform_11(%arg0: i32) -> (i32, i32) {
    %c0_i32 = arith.constant 0 : i32
    %c0_i32_0 = arith.constant 0 : i32
    %c0_i32_1 = arith.constant 0 : i32
    return %c0_i32, %c0_i32_0 : i32, i32
  }
  func.func @transform_12(%arg0: i32) -> (i32, i32) {
    %c0_i32 = arith.constant 0 : i32
    %c0_i32_0 = arith.constant 0 : i32
    %c0_i32_1 = arith.constant 0 : i32
    return %c0_i32, %c0_i32_0 : i32, i32
  }
  func.func @transform_13(%arg0: i32) -> (i32, i32) {
    %c0_i32 = arith.constant 0 : i32
    %c0_i32_0 = arith.constant 0 : i32
    %c0_i32_1 = arith.constant 0 : i32
    return %c0_i32, %c0_i32_0 : i32, i32
  }
  func.func @transform_14(%arg0: i32) -> (i32, i32) {
    %c0_i32 = arith.constant 0 : i32
    %c0_i32_0 = arith.constant 0 : i32
    %c0_i32_1 = arith.constant 0 : i32
    return %c0_i32, %c0_i32_0 : i32, i32
  }
  func.func @transform_15(%arg0: i32) -> (i32, i32) {
    %c0_i32 = arith.constant 0 : i32
    %c0_i32_0 = arith.constant 0 : i32
    %c0_i32_1 = arith.constant 0 : i32
    return %c0_i32, %c0_i32_0 : i32, i32
  }
  func.func @transform_16(%arg0: i32) -> (i32, i32) {
    %c0_i32 = arith.constant 0 : i32
    %c0_i32_0 = arith.constant 0 : i32
    %c0_i32_1 = arith.constant 0 : i32
    return %c0_i32, %c0_i32_0 : i32, i32
  }
  func.func @transform_17(%arg0: i32) -> (i32, i32) {
    %c0_i32 = arith.constant 0 : i32
    %c0_i32_0 = arith.constant 0 : i32
    %c0_i32_1 = arith.constant 0 : i32
    return %c0_i32, %c0_i32_0 : i32, i32
  }
  func.func @transform_18(%arg0: i32) -> (i32, i32) {
    %c0_i32 = arith.constant 0 : i32
    %c0_i32_0 = arith.constant 0 : i32
    %c0_i32_1 = arith.constant 0 : i32
    return %c0_i32, %c0_i32_0 : i32, i32
  }
  func.func @transform_19(%arg0: i32) -> (i32, i32) {
    %c0_i32 = arith.constant 0 : i32
    %c0_i32_0 = arith.constant 0 : i32
    %c0_i32_1 = arith.constant 0 : i32
    return %c0_i32, %c0_i32_0 : i32, i32
  }
  func.func @transform_20(%arg0: i32) -> (i32, i32) {
    %c0_i32 = arith.constant 0 : i32
    %c0_i32_0 = arith.constant 0 : i32
    %c0_i32_1 = arith.constant 0 : i32
    return %c0_i32, %c0_i32_0 : i32, i32
  }
  func.func @transform_21(%arg0: i32) -> (i32, i32) {
    %c0_i32 = arith.constant 0 : i32
    %c0_i32_0 = arith.constant 0 : i32
    %c0_i32_1 = arith.constant 0 : i32
    return %c0_i32, %c0_i32_0 : i32, i32
  }
  func.func @transform_22(%arg0: i32) -> (i32, i32, i32) {
    %c0_i32 = arith.constant 0 : i32
    %c0_i32_0 = arith.constant 0 : i32
    %c0_i32_1 = arith.constant 0 : i32
    return %arg0, %c0_i32, %c0_i32_0 : i32, i32, i32
  }
}

</mosaic_0001>

<bundles_post_ra>
// kernel: my_transformer_forward.8
= control target key start
LH: loop header
LB: loop body
LE: loop exit
PB: predicated region body
PF: predicated region fallthrough
CT: control target
= control target key end

     0   :  { %vm18_vm0 = vcmask 261120   ;;  %v95_v4 = vmov 32.0   ;;  %s140_s0 = inlined_call_operand.vmem [shape: f32[16,32], index: 0, kind: input, shape index: {}]   ;;  %s141_s1 = inlined_call_operand.vmem [shape: f32[1,32], index: 1, kind: input, shape index: {}]   ;;  %s142_s2 = inlined_call_operand.vmem [shape: f32[1,32], index: 2, kind: input, shape index: {}]   ;;  %s143_s3 = inlined_call_operand.vmem [shape: f32[16,32], index: 3, kind: output, shape index: {}]  }
   0x1   :  { %v14_v0 = vld [vmem:[%s140_s0] sm:$0xff]  ;;  %v15_v2 = vld [vmem:[%s140_s0 + $0x8] sm:$0xff]  ;;  %89 = vrcp.f32 %v95_v4 }
   0x2   :  { %v19_v1 = vsel %vm18_vm0, %v14_v0, 0.0  ;;  %v22_v3 = vsel %vm18_vm0, %v15_v2, 0.0  ;;  %v87_v35 = vld [vmem:[%s141_s1] ss:$0 sm:$0xff] }
   0x3   :  { %20 = vadd.xlane.f32.xlu0 %v19_v1  ;;  %v88_v38 = vld [vmem:[%s142_s2] ss:$0 sm:$0xff] }
   0x7   :  { %v90_v5 = vpop.eup %89 }
   0x8   :  { %v26_v6 = vmul.f32 32.0, %v90_v5  ;;  %vm30_vm1 = vweird.f32 %v90_v5 }
   0xa   :  { %v27_v7 = vsub.f32 1.0, %v26_v6 }
   0xb   :  { %23 = vadd.xlane.f32.xlu0 %v22_v3 }
   0xc   :  { %v28_v8 = vmul.f32 %v90_v5, %v27_v7 }
   0xe   :  { %v29_v9 = vadd.f32 %v90_v5, %v28_v8 }
  0x10   :  { %v31_v10 = vsel %vm30_vm1, %v90_v5, %v29_v9 }
  0x76   :  { %v21_v11 = vpop.xlane.xlu0 %20 }
  0x77   :  { %v32_v12 = vmul.f32 %v31_v10, %v21_v11 }
  0x79   :  { %v34_v13 = vsub.f32 %v14_v0, %v32_v12 }
  0x7b   :  { %v36_v14 = vmul.f32 %v34_v13, %v34_v13 }
  0x7d   :  { %v38_v15 = vsel %vm18_vm0, %v36_v14, 0.0 }
  0x7e   :  { %39 = vadd.xlane.f32.xlu1 %v38_v15  ;;  %v24_v16 = vpop.xlane.xlu0 %23 }
  0x7f   :  { %v33_v17 = vmul.f32 %v31_v10, %v24_v16 }
  0x81   :  { %v35_v18 = vsub.f32 %v15_v2, %v33_v17 }
  0x83   :  { %v37_v19 = vmul.f32 %v35_v18, %v35_v18 }
  0x85   :  { %v41_v20 = vsel %vm18_vm0, %v37_v19, 0.0 }
  0x86   :  { %42 = vadd.xlane.f32.xlu1 %v41_v20 }
  0xf1   :  { %v40_v21 = vpop.xlane.xlu1 %39 }
  0xf2   :  { %v44_v22 = vmul.f32 %v40_v21, %v31_v10 }
  0xf4   :  { %v46_v23 = vadd.f32 1e-05, %v44_v22 }
  0xf6   :  { %91 = vrsqrt.f32 %v46_v23  ;;  %vm54_vm3 = vweird.f32 %v46_v23 }
  0xf9   :  { %v43_v24 = vpop.xlane.xlu1 %42 }
  0xfa   :  { %v45_v25 = vmul.f32 %v43_v24, %v31_v10 }
  0xfc   :  { %v92_v26 = vpop.eup %91  ;;  %v47_v27 = vadd.f32 1e-05, %v45_v25 }
  0xfd   :  { %v49_v28 = vmul.f32 %v92_v26, %v46_v23  ;;  %vm55_vm2 = vweird.f32 %v92_v26 }
  0xfe   :  { %93 = vrsqrt.f32 %v47_v27  ;;  %vm56_vm4 = vmor %vm54_vm3, %vm55_vm2  ;;  %vm64_vm6 = vweird.f32 %v47_v27 }
  0xff   :  { %v50_v29 = vmul.f32 %v92_v26, %v49_v28 }
 0x101   :  { %v51_v30 = vmul.f32 0.5, %v50_v29 }
 0x103   :  { %v52_v31 = vsub.f32 1.5, %v51_v30 }
 0x104   :  { %v94_v32 = vpop.eup %93 }
 0x105   :  { %v53_v33 = vmul.f32 %v92_v26, %v52_v31  ;;  %v59_v34 = vmul.f32 %v94_v32, %v47_v27  ;;  %vm65_vm5 = vweird.f32 %v94_v32 }
 0x106   :  { %vm66_vm7 = vmor %vm64_vm6, %vm65_vm5 }
 0x107   :  { %v57_v36 = vsel %vm56_vm4, %v92_v26, %v53_v33  ;;  %v60_v37 = vmul.f32 %v94_v32, %v59_v34 }
 0x108   :  { %v68_v39 = vmul.f32 %v57_v36, %v34_v13 }
 0x109   :  { %v61_v40 = vmul.f32 0.5, %v60_v37 }
 0x10a   :  { %v73_v41 = vmul.f32 %v87_v35, %v68_v39 }
 0x10b   :  { %v62_v42 = vsub.f32 1.5, %v61_v40 }
 0x10c   :  { %v78_v43 = vadd.f32 %v88_v38, %v73_v41 }
 0x10d   :  { %v63_v44 = vmul.f32 %v94_v32, %v62_v42 }
 0x10e   :  { %80 = vst.msk [vmem:[%s143_s3] sm:$0xff] %vm18_vm0, %v78_v43 }
 0x10f   :  { %v67_v45 = vsel %vm66_vm7, %v94_v32, %v63_v44 }
 0x110   :  { %v69_v46 = vmul.f32 %v67_v45, %v35_v18 }
 0x112   :  { %v74_v47 = vmul.f32 %v87_v35, %v69_v46 }
 0x114   :  { %v79_v48 = vadd.f32 %v88_v38, %v74_v47 }
 0x116   :  { %81 = vst.msk [vmem:[%s143_s3 + $0x8] sm:$0xff] %vm18_vm0, %v79_v48 }

// kernel: my_transformer_forward.11
= control target key start
LH: loop header
LB: loop body
LE: loop exit
PB: predicated region body
PF: predicated region fallthrough
CT: control target
= control target key end

     0   :  { %10 = vsyncpa [#allocation3], 0  ;;  %s301_s0 = inlined_call_operand.vmem [shape: f32[16,32], index: 0, kind: input, shape index: {}]   ;;  %s302_s1 = inlined_call_operand.vmem [shape: f32[1,32], index: 1, kind: input, shape index: {}]   ;;  %s303_s2 = inlined_call_operand.hbm [shape: f32[1,32], index: 2, kind: input, shape index: {}]   ;;  %s304_s3 = inlined_call_operand.vmem [shape: f32[32,128], index: 3, kind: input, shape index: {}]   ;;  %s305_s4 = inlined_call_operand.hbm [shape: f32[1,128], index: 4, kind: input, shape index: {}]   ;;  %s306_s5 = inlined_call_operand.vmem [shape: f32[16,128], index: 5, kind: output, shape index: {}]  }
   0x1   :  { %s21_s20 = sshll.u32 %s303_s2, 4  ;;  %s22_s20 = int_to_ptr.hbm [resolvable:$true] %s21_s20 }
   0x2   :  { %11 = vsyncpa [#allocation5], 0  ;;  %s229_s21 = smov [#allocation2]   ;;  %s34_s25 = sshll.u32 %s305_s4, 4  ;;  %s35_s25 = int_to_ptr.hbm [resolvable:$true] %s34_s25 }
   0x3   :  { %s23_s22 = sshll.u32 %s229_s21, 4  ;;  %s230_s26 = smov [#allocation4]   ;;  %s24_s22 = int_to_ptr.vmem [resolvable:$true] %s23_s22 }
   0x4   :  { %26 = dma.hbm_to_vmem [thread:$0]  %s22_s20, 16, %s24_s22, [#allocation3]  }
   0x5   :  { %s36_s27 = sshll.u32 %s230_s26, 4  ;;  %s37_s27 = int_to_ptr.vmem [resolvable:$true] %s36_s27 }
   0x6   :  { %39 = dma.hbm_to_vmem [thread:$0]  %s35_s25, 16, %s37_s27, [#allocation5]  }
   0x7   :  { %225 = dma.done.wait [#allocation3], 16  }
   0x8   :  { %226 = vsyncadd [#allocation3], 4294967280 }
   0x9   :  { %227 = dma.done.wait [#allocation5], 16  }
   0xa   :  { %228 = vsyncadd [#allocation5], 4294967280  ;;  %vm52_vm0 = vcmask 261120   ;;  %v48_v0 = vld [vmem:[%s301_s0] sm:$0xff]  ;;  %v49_v2 = vld [vmem:[%s301_s0 + $0x8] sm:$0xff]  ;;  %v231_v4 = vmov 32.0  }
   0xb   :  { %v53_v1 = vsel %vm52_vm0, %v48_v0, 0.0  ;;  %v56_v3 = vsel %vm52_vm0, %v49_v2, 0.0  ;;  %171 = vrcp.f32 %v231_v4  ;;  %v117_v21 = vld [vmem:[%s304_s3 + $0x18] sm:$0xff]  ;;  %v116_v22 = vld [vmem:[%s304_s3 + $0x10] sm:$0xff]  ;;  %v115_v23 = vld [vmem:[%s304_s3 + $0x8] sm:$0xff] }
   0xc   :  { %54 = vadd.xlane.f32.xlu0 %v53_v1  ;;  %140 = vmatpush.msra.mxu0 %v117_v21  ;;  %v114_v24 = vld [vmem:[%s304_s3] sm:$0xff] }
   0xd   :  { %161 = vmatpush.msra.mxu1 %v117_v21  ;;  %v168_v39 = vld [vmem:[%s302_s1] ss:$0 sm:$0xff]  ;;  %v170_v53 = vld [vmem:[#allocation4] ss:$0 sm:$0xff] }
   0xe   :  { %141 = vmatpush.msra.mxu0 %v116_v22  ;;  %v169_v43 = vld [vmem:[#allocation2] ss:$0 sm:$0xff] }
   0xf   :  { %162 = vmatpush.msra.mxu1 %v116_v22 }
  0x10   :  { %142 = vmatpush.msra.mxu0 %v115_v23 }
  0x11   :  { %v172_v5 = vpop.eup %171  ;;  %163 = vmatpush.msra.mxu1 %v115_v23 }
  0x12   :  { %v60_v6 = vmul.f32 32.0, %v172_v5  ;;  %vm64_vm1 = vweird.f32 %v172_v5  ;;  %143 = vmatpush.msra.mxu0 %v114_v24 }
  0x13   :  { %164 = vmatpush.msra.mxu1 %v114_v24 }
  0x14   :  { %57 = vadd.xlane.f32.xlu0 %v56_v3  ;;  %v61_v7 = vsub.f32 1.0, %v60_v6 }
  0x16   :  { %v62_v8 = vmul.f32 %v172_v5, %v61_v7 }
  0x18   :  { %v63_v9 = vadd.f32 %v172_v5, %v62_v8 }
  0x1a   :  { %v65_v10 = vsel %vm64_vm1, %v172_v5, %v63_v9 }
  0x7f   :  { %v55_v11 = vpop.xlane.xlu0 %54 }
  0x80   :  { %v66_v12 = vmul.f32 %v65_v10, %v55_v11 }
  0x82   :  { %v68_v13 = vsub.f32 %v48_v0, %v66_v12 }
  0x84   :  { %v70_v14 = vmul.f32 %v68_v13, %v68_v13 }
  0x86   :  { %v72_v15 = vsel %vm52_vm0, %v70_v14, 0.0 }
  0x87   :  { %73 = vadd.xlane.f32.xlu1 %v72_v15  ;;  %v58_v16 = vpop.xlane.xlu0 %57 }
  0x88   :  { %v67_v17 = vmul.f32 %v65_v10, %v58_v16 }
  0x8a   :  { %v69_v18 = vsub.f32 %v49_v2, %v67_v17 }
  0x8c   :  { %v71_v19 = vmul.f32 %v69_v18, %v69_v18 }
  0x8e   :  { %v75_v20 = vsel %vm52_vm0, %v71_v19, 0.0 }
  0x8f   :  { %76 = vadd.xlane.f32.xlu1 %v75_v20 }
  0xfa   :  { %v74_v25 = vpop.xlane.xlu1 %73 }
  0xfb   :  { %v78_v26 = vmul.f32 %v74_v25, %v65_v10 }
  0xfd   :  { %v80_v27 = vadd.f32 1e-05, %v78_v26 }
  0xff   :  { %173 = vrsqrt.f32 %v80_v27  ;;  %vm88_vm3 = vweird.f32 %v80_v27 }
 0x102   :  { %v77_v28 = vpop.xlane.xlu1 %76 }
 0x103   :  { %v79_v29 = vmul.f32 %v77_v28, %v65_v10 }
 0x105   :  { %v174_v30 = vpop.eup %173  ;;  %v81_v31 = vadd.f32 1e-05, %v79_v29 }
 0x106   :  { %v83_v32 = vmul.f32 %v174_v30, %v80_v27  ;;  %vm89_vm2 = vweird.f32 %v174_v30 }
 0x107   :  { %175 = vrsqrt.f32 %v81_v31  ;;  %vm90_vm4 = vmor %vm88_vm3, %vm89_vm2  ;;  %vm98_vm6 = vweird.f32 %v81_v31 }
 0x108   :  { %v84_v33 = vmul.f32 %v174_v30, %v83_v32 }
 0x10a   :  { %v85_v34 = vmul.f32 0.5, %v84_v33 }
 0x10c   :  { %v86_v35 = vsub.f32 1.5, %v85_v34 }
 0x10d   :  { %v176_v36 = vpop.eup %175 }
 0x10e   :  { %v87_v37 = vmul.f32 %v174_v30, %v86_v35  ;;  %v93_v38 = vmul.f32 %v176_v36, %v81_v31  ;;  %vm99_vm5 = vweird.f32 %v176_v36 }
 0x10f   :  { %vm100_vm7 = vmor %vm98_vm6, %vm99_vm5 }
 0x110   :  { %v91_v40 = vsel %vm90_vm4, %v174_v30, %v87_v37  ;;  %v94_v41 = vmul.f32 %v176_v36, %v93_v38 }
 0x111   :  { %v102_v42 = vmul.f32 %v91_v40, %v68_v13 }
 0x112   :  { %v95_v44 = vmul.f32 0.5, %v94_v41 }
 0x113   :  { %v107_v45 = vmul.f32 %v168_v39, %v102_v42 }
 0x114   :  { %v96_v46 = vsub.f32 1.5, %v95_v44 }
 0x115   :  { %v112_v47 = vadd.f32 %v169_v43, %v107_v45 }
 0x116   :  { %v97_v48 = vmul.f32 %v176_v36, %v96_v46 }
 0x117   :  { %159 = vmatmul.msk.f32.vlgmr.msra.gmra.mxu0 %vm52_vm0, %v112_v47 }
 0x118   :  { %v101_v49 = vsel %vm100_vm7, %v176_v36, %v97_v48 }
 0x119   :  { %v103_v50 = vmul.f32 %v101_v49, %v69_v18 }
 0x11b   :  { %v108_v51 = vmul.f32 %v168_v39, %v103_v50 }
 0x11d   :  { %v113_v52 = vadd.f32 %v169_v43, %v108_v51 }
 0x11f   :  { %160 = vmatmul.msk.f32.vlgmr.msra.gmra.mxu1 %vm52_vm0, %v113_v52 }
 0x194   :  { %v145_v54 = vpop.f32.mrf.mxu0 }
 0x195   :  { %v146_v55 = vadd.f32 %v170_v53, %v145_v54 }
 0x197   :  { %151 = vst [vmem:[%s306_s5] sm:$0xff] %v146_v55 }
 0x19c   :  { %v148_v56 = vpop.f32.mrf.mxu1 }
 0x19d   :  { %v149_v57 = vadd.f32 %v170_v53, %v148_v56 }
 0x19f   :  { %152 = vst [vmem:[%s306_s5 + $0x8] sm:$0xff] %v149_v57 }
 0x1a0   :  { %157 = vsyncpa [#allocation3], 1 }
 0x1a1   :  { %158 = vsyncpa [#allocation5], 1 }

// kernel: my_transformer_forward.6
= control target key start
LH: loop header
LB: loop body
LE: loop exit
PB: predicated region body
PF: predicated region fallthrough
CT: control target
= control target key end

     0   :  { %s1195_s25 = smov 0   ;;  %s1358_s0 = inlined_call_operand.vmem [shape: f32[2,8,32], index: 0, kind: input, shape index: {}]   ;;  %s1359_s1 = inlined_call_operand.vmem [shape: f32[32,96], index: 1, kind: input, shape index: {}]   ;;  %s1360_s2 = inlined_call_operand.vmem [shape: f32[1,96], index: 2, kind: input, shape index: {}]   ;;  %s1361_s3 = inlined_call_operand.vmem [shape: f32[32,32], index: 3, kind: input, shape index: {}]   ;;  %s1362_s4 = inlined_call_operand.vmem [shape: f32[1,32], index: 4, kind: input, shape index: {}]   ;;  %s1363_s5 = inlined_call_operand.vmem [shape: f32[1,32], index: 5, kind: input, shape index: {}]   ;;  %s1364_s6 = inlined_call_operand.vmem [shape: f32[1,32], index: 6, kind: input, shape index: {}]   ;;  %s1365_s7 = inlined_call_operand.vmem [shape: f32[32,64], index: 7, kind: input, shape index: {}]   ;;  %s1366_s8 = inlined_call_operand.vmem [shape: f32[1,64], index: 8, kind: input, shape index: {}]   ;;  %s1367_s9 = inlined_call_operand.vmem [shape: f32[64,32], index: 9, kind: input, shape index: {}]   ;;  %s1368_s10 = inlined_call_operand.vmem [shape: f32[1,32], index: 10, kind: input, shape index: {}]   ;;  %s1369_s11 = inlined_call_operand.vmem [shape: f32[1,32], index: 11, kind: input, shape index: {}]   ;;  %s1370_s12 = inlined_call_operand.vmem [shape: f32[1,32], index: 12, kind: input, shape index: {}]   ;;  %s1371_s13 = inlined_call_operand.vmem [shape: f32[2,8,32], index: 13, kind: output, shape index: {}]  }
   0x1 LB: > { %s1027_s26 = sadd.s32 4294967295, %s1111_s25   ;;  %p1031_p0 = scmp.ge.s32.totalorder %s1111_s25, 1  ;;  %s1111_s25 = sphi %s1195_s25, %s23_s25  }
   0x2   : > { %p386_p1 = scmp.lt.s32.totalorder %s1111_s25, 3 }
   0x4   : > { %p387_p2 = pnand %p1031_p0, %p386_p1 }
   0x5   : > { %p428_p3 = scmp.lt.s32.totalorder (!%p387_p2), %s1027_s26, 1  ;;  %s1113_s24 = smov (!%p387_p2), 88  }
   0x6   : > { %390 = sbr.rel (%p387_p2) target bundleno = 2254 (0x8ce), region = 72  ;;  %s1114_s27 = smov (!%p387_p2), 96  }
   0x7   : > { %s1115_s28 = smov (!%p387_p2), 120   ;;  %s1116_s29 = smov (!%p387_p2), 72  }
   0x8   : > { %s1117_s30 = smov (!%p387_p2), 104   ;;  %s1118_s14 = smov (!%p387_p2), 80  }
   0x9   : > { %s1119_s17 = smov (!%p387_p2), 64   ;;  %s1120_s19 = smov (!%p387_p2), 112  }
   0xa   : > { %s1121_s20 = smov (!%p387_p2), 48   ;;  %s1123_s22 = smov (!%p387_p2), 40  }
   0xb   : > { %v440_v0 = vld [vmem:[%s1359_s1 + $0x18] sm:$0xff]  ;;  %v439_v1 = vld [vmem:[%s1359_s1 + $0x10] sm:$0xff]  ;;  %v438_v2 = vld [vmem:[%s1359_s1 + $0x8] sm:$0xff]  ;;  %s1373_s26 = smov (!%p428_p3, %s1027_s26), 1  ;;  %vm445_vm0 = vcmask 261120   ;;  %vm477_vm1 = vcmask 64512  }
   0xc   : > { %461 = vmatpush.msra.mxu0 %v440_v0  ;;  %v437_v3 = vld [vmem:[%s1359_s1] sm:$0xff]  ;;  %s1032_s18 = sshll.u32 %s1373_s26, 3  ;;  %v470_v62 = vld [vmem:[%s1361_s3 + $0x8] sm:$0xff]  ;;  %v471_v63 = vld [vmem:[%s1361_s3 + $0x10] sm:$0xff]  ;;  %vm916_vm6 = vcmask 523264  }
   0xd   : > { %s431_s21 = scalar_lea.vmem %s1358_s0, %s1032_s18  ;;  %v1075_v5 = vld [vmem:[%s1360_s2] ss:$0 sm:$0xff] }
   0xe   : > { %462 = vmatpush.msra.mxu0 %v439_v1  ;;  %v1223_v4 = vld [vmem:[%s431_s21] sm:$0xff]  ;;  %s1122_s21 = smov 56  }
   0xf   : > { %v469_v8 = vld [vmem:[%s1361_s3] sm:$0xff] }
  0x10   : > { %463 = vmatpush.msra.mxu0 %v438_v2  ;;  %645 = vmatpush.msra.mxu3 %v469_v8  ;;  %v472_v2 = vld [vmem:[%s1361_s3 + $0x18] sm:$0xff] }
  0x12   : > { %464 = vmatpush.msra.mxu0 %v437_v3 }
  0x13   : > { %1034 = vmatmul.msk.f32.vlgmr.msra.gmra.mxu0 %vm445_vm0, %v1223_v4 }
  0x90   : > { %v466_v6 = vpop.f32.mrf.mxu0 }
  0x91   : > { %v1230_v7 = vadd.f32 %v1075_v5, %v466_v6 }
  0x93   : > { %541 = vrot.lane.b32.xlu2 %v1230_v7, %s1113_s24  ;;  %475 = vrot.lane.b32.xlu0 %v1230_v7, %s1114_s27 }
  0x9b   : > { %539 = vrot.lane.b32.xlu2 %v1230_v7, %s1115_s28 }
  0xa3   : > { %741 = vrot.lane.b32.xlu2 %v1230_v7, %s1116_s29  ;;  %s435_s29 = scalar_lea.vmem %s1371_s13, %s1032_s18 }
  0xab   : > { %739 = vrot.lane.b32.xlu2 %v1230_v7, %s1117_s30 }
  0xb3   : > { %652 = vrot.lane.b32.xlu2 %v1230_v7, %s1118_s14 }
  0xed   : > { %v542_v9 = vpop.permute.xlu2 %541 }
  0xee   : > { %1038 = vmatpush.xpose.msk.msrb.mxu0 %vm477_vm1, %v542_v9  ;;  %v1076_v9 = vld [vmem:[%s1362_s4] ss:$0 sm:$0xff] }
  0xf5   : > { %v540_v10 = vpop.permute.xlu2 %539 }
  0xf6   : > { %1039 = vmatmul.msk.f32.vlgmr.msrb.gmra.mxu0 %vm477_vm1, %v540_v10 }
  0xfd   : > { %v742_v11 = vpop.permute.xlu2 %741 }
  0xfe   : > { %1047 = vmatpush.xpose.msk.msrb.mxu3 %vm477_vm1, %v742_v11 }
 0x105   : > { %v740_v12 = vpop.permute.xlu2 %739  ;;  %v476_v13 = vpop.permute.xlu0 %475 }
 0x106   : > { %1035 = vmatpush.xpose.msk.msra.mxu1 %vm477_vm1, %v476_v13 }
 0x109   : > { %1036 = vmatmul.msk.f32.vlgmr.msra.gmra.mxu1 %vm477_vm1, %v1230_v7 }
 0x10a   : > { %622 = vmatpush.msrb.mxu1 %v470_v62 }
 0x10c   : > { %733 = vmatpush.msra.mxu1 %v471_v63 }
 0x10d   : > { %v653_v14 = vpop.permute.xlu2 %652 }
 0x10e   : > { %1043 = vmatpush.xpose.msk.msra.mxu0 %vm477_vm1, %v653_v14 }
 0x173   : > { %v564_v15 = vpop.f32.mrf.mxu0 }
 0x174   : > { %v567_v16 = vsel %vm477_vm1, %v564_v15, -inf }
 0x175   : > { %568 = vmax.xlane.f32.xlu2 %v567_v16 }
 0x186   : > { %v499_v17 = vpop.f32.mrf.mxu1 }
 0x187   : > { %v502_v18 = vsel %vm477_vm1, %v499_v17, -inf }
 0x188   : > { %503 = vmax.xlane.f32.xlu0 %v502_v18 }
 0x1e8   : > { %v569_v32 = vpop.xlane.xlu2 %568 }
 0x1e9   : > { %v570_v33 = vsub.f32 %v564_v15, %v569_v32  ;;  %v1124_v15 = vmov 32.0   ;;  %v909_v32 = vld [vmem:[%s1367_s9 + $0x28] sm:$0xff] }
 0x1eb   : > { %v571_v35 = vmul.f32 1.442695, %v570_v33 }
 0x1fb   : > { %v504_v19 = vpop.xlane.xlu0 %503 }
 0x1fc   : > { %v505_v20 = vsub.f32 %v499_v17, %v504_v19 }
 0x1fe   : > { %v506_v21 = vmul.f32 1.442695, %v505_v20 }
 0x200   : > { %1083 = vpow2.f32 %v506_v21 }
 0x206   : > { %v1084_v22 = vpop.eup %1083 }
 0x207   : > { %v508_v23 = vsel %vm477_vm1, %v1084_v22, 0.0 }
 0x208   : > { %509 = vadd.xlane.f32.xlu1 %v508_v23 }
 0x221   : > { %513 = vrot.lane.b32.xlu1 %v1230_v7, %s1119_s17 }
 0x229   : > { %650 = vrot.lane.b32.xlu1 %v1230_v7, %s1120_s19 }
 0x27b   : > { %v510_v24 = vpop.xlane.xlu1 %509 }
 0x27c   : > { %1085 = vrcp.f32 %v510_v24 }
 0x27d   : > { %1087 = vpow2.f32 %v571_v35  ;;  %v908_v35 = vld [vmem:[%s1367_s9 + $0x20] sm:$0xff] }
 0x282   : > { %v1086_v25 = vpop.eup %1085 }
 0x283   : > { %v512_v27 = vmul.f32 %v1086_v25, %v1084_v22  ;;  %v1088_v41 = vpop.eup %1087 }
 0x284   : > { %v573_v42 = vsel %vm477_vm1, %v1088_v41, 0.0 }
 0x293   : > { %v514_v26 = vpop.permute.xlu1 %513 }
 0x294   : > { %534 = vmatpush.msra.mxu2 %v514_v26  ;;  %v875_v26 = vld [vmem:[%s1365_s7 + $0x18] sm:$0xff] }
 0x295   : > { %1037 = vmatmul.msk.f32.vlgmr.msra.gmra.mxu2 %vm477_vm1, %v512_v27  ;;  %v874_v27 = vld [vmem:[%s1365_s7 + $0x10] sm:$0xff] }
 0x29b   : > { %v651_v28 = vpop.permute.xlu1 %650 }
 0x29c   : > { %1044 = vmatmul.msk.f32.vlgmr.msra.gmra.mxu0 %vm477_vm1, %v651_v28  ;;  %v873_v28 = vld [vmem:[%s1365_s7 + $0x8] sm:$0xff] }
 0x318   : > { %v536_v29 = vpop.f32.mrf.mxu2 }
 0x319   : > { %1042 = vmatmul.msk.f32.vlgmr.msra.gmra.mxu3 %vm477_vm1, %v536_v29  ;;  %v675_v30 = vpop.f32.mrf.mxu0  ;;  %v872_v29 = vld [vmem:[%s1365_s7] sm:$0xff] }
 0x31a   : > { %v678_v31 = vsel %vm477_vm1, %v675_v30, -inf }
 0x31b   : > { %679 = vmax.xlane.f32.xlu1 %v678_v31  ;;  %v910_v31 = vld [vmem:[%s1367_s9 + $0x30] sm:$0xff] }
 0x321   : > { %1048 = vmatmul.msk.f32.vlgmr.msrb.gmra.mxu3 %vm477_vm1, %v740_v12 }
 0x334   : > { %689 = vrot.lane.b32.xlu1 %v1230_v7, %s1121_s20 }
 0x38e   : > { %v680_v36 = vpop.xlane.xlu1 %679 }
 0x38f   : > { %v681_v37 = vsub.f32 %v675_v30, %v680_v36  ;;  %v911_v30 = vld [vmem:[%s1367_s9 + $0x38] sm:$0xff] }
 0x390   : > { %928 = vmatpush.msra.mxu3 %v911_v30 }
 0x391   : > { %v682_v40 = vmul.f32 1.442695, %v681_v37  ;;  %v907_v37 = vld [vmem:[%s1367_s9 + $0x18] sm:$0xff] }
 0x392   : > { %929 = vmatpush.msra.mxu3 %v910_v31 }
 0x393   : > { %1089 = vpow2.f32 %v682_v40 }
 0x394   : > { %930 = vmatpush.msra.mxu3 %v909_v32 }
 0x396   : > { %931 = vmatpush.msra.mxu3 %v908_v35 }
 0x398   : > { %932 = vmatpush.msra.mxu3 %v907_v37 }
 0x399   : > { %v1090_v43 = vpop.eup %1089 }
 0x39a   : > { %v684_v44 = vsel %vm477_vm1, %v1090_v43, 0.0 }
 0x39c   : > { %v647_v34 = vpop.f32.mrf.mxu3 }
 0x3a4   : > { %v764_v38 = vpop.f32.mrf.mxu3 }
 0x3a5   : > { %v767_v39 = vsel %vm477_vm1, %v764_v38, -inf }
 0x3a6   : > { %768 = vmax.xlane.f32.xlu0 %v767_v39  ;;  %v690_v55 = vpop.permute.xlu1 %689 }
 0x3ae   : > { %574 = vadd.xlane.f32.xlu0 %v573_v42 }
 0x3b6   : > { %685 = vadd.xlane.f32.xlu0 %v684_v44  ;;  %v1077_v44 = vld [vmem:[%s1363_s5] ss:$0 sm:$0xff] }
 0x3ca   : > { %578 = vrot.lane.b32.xlu0 %v1230_v7, %s1122_s21 }
 0x419   : > { %v769_v45 = vpop.xlane.xlu0 %768 }
 0x41a   : > { %v770_v46 = vsub.f32 %v764_v38, %v769_v45 }
 0x41c   : > { %v771_v47 = vmul.f32 1.442695, %v770_v46 }
 0x41e   : > { %1091 = vpow2.f32 %v771_v47  ;;  %v1078_v47 = vld [vmem:[%s1364_s6] ss:$0 sm:$0xff] }
 0x421   : > { %v575_v50 = vpop.xlane.xlu0 %574 }
 0x422   : > { %1093 = vrcp.f32 %v575_v50  ;;  %v906_v50 = vld [vmem:[%s1367_s9 + $0x10] sm:$0xff] }
 0x423   : > { %933 = vmatpush.msra.mxu3 %v906_v50 }
 0x424   : > { %v1092_v48 = vpop.eup %1091 }
 0x425   : > { %v773_v49 = vsel %vm477_vm1, %v1092_v48, 0.0 }
 0x426   : > { %774 = vadd.xlane.f32.xlu2 %v773_v49 }
 0x428   : > { %v1094_v52 = vpop.eup %1093 }
 0x429   : > { %v686_v51 = vpop.xlane.xlu0 %685  ;;  %v577_v54 = vmul.f32 %v1094_v52, %v1088_v41  ;;  %v904_v52 = vld [vmem:[%s1367_s9] sm:$0xff] }
 0x42a   : > { %1095 = vrcp.f32 %v686_v51  ;;  %v905_v51 = vld [vmem:[%s1367_s9 + $0x8] sm:$0xff] }
 0x42b   : > { %934 = vmatpush.msra.mxu3 %v905_v51 }
 0x42d   : > { %935 = vmatpush.msra.mxu3 %v904_v52 }
 0x430   : > { %v1096_v56 = vpop.eup %1095 }
 0x431   : > { %v688_v57 = vmul.f32 %v1096_v56, %v1090_v43 }
 0x43c   : > { %v579_v53 = vpop.permute.xlu0 %578 }
 0x43d   : > { %599 = vmatpush.msrb.mxu2 %v579_v53  ;;  %v1079_v53 = vld [vmem:[%s1366_s8] ss:$0 sm:$0xff] }
 0x43e   : > { %778 = vrot.lane.b32.xlu2 %v1230_v7, %s1123_s22  ;;  %1040 = vmatmul.msk.f32.vlgmr.msrb.gmra.mxu2 %vm477_vm1, %v577_v54 }
 0x43f   : > { %710 = vmatpush.msra.mxu2 %v690_v55 }
 0x441   : > { %822 = vmatpush.msrb.mxu2 %v472_v2 }
 0x446   : > { %1045 = vmatmul.msk.f32.vlgmr.msra.gmra.mxu2 %vm477_vm1, %v688_v57  ;;  %v1080_v57 = vld [vmem:[%s1368_s10] ss:$0 sm:$0xff] }
 0x499   : > { %v775_v58 = vpop.xlane.xlu2 %774 }
 0x49a   : > { %1097 = vrcp.f32 %v775_v58 }
 0x49b   : > { %1099 = vrcp.f32 %v1124_v15  ;;  %v1082_v15 = vld [vmem:[%s1370_s12] ss:$0 sm:$0xff] }
 0x4a0   : > { %v1098_v59 = vpop.eup %1097 }
 0x4a1   : > { %v777_v60 = vmul.f32 %v1098_v59, %v1092_v48  ;;  %v779_v61 = vpop.permute.xlu2 %778  ;;  %v1100_v16 = vpop.eup %1099 }
 0x4a2   : > { %799 = vmatpush.msrb.mxu0 %v779_v61  ;;  %v839_v17 = vmul.f32 32.0, %v1100_v16  ;;  %vm843_vm2 = vweird.f32 %v1100_v16 }
 0x4a3   : > { %1049 = vmatmul.msk.f32.vlgmr.msrb.gmra.mxu0 %vm477_vm1, %v777_v60 }
 0x4a4   : > { %v840_v18 = vsub.f32 1.0, %v839_v17 }
 0x4a6   : > { %v841_v19 = vmul.f32 %v1100_v16, %v840_v18 }
 0x4a8   : > { %v842_v20 = vadd.f32 %v1100_v16, %v841_v19 }
 0x4aa   : > { %v1285_v21 = vsel %vm843_vm2, %v1100_v16, %v842_v20 }
 0x4c1   : > { %v601_v0 = vpop.f32.mrf.mxu2 }
 0x4c2   : > { %1041 = vmatmul.msk.f32.vlgmr.msrb.gmra.mxu1 %vm477_vm1, %v601_v0 }
 0x4c3   : > { %895 = vmatpush.msrb.mxu1 %v875_v26 }
 0x4c5   : > { %896 = vmatpush.msrb.mxu1 %v874_v27 }
 0x4c7   : > { %897 = vmatpush.msrb.mxu1 %v873_v28 }
 0x4c9   : > { %v712_v1 = vpop.f32.mrf.mxu2  ;;  %898 = vmatpush.msrb.mxu1 %v872_v29 }
 0x4ca   : > { %1046 = vmatmul.msk.f32.vlgmr.msra.gmra.mxu1 %vm477_vm1, %v712_v1 }
 0x520   : > { %v801_v3 = vpop.f32.mrf.mxu0 }
 0x521   : > { %1050 = vmatmul.msk.f32.vlgmr.msrb.gmra.mxu2 %vm477_vm1, %v801_v3 }
 0x53f   : > { %v624_v5 = vpop.f32.mrf.mxu1 }
 0x540   : > { %v648_v7 = vadd.f32 %v647_v34, %v624_v5 }
 0x547   : > { %v735_v6 = vpop.f32.mrf.mxu1 }
 0x548   : > { %v738_v8 = vadd.f32 %v735_v6, %v648_v7 }
 0x5a4   : > { %v824_v10 = vpop.f32.mrf.mxu2 }
 0x5a5   : > { %v827_v11 = vadd.f32 %v824_v10, %v738_v8 }
 0x5a7   : > { %v831_v12 = vadd.f32 %v1076_v9, %v827_v11 }
 0x5a9   : > { %v832_v13 = vadd.f32 %v831_v12, %v1223_v4 }
 0x5ab   : > { %v835_v14 = vsel %vm445_vm0, %v832_v13, 0.0 }
 0x5ac   : > { %836 = vadd.xlane.f32.xlu0 %v835_v14 }
 0x61f   : > { %v837_v22 = vpop.xlane.xlu0 %836 }
 0x620   : > { %v845_v23 = vmul.f32 %v1285_v21, %v837_v22 }
 0x622   : > { %v846_v24 = vsub.f32 %v832_v13, %v845_v23  ;;  %v1081_v13 = vld [vmem:[%s1369_s11] ss:$0 sm:$0xff] }
 0x624   : > { %v847_v25 = vmul.f32 %v846_v24, %v846_v24 }
 0x626   : > { %v848_v4 = vsel %vm445_vm0, %v847_v25, 0.0 }
 0x627   : > { %849 = vadd.xlane.f32.xlu1 %v848_v4 }
 0x69a   : > { %v850_v33 = vpop.xlane.xlu1 %849 }
 0x69b   : > { %v851_v34 = vmul.f32 %v850_v33, %v1285_v21 }
 0x69d   : > { %v852_v36 = vadd.f32 1e-05, %v851_v34 }
 0x69f   : > { %1101 = vrsqrt.f32 %v852_v36  ;;  %vm859_vm4 = vweird.f32 %v852_v36 }
 0x6a5   : > { %v1102_v38 = vpop.eup %1101 }
 0x6a6   : > { %v854_v39 = vmul.f32 %v1102_v38, %v852_v36  ;;  %vm860_vm3 = vweird.f32 %v1102_v38 }
 0x6a7   : > { %vm861_vm5 = vmor %vm859_vm4, %vm860_vm3 }
 0x6a8   : > { %v855_v40 = vmul.f32 %v1102_v38, %v854_v39 }
 0x6aa   : > { %v856_v41 = vmul.f32 0.5, %v855_v40 }
 0x6ac   : > { %v857_v42 = vsub.f32 1.5, %v856_v41 }
 0x6ae   : > { %v858_v43 = vmul.f32 %v1102_v38, %v857_v42 }
 0x6b0   : > { %v862_v45 = vsel %vm861_vm5, %v1102_v38, %v858_v43 }
 0x6b1   : > { %v863_v46 = vmul.f32 %v862_v45, %v846_v24 }
 0x6b3   : > { %v867_v48 = vmul.f32 %v1077_v44, %v863_v46 }
 0x6b5   : > { %v871_v49 = vadd.f32 %v1078_v47, %v867_v48 }
 0x6b7   : > { %1051 = vmatmul.msk.f32.vlgmr.msrb.gmra.mxu1 %vm445_vm0, %v871_v49 }
 0x734   : > { %v900_v54 = vpop.f32.mrf.mxu1 }
 0x735   : > { %v901_v55 = vadd.f32 %v1079_v53, %v900_v54 }
 0x737   : > { %v903_v56 = vmax.f32 %v901_v55, 0.0 }
 0x739   : > { %1052 = vmatmul.msk.f32.vlgmr.msra.gmra.mxu3 %vm916_vm6, %v903_v56 }
 0x7bc   : > { %v937_v58 = vpop.f32.mrf.mxu3 }
 0x7bd   : > { %v938_v59 = vadd.f32 %v1080_v57, %v937_v58 }
 0x7bf   : > { %v940_v60 = vadd.f32 %v938_v59, %v871_v49 }
 0x7c1   : > { %v943_v61 = vsel %vm445_vm0, %v940_v60, 0.0 }
 0x7c2   : > { %944 = vadd.xlane.f32.xlu2 %v943_v61 }
 0x835   : > { %v945_v62 = vpop.xlane.xlu2 %944 }
 0x836   : > { %v946_v63 = vmul.f32 %v945_v62, %v1285_v21 }
 0x838   : > { %v947_v0 = vsub.f32 %v940_v60, %v946_v63 }
 0x83a   : > { %v948_v1 = vmul.f32 %v947_v0, %v947_v0 }
 0x83c   : > { %v949_v2 = vsel %vm445_vm0, %v948_v1, 0.0 }
 0x83d   : > { %950 = vadd.xlane.f32.xlu0 %v949_v2 }
 0x8b0   : > { %v951_v3 = vpop.xlane.xlu0 %950 }
 0x8b1   : > { %v952_v5 = vmul.f32 %v951_v3, %v1285_v21 }
 0x8b3   : > { %v953_v6 = vadd.f32 1e-05, %v952_v5 }
 0x8b5   : > { %1103 = vrsqrt.f32 %v953_v6  ;;  %vm960_vm8 = vweird.f32 %v953_v6 }
 0x8bb   : > { %v1104_v7 = vpop.eup %1103 }
 0x8bc   : > { %v955_v8 = vmul.f32 %v1104_v7, %v953_v6  ;;  %vm961_vm7 = vweird.f32 %v1104_v7 }
 0x8bd   : > { %vm962_vm9 = vmor %vm960_vm8, %vm961_vm7 }
 0x8be   : > { %v956_v9 = vmul.f32 %v1104_v7, %v955_v8 }
 0x8c0   : > { %v957_v10 = vmul.f32 0.5, %v956_v9 }
 0x8c2   : > { %v958_v11 = vsub.f32 1.5, %v957_v10 }
 0x8c4   : > { %v959_v12 = vmul.f32 %v1104_v7, %v958_v11 }
 0x8c6   : > { %v963_v14 = vsel %vm962_vm9, %v1104_v7, %v959_v12 }
 0x8c7   : > { %v964_v16 = vmul.f32 %v963_v14, %v947_v0 }
 0x8c9   : > { %v968_v17 = vmul.f32 %v1081_v13, %v964_v16 }
 0x8cb   : > { %v972_v18 = vadd.f32 %v1082_v15, %v968_v17 }
 0x8cd   : > { %973 = vst.msk [vmem:[%s435_s29] sm:$0xff] %vm445_vm0, %v972_v18 }
 0x8ce PF: > { %s23_s25 = sadd.s32 1, %s1111_s25  }
 0x8cf   : > { %p20_p4 = scmp.ge.s32.totalorder %s23_s25, 4  }
 0x8d1   :  { %22 = sbr.rel (!%p20_p4) target bundleno = 1 (0x1), region = 102 }

// kernel: my_transformer_forward.9
= control target key start
LH: loop header
LB: loop body
LE: loop exit
PB: predicated region body
PF: predicated region fallthrough
CT: control target
= control target key end

     0   :  { %s3263_s0 = inlined_call_operand.vmem [shape: f32[2,8,32], index: 0, kind: input, shape index: {}]   ;;  %s3264_s1 = inlined_call_operand.vmem [shape: f32[2,8,32], index: 1, kind: input, shape index: {}]   ;;  %s3265_s2 = inlined_call_operand.vmem [shape: f32[32,96], index: 2, kind: input, shape index: {}]   ;;  %s3266_s3 = inlined_call_operand.hbm [shape: f32[1,96], index: 3, kind: input, shape index: {}]   ;;  %s3267_s4 = inlined_call_operand.vmem [shape: f32[32,32], index: 4, kind: input, shape index: {}]   ;;  %s3268_s5 = inlined_call_operand.hbm [shape: f32[1,32], index: 5, kind: input, shape index: {}]   ;;  %s3269_s6 = inlined_call_operand.hbm [shape: f32[1,32], index: 6, kind: input, shape index: {}]   ;;  %s3270_s7 = inlined_call_operand.hbm [shape: f32[1,32], index: 7, kind: input, shape index: {}]   ;;  %s3271_s8 = inlined_call_operand.vmem [shape: f32[32,32], index: 8, kind: input, shape index: {}]   ;;  %s3272_s9 = inlined_call_operand.hbm [shape: f32[1,32], index: 9, kind: input, shape index: {}]   ;;  %s3273_s10 = inlined_call_operand.vmem [shape: f32[32,64], index: 10, kind: input, shape index: {}]   ;;  %s3274_s11 = inlined_call_operand.hbm [shape: f32[1,64], index: 11, kind: input, shape index: {}]   ;;  %s3275_s12 = inlined_call_operand.vmem [shape: f32[32,32], index: 12, kind: input, shape index: {}]   ;;  %s3276_s13 = inlined_call_operand.hbm [shape: f32[1,32], index: 13, kind: input, shape index: {}]   ;;  %s3277_s14 = inlined_call_operand.hbm [shape: f32[1,32], index: 14, kind: input, shape index: {}]   ;;  %s3278_s15 = inlined_call_operand.hbm [shape: f32[1,32], index: 15, kind: input, shape index: {}]   ;;  %s3279_s16 = inlined_call_operand.vmem [shape: f32[32,64], index: 16, kind: input, shape index: {}]   ;;  %s3280_s17 = inlined_call_operand.hbm [shape: f32[1,64], index: 17, kind: input, shape index: {}]   ;;  %s3281_s18 = inlined_call_operand.vmem [shape: f32[64,32], index: 18, kind: input, shape index: {}]   ;;  %s3282_s19 = inlined_call_operand.hbm [shape: f32[1,32], index: 19, kind: input, shape index: {}]   ;;  %s3283_s20 = inlined_call_operand.hbm [shape: f32[1,32], index: 20, kind: input, shape index: {}]   ;;  %s3284_s21 = inlined_call_operand.hbm [shape: f32[1,32], index: 21, kind: input, shape index: {}]   ;;  %s3285_s22 = inlined_call_operand.vmem [shape: f32[2,8,32], index: 22, kind: output, shape index: {}]  }
   0x1   :  { %3294 = sst [smem:[#allocation30_spill]] %s3263_s0 }
   0x2   :  { %3295 = sst [smem:[#allocation31_spill]] %s3264_s1 }
   0x3   :  { %3296 = sst [smem:[#allocation32_spill]] %s3265_s2 }
   0x4   :  { %3297 = sst [smem:[#allocation33_spill]] %s3266_s3 }
   0x5   :  { %3298 = sst [smem:[#allocation34_spill]] %s3267_s4 }
   0x6   :  { %3299 = sst [smem:[#allocation35_spill]] %s3268_s5 }
   0x7   :  { %3300 = sst [smem:[#allocation36_spill]] %s3269_s6 }
   0x8   :  { %3301 = sst [smem:[#allocation37_spill]] %s3270_s7 }
   0x9   :  { %3302 = sst [smem:[#allocation38_spill]] %s3274_s11 }
   0xa   :  { %3303 = sst [smem:[#allocation39_spill]] %s3277_s14 }
   0xb   :  { %27 = vsyncpa [#allocation3], 0 }
   0xc   :  { %28 = vsyncpa [#allocation5], 0 }
   0xd   :  { %29 = vsyncpa [#allocation8], 0 }
   0xe   :  { %30 = vsyncpa [#allocation11], 0 }
   0xf   :  { %31 = vsyncpa [#allocation14], 0 }
  0x10   :  { %32 = vsyncpa [#allocation17], 0 }
  0x11   :  { %33 = vsyncpa [#allocation20], 0  ;;  %s2914_s3 = smov 0  }
  0x12 LB: > { %3304 = sst [smem:[#allocation29_spill]] %s2772_s3  ;;  %s2923_s0 = sadd.s32 4294967295, %s2772_s3   ;;  %s2772_s3 = sphi %s2914_s3, %s39_s3  }
  0x13   : > { %s3305_s30 = sld [smem:[#allocation35_spill]]  ;;  %p2073_p0 = scmp.ge.s32.totalorder %s2772_s3, 1 }
  0x14   : > { %p542_p1 = scmp.lt.s32.totalorder %s2772_s3, 3  ;;  %p2236_p2 = scmp.eq.s32.totalorder %s2923_s0, 0 }
  0x15   : > { %s2774_s1 = smov [#allocation4]   ;;  %s3307_s7 = sld [smem:[#allocation37_spill]] }
  0x16   : > { %p2928_p3 = pnand %p2073_p0, %p542_p1  ;;  %s574_s5 = sshll.u32 %s2774_s1, 4  ;;  %s575_s5 = int_to_ptr.vmem [resolvable:$true] %s574_s5 }
  0x17   : > { %s3308_s11 = sld [smem:[#allocation38_spill]]  ;;  %s2775_s29 = smov [#allocation7]  }
  0x18   : > { %p2196_p4 = pneg %p2928_p3  ;;  %s2776_s1 = smov [#allocation10]  }
  0x19   : > { %s572_s4 = sshll.u32 %s3305_s30, 4  ;;  %s598_s30 = sshll.u32 %s2775_s29, 4  ;;  %s573_s4 = int_to_ptr.hbm [resolvable:$true] %s572_s4  ;;  %s599_s30 = int_to_ptr.vmem [resolvable:$true] %s598_s30 }
  0x1a   : > { %p2942_p5 = pnand %p2236_p2, %p2196_p4  ;;  %s628_s24 = sshll.u32 %s2776_s1, 4  ;;  %s629_s24 = int_to_ptr.vmem [resolvable:$true] %s628_s24 }
  0x1b   : > { %s596_s25 = sshll.u32 %s3307_s7, 4  ;;  %s3310_s14 = sld [smem:[#allocation39_spill]]  ;;  %s597_s25 = int_to_ptr.hbm [resolvable:$true] %s596_s25 }
  0x1c   : > { %2202 = dma.hbm_to_vmem [thread:$0]  (!%p2942_p5), %s573_s4, 16, %s575_s5, [#allocation5]  }
  0x1d   : > { %s626_s27 = sshll.u32 %s3308_s11, 4  ;;  %s680_s11 = sshll.u32 %s3280_s17, 4  ;;  %s627_s27 = int_to_ptr.hbm [resolvable:$true] %s626_s27  ;;  %s681_s11 = int_to_ptr.hbm [resolvable:$true] %s680_s11 }
  0x1e   : > { %2208 = dma.hbm_to_vmem [thread:$0]  (!%p2942_p5), %s597_s25, 16, %s599_s30, [#allocation8]  }
  0x1f   : > { %2214 = dma.hbm_to_vmem [thread:$0]  (!%p2942_p5), %s627_s27, 16, %s629_s24, [#allocation11]  }
  0x20   : > { %s2777_s3 = smov [#allocation13]   ;;  %s2778_s5 = smov [#allocation16]  }
  0x21   : > { %s653_s2 = sshll.u32 %s3310_s14, 4  ;;  %s655_s4 = sshll.u32 %s2777_s3, 4  ;;  %s654_s2 = int_to_ptr.hbm [resolvable:$true] %s653_s2  ;;  %s656_s4 = int_to_ptr.vmem [resolvable:$true] %s655_s4 }
  0x22   : > { %2220 = dma.hbm_to_vmem [thread:$0]  (!%p2942_p5), %s654_s2, 16, %s656_s4, [#allocation14]  }
  0x23   : > { %s682_s25 = sshll.u32 %s2778_s5, 4  ;;  %s707_s6 = sshll.u32 %s3283_s20, 4  ;;  %s683_s25 = int_to_ptr.vmem [resolvable:$true] %s682_s25  ;;  %s708_s6 = int_to_ptr.hbm [resolvable:$true] %s707_s6 }
  0x24   : > { %2226 = dma.hbm_to_vmem [thread:$0]  (!%p2942_p5), %s681_s11, 16, %s683_s25, [#allocation17]  }
  0x25   : > { %s3311_s24 = sld [smem:[#allocation33_spill]]  ;;  %s2779_s3 = smov [#allocation19]  }
  0x26   : > { %s709_s29 = sshll.u32 %s2779_s3, 4  ;;  %s2780_s2 = smov [#allocation2]   ;;  %s710_s29 = int_to_ptr.vmem [resolvable:$true] %s709_s29 }
  0x27   : > { %2232 = dma.hbm_to_vmem [thread:$0]  (!%p2942_p5), %s708_s6, 16, %s710_s29, [#allocation20]  }
  0x28   : > { %s559_s4 = sshll.u32 %s2780_s2, 4  ;;  %s3312_s1 = sld [smem:[#allocation36_spill]]  ;;  %s560_s4 = int_to_ptr.vmem [resolvable:$true] %s559_s4 }
  0x29   : > { %s611_s7 = sshll.u32 %s3272_s9, 4  ;;  %s2781_s27 = smov [#allocation6]   ;;  %s612_s7 = int_to_ptr.hbm [resolvable:$true] %s611_s7 }
  0x2a   : > { %s2782_s6 = smov [#allocation9]   ;;  %s641_s5 = sshll.u32 %s3276_s13, 4  ;;  %s642_s5 = int_to_ptr.hbm [resolvable:$true] %s641_s5 }
  0x2b   : > { %s557_s26 = sshll.u32 %s3311_s24, 4  ;;  %s586_s24 = sshll.u32 %s2781_s27, 4  ;;  %s558_s26 = int_to_ptr.hbm [resolvable:$true] %s557_s26  ;;  %s587_s24 = int_to_ptr.vmem [resolvable:$true] %s586_s24 }
  0x2c   : > { %2199 = dma.hbm_to_vmem [thread:$0]  (!%p2942_p5), %s558_s26, 16, %s560_s4, [#allocation3]  }
  0x2d   : > { %s613_s3 = sshll.u32 %s2782_s6, 4  ;;  %s665_s30 = sshll.u32 %s3278_s15, 4  ;;  %s614_s3 = int_to_ptr.vmem [resolvable:$true] %s613_s3  ;;  %s666_s30 = int_to_ptr.hbm [resolvable:$true] %s665_s30 }
  0x2e   : > { %s584_s14 = sshll.u32 %s3312_s1, 4  ;;  %s2783_s1 = smov [#allocation12]   ;;  %s585_s14 = int_to_ptr.hbm [resolvable:$true] %s584_s14 }
  0x2f   : > { %2205 = dma.hbm_to_vmem [thread:$0]  (!%p2942_p5), %s585_s14, 16, %s587_s24, [#allocation5]  }
  0x30   : > { %2211 = dma.hbm_to_vmem [thread:$0]  (!%p2942_p5), %s612_s7, 16, %s614_s3, [#allocation8]  }
  0x31   : > { %s643_s11 = sshll.u32 %s2783_s1, 4  ;;  %s2784_s14 = smov [#allocation15]   ;;  %s644_s11 = int_to_ptr.vmem [resolvable:$true] %s643_s11 }
  0x32   : > { %2217 = dma.hbm_to_vmem [thread:$0]  (!%p2942_p5), %s642_s5, 16, %s644_s11, [#allocation11]  }
  0x33   : > { %s667_s25 = sshll.u32 %s2784_s14, 4  ;;  %s695_s6 = sshll.u32 %s3282_s19, 4  ;;  %s668_s25 = int_to_ptr.vmem [resolvable:$true] %s667_s25  ;;  %s696_s6 = int_to_ptr.hbm [resolvable:$true] %s695_s6 }
  0x34   : > { %2223 = dma.hbm_to_vmem [thread:$0]  (!%p2942_p5), %s666_s30, 16, %s668_s25, [#allocation14]  }
  0x35   : > { %s719_s29 = sshll.u32 %s3284_s21, 4  ;;  %s2785_s2 = smov [#allocation18]   ;;  %s720_s29 = int_to_ptr.hbm [resolvable:$true] %s719_s29 }
  0x36   : > { %s697_s26 = sshll.u32 %s2785_s2, 4  ;;  %s2786_s5 = smov [#allocation21]   ;;  %s698_s26 = int_to_ptr.vmem [resolvable:$true] %s697_s26 }
  0x37   : > { %2229 = dma.hbm_to_vmem [thread:$0]  (!%p2942_p5), %s696_s6, 16, %s698_s26, [#allocation17]  }
  0x38   : > { %s721_s4 = sshll.u32 %s2786_s5, 4  ;;  %748 = sbr.rel (%p2928_p3) target bundleno = 3911 (0xf47), region = 108  ;;  %s722_s4 = int_to_ptr.vmem [resolvable:$true] %s721_s4 }
  0x39   : > { %2235 = dma.hbm_to_vmem [thread:$0]  (!%p2942_p5), %s720_s29, 16, %s722_s4, [#allocation20]  }
  0x3d   : > { %2743 = dma.done.wait (%p2236_p2), [#allocation3], 16  }
  0x3e   : > { %2745 = vsyncadd (%p2236_p2), [#allocation3], 4294967280 }
  0x3f   : > { %2747 = dma.done.wait (%p2236_p2), [#allocation5], 32  }
  0x40   : > { %2749 = vsyncadd (%p2236_p2), [#allocation5], 4294967264 }
  0x41   : > { %2751 = dma.done.wait (%p2236_p2), [#allocation8], 32  }
  0x42   : > { %2753 = vsyncadd (%p2236_p2), [#allocation8], 4294967264 }
  0x43   : > { %2755 = dma.done.wait (%p2236_p2), [#allocation11], 32  }
  0x44   : > { %2757 = vsyncadd (%p2236_p2), [#allocation11], 4294967264 }
  0x45   : > { %2759 = dma.done.wait (%p2236_p2), [#allocation14], 32  }
  0x46   : > { %2761 = vsyncadd (%p2236_p2), [#allocation14], 4294967264 }
  0x47   : > { %2763 = dma.done.wait (%p2236_p2), [#allocation17], 32  }
  0x48   : > { %2765 = vsyncadd (%p2236_p2), [#allocation17], 4294967264 }
  0x49   : > { %2767 = dma.done.wait (%p2236_p2), [#allocation20], 32  }
  0x4a   : > { %2769 = vsyncadd (%p2236_p2), [#allocation20], 4294967264  ;;  %p873_p6 = scmp.lt.s32.totalorder %s2923_s0, 1  ;;  %s3313_s1 = sld [smem:[#allocation32_spill]]  ;;  %vm895_vm0 = vcmask 261120   ;;  %vm927_vm1 = vcmask 64512  }
  0x4b   : > { %s3314_s24 = sld [smem:[#allocation30_spill]]  ;;  %v2295_v5 = vld [vmem:[#allocation2] ss:$0 sm:$0xff]  ;;  %s3290_s2 = smov 88   ;;  %vm1822_vm9 = vcmask 523264  }
  0x4c   : > { %s3323_s0 = smov (!%p873_p6, %s2923_s0), 1  ;;  %s2788_s26 = smov 96  }
  0x4d   : > { %s3034_s23 = sshll.u32 %s3323_s0, 3  ;;  %s2789_s5 = smov 120  }
  0x4e   : > { %s3289_s4 = smov 72   ;;  %s3292_s28 = smov 104  }
  0x4f   : > { %s3291_s30 = smov 80   ;;  %s2793_s11 = smov 64  }
  0x50   : > { %v890_v0 = vld [vmem:[%s3313_s1 + $0x18] sm:$0xff]  ;;  %v889_v1 = vld [vmem:[%s3313_s1 + $0x10] sm:$0xff]  ;;  %v888_v2 = vld [vmem:[%s3313_s1 + $0x8] sm:$0xff]  ;;  %s2794_s14 = smov 112   ;;  %s2796_s7 = smov 56  }
  0x51   : > { %s876_s6 = scalar_lea.vmem %s3314_s24, %s3034_s23  ;;  %911 = vmatpush.msra.mxu0 %v890_v0  ;;  %v887_v3 = vld [vmem:[%s3313_s1] sm:$0xff]  ;;  %s3315_s24 = sld [smem:[#allocation34_spill]] }
  0x52   : > { %v3052_v4 = vld [vmem:[%s876_s6] sm:$0xff]  ;;  %s2795_s6 = smov 48   ;;  %s2797_s3 = smov 40  }
  0x53   : > { %912 = vmatpush.msra.mxu0 %v889_v1  ;;  %s3319_s25 = smov 88   ;;  %s3320_s27 = smov 72  }
  0x55   : > { %913 = vmatpush.msra.mxu0 %v888_v2 }
  0x57   : > { %914 = vmatpush.msra.mxu0 %v887_v3  ;;  %v919_v25 = vld [vmem:[%s3315_s24] sm:$0xff]  ;;  %v920_v62 = vld [vmem:[%s3315_s24 + $0x8] sm:$0xff]  ;;  %v921_v63 = vld [vmem:[%s3315_s24 + $0x10] sm:$0xff] }
  0x58   : > { %2105 = vmatmul.msk.f32.vlgmr.msra.gmra.mxu0 %vm895_vm0, %v3052_v4  ;;  %v922_v2 = vld [vmem:[%s3315_s24 + $0x18] sm:$0xff] }
  0xd5   : > { %v916_v6 = vpop.f32.mrf.mxu0 }
  0xd6   : > { %v3056_v7 = vadd.f32 %v2295_v5, %v916_v6 }
  0xd8   : > { %991 = vrot.lane.b32.xlu2 %v3056_v7, %s3290_s2  ;;  %925 = vrot.lane.b32.xlu0 %v3056_v7, %s2788_s26 }
  0xe0   : > { %989 = vrot.lane.b32.xlu2 %v3056_v7, %s2789_s5 }
  0xe8   : > { %1191 = vrot.lane.b32.xlu2 %v3056_v7, %s3289_s4  ;;  %s3316_s4 = sld [smem:[#allocation31_spill]] }
  0xee   : > { %s880_s2 = scalar_lea.vmem %s3316_s4, %s3034_s23 }
  0xf0   : > { %1189 = vrot.lane.b32.xlu2 %v3056_v7, %s3292_s28 }
  0xf8   : > { %1102 = vrot.lane.b32.xlu2 %v3056_v7, %s3291_s30 }
 0x132   : > { %v992_v8 = vpop.permute.xlu2 %991 }
 0x13a   : > { %v990_v9 = vpop.permute.xlu2 %989 }
 0x142   : > { %v1192_v10 = vpop.permute.xlu2 %1191 }
 0x14a   : > { %v1190_v11 = vpop.permute.xlu2 %1189  ;;  %v926_v12 = vpop.permute.xlu0 %925 }
 0x14b   : > { %2106 = vmatpush.xpose.msk.msra.mxu1 %vm927_vm1, %v926_v12 }
 0x14e   : > { %2107 = vmatmul.msk.f32.vlgmr.msra.gmra.mxu1 %vm927_vm1, %v3056_v7 }
 0x14f   : > { %1072 = vmatpush.msrb.mxu1 %v920_v62 }
 0x151   : > { %1183 = vmatpush.msra.mxu1 %v921_v63 }
 0x152   : > { %v1103_v13 = vpop.permute.xlu2 %1102 }
 0x153   : > { %2114 = vmatpush.xpose.msk.msrb.mxu0 %vm927_vm1, %v1103_v13 }
 0x1cb   : > { %v949_v14 = vpop.f32.mrf.mxu1 }
 0x1cc   : > { %v952_v15 = vsel %vm927_vm1, %v949_v14, -inf }
 0x1cd   : > { %953 = vmax.xlane.f32.xlu0 %v952_v15  ;;  %v2798_v15 = vmov 32.0  }
 0x240   : > { %v954_v16 = vpop.xlane.xlu0 %953 }
 0x241   : > { %v955_v17 = vsub.f32 %v949_v14, %v954_v16 }
 0x243   : > { %v956_v18 = vmul.f32 1.442695, %v955_v17 }
 0x245   : > { %2308 = vpow2.f32 %v956_v18 }
 0x24b   : > { %v2309_v19 = vpop.eup %2308 }
 0x24c   : > { %v958_v20 = vsel %vm927_vm1, %v2309_v19, 0.0 }
 0x24d   : > { %959 = vadd.xlane.f32.xlu1 %v958_v20 }
 0x266   : > { %963 = vrot.lane.b32.xlu1 %v3056_v7, %s2793_s11 }
 0x26e   : > { %1100 = vrot.lane.b32.xlu1 %v3056_v7, %s2794_s14 }
 0x2c0   : > { %v960_v21 = vpop.xlane.xlu1 %959 }
 0x2c1   : > { %2310 = vrcp.f32 %v960_v21 }
 0x2c7   : > { %v2311_v22 = vpop.eup %2310 }
 0x2c8   : > { %v962_v24 = vmul.f32 %v2311_v22, %v2309_v19 }
 0x2d8   : > { %v964_v23 = vpop.permute.xlu1 %963 }
 0x2d9   : > { %984 = vmatpush.msra.mxu3 %v964_v23 }
 0x2da   : > { %2108 = vmatmul.msk.f32.vlgmr.msra.gmra.mxu3 %vm927_vm1, %v962_v24 }
 0x2db   : > { %2109 = vmatpush.xpose.msk.msrb.mxu3 %vm927_vm1, %v992_v8 }
 0x2df   : > { %1095 = vmatpush.msra.mxu3 %v919_v25 }
 0x2e0   : > { %v1101_v26 = vpop.permute.xlu1 %1100 }
 0x2e1   : > { %2115 = vmatmul.msk.f32.vlgmr.msrb.gmra.mxu0 %vm927_vm1, %v1101_v26  ;;  %v1356_v26 = vld [vmem:[%s3273_s10 + $0x18] sm:$0xff] }
 0x2e2   : > { %2110 = vmatmul.msk.f32.vlgmr.msrb.gmra.mxu3 %vm927_vm1, %v990_v9  ;;  %v2296_v9 = vld [vmem:[#allocation4] ss:$0 sm:$0xff] }
 0x2e3   : > { %2118 = vmatpush.xpose.msk.msrb.mxu3 %vm927_vm1, %v1192_v10 }
 0x35d   : > { %v986_v27 = vpop.f32.mrf.mxu3 }
 0x35e   : > { %2113 = vmatmul.msk.f32.vlgmr.msra.gmra.mxu3 %vm927_vm1, %v986_v27  ;;  %v1125_v28 = vpop.f32.mrf.mxu0  ;;  %v1355_v27 = vld [vmem:[%s3273_s10 + $0x10] sm:$0xff] }
 0x35f   : > { %v1128_v29 = vsel %vm927_vm1, %v1125_v28, -inf  ;;  %1376 = vmatpush.msra.mxu3 %v1356_v26 }
 0x360   : > { %1129 = vmax.xlane.f32.xlu1 %v1128_v29  ;;  %v1353_v29 = vld [vmem:[%s3273_s10] sm:$0xff] }
 0x361   : > { %1377 = vmatpush.msra.mxu3 %v1355_v27 }
 0x365   : > { %v1014_v30 = vpop.f32.mrf.mxu3 }
 0x366   : > { %2119 = vmatmul.msk.f32.vlgmr.msrb.gmra.mxu3 %vm927_vm1, %v1190_v11  ;;  %v1017_v31 = vsel %vm927_vm1, %v1014_v30, -inf }
 0x367   : > { %1018 = vmax.xlane.f32.xlu2 %v1017_v31  ;;  %v1325_v31 = vld [vmem:[%s3271_s8 + $0x18] sm:$0xff] }
 0x379   : > { %1139 = vrot.lane.b32.xlu1 %v3056_v7, %s2795_s6 }
 0x3d3   : > { %v1130_v36 = vpop.xlane.xlu1 %1129 }
 0x3d4   : > { %v1131_v37 = vsub.f32 %v1125_v28, %v1130_v36  ;;  %v1354_v28 = vld [vmem:[%s3273_s10 + $0x8] sm:$0xff] }
 0x3d5   : > { %1378 = vmatpush.msra.mxu3 %v1354_v28 }
 0x3d6   : > { %v1132_v40 = vmul.f32 1.442695, %v1131_v37 }
 0x3d7   : > { %1379 = vmatpush.msra.mxu3 %v1353_v29 }
 0x3da   : > { %v1019_v32 = vpop.xlane.xlu2 %1018 }
 0x3db   : > { %v1020_v33 = vsub.f32 %v1014_v30, %v1019_v32  ;;  %v886_v30 = vld [vmem:[%s880_s2] sm:$0xff]  ;;  %v1324_v32 = vld [vmem:[%s3271_s8 + $0x10] sm:$0xff]  ;;  %s3317_s2 = smov 104  }
 0x3dc   : > { %2123 = vmatmul.msk.f32.vlgmr.msra.gmra.mxu3 %vm895_vm0, %v886_v30 }
 0x3dd   : > { %v1021_v35 = vmul.f32 1.442695, %v1020_v33  ;;  %v1323_v33 = vld [vmem:[%s3271_s8 + $0x8] sm:$0xff] }
 0x3df   : > { %2312 = vpow2.f32 %v1021_v35 }
 0x3e0   : > { %2314 = vpow2.f32 %v1132_v40 }
 0x3e1   : > { %v1097_v34 = vpop.f32.mrf.mxu3 }
 0x3e5   : > { %v2313_v41 = vpop.eup %2312 }
 0x3e6   : > { %v1023_v42 = vsel %vm927_vm1, %v2313_v41, 0.0  ;;  %v2315_v43 = vpop.eup %2314 }
 0x3e7   : > { %v1134_v44 = vsel %vm927_vm1, %v2315_v43, 0.0 }
 0x3e9   : > { %v1214_v38 = vpop.f32.mrf.mxu3 }
 0x3ea   : > { %v1217_v39 = vsel %vm927_vm1, %v1214_v38, -inf }
 0x3eb   : > { %1218 = vmax.xlane.f32.xlu0 %v1217_v39  ;;  %v1140_v55 = vpop.permute.xlu1 %1139 }
 0x3f3   : > { %1024 = vadd.xlane.f32.xlu0 %v1023_v42 }
 0x3fb   : > { %1135 = vadd.xlane.f32.xlu0 %v1134_v44  ;;  %v2297_v44 = vld [vmem:[#allocation6] ss:$0 sm:$0xff] }
 0x40f   : > { %1028 = vrot.lane.b32.xlu0 %v3056_v7, %s2796_s7 }
 0x45e   : > { %v1219_v45 = vpop.xlane.xlu0 %1218 }
 0x45f   : > { %v1220_v46 = vsub.f32 %v1214_v38, %v1219_v45 }
 0x461   : > { %v1221_v47 = vmul.f32 1.442695, %v1220_v46 }
 0x463   : > { %2316 = vpow2.f32 %v1221_v47  ;;  %v2298_v47 = vld [vmem:[#allocation7] ss:$0 sm:$0xff] }
 0x466   : > { %v1025_v50 = vpop.xlane.xlu0 %1024 }
 0x467   : > { %2318 = vrcp.f32 %v1025_v50  ;;  %v2299_v50 = vld [vmem:[#allocation10] ss:$0 sm:$0xff] }
 0x469   : > { %v2317_v48 = vpop.eup %2316 }
 0x46a   : > { %v1223_v49 = vsel %vm927_vm1, %v2317_v48, 0.0 }
 0x46b   : > { %1224 = vadd.xlane.f32.xlu2 %v1223_v49 }
 0x46d   : > { %v2319_v52 = vpop.eup %2318 }
 0x46e   : > { %v1136_v51 = vpop.xlane.xlu0 %1135  ;;  %v1027_v54 = vmul.f32 %v2319_v52, %v2313_v41 }
 0x46f   : > { %2320 = vrcp.f32 %v1136_v51  ;;  %v1381_v51 = vpop.f32.mrf.mxu3 }
 0x470   : > { %v3153_v52 = vadd.f32 %v2299_v50, %v1381_v51  ;;  %v1387_v51 = vld [vmem:[%s3275_s12 + $0x18] sm:$0xff] }
 0x475   : > { %v2321_v56 = vpop.eup %2320 }
 0x476   : > { %v1138_v57 = vmul.f32 %v2321_v56, %v2315_v43 }
 0x481   : > { %v1029_v53 = vpop.permute.xlu0 %1028 }
 0x482   : > { %1049 = vmatpush.msra.mxu2 %v1029_v53  ;;  %v2300_v53 = vld [vmem:[#allocation9] ss:$0 sm:$0xff] }
 0x483   : > { %1228 = vrot.lane.b32.xlu2 %v3056_v7, %s2797_s3  ;;  %2111 = vmatmul.msk.f32.vlgmr.msra.gmra.mxu2 %vm927_vm1, %v1027_v54  ;;  %s884_s3 = scalar_lea.vmem %s3285_s22, %s3034_s23 }
 0x484   : > { %1160 = vmatpush.msrb.mxu2 %v1140_v55 }
 0x486   : > { %1272 = vmatpush.msra.mxu2 %v922_v2 }
 0x48b   : > { %2116 = vmatmul.msk.f32.vlgmr.msrb.gmra.mxu2 %vm927_vm1, %v1138_v57 }
 0x4de   : > { %v1225_v58 = vpop.xlane.xlu2 %1224 }
 0x4df   : > { %2322 = vrcp.f32 %v1225_v58 }
 0x4e0   : > { %2324 = vrcp.f32 %v2798_v15 }
 0x4e5   : > { %v2323_v59 = vpop.eup %2322 }
 0x4e6   : > { %v1227_v60 = vmul.f32 %v2323_v59, %v2317_v48  ;;  %v1229_v61 = vpop.permute.xlu2 %1228  ;;  %v2325_v16 = vpop.eup %2324 }
 0x4e7   : > { %1249 = vmatpush.msra.mxu0 %v1229_v61  ;;  %v1289_v17 = vmul.f32 32.0, %v2325_v16  ;;  %vm1293_vm2 = vweird.f32 %v2325_v16 }
 0x4e8   : > { %2120 = vmatmul.msk.f32.vlgmr.msra.gmra.mxu0 %vm927_vm1, %v1227_v60 }
 0x4e9   : > { %v1290_v18 = vsub.f32 1.0, %v1289_v17  ;;  %2124 = vmatpush.xpose.msk.msrb.mxu0 %vm927_vm1, %v3153_v52 }
 0x4eb   : > { %v1291_v19 = vmul.f32 %v2325_v16, %v1290_v18 }
 0x4ed   : > { %v1292_v20 = vadd.f32 %v2325_v16, %v1291_v19 }
 0x4ef   : > { %v3115_v21 = vsel %vm1293_vm2, %v2325_v16, %v1292_v20 }
 0x506   : > { %v1051_v0 = vpop.f32.mrf.mxu2 }
 0x507   : > { %2112 = vmatmul.msk.f32.vlgmr.msrb.gmra.mxu1 %vm927_vm1, %v1051_v0 }
 0x508   : > { %1345 = vmatpush.msrb.mxu1 %v1325_v31 }
 0x50a   : > { %1346 = vmatpush.msrb.mxu1 %v1324_v32 }
 0x50c   : > { %1347 = vmatpush.msrb.mxu1 %v1323_v33 }
 0x50e   : > { %v1162_v1 = vpop.f32.mrf.mxu2 }
 0x50f   : > { %2117 = vmatmul.msk.f32.vlgmr.msra.gmra.mxu1 %vm927_vm1, %v1162_v1 }
 0x565   : > { %v1251_v3 = vpop.f32.mrf.mxu0 }
 0x566   : > { %2121 = vmatmul.msk.f32.vlgmr.msra.gmra.mxu2 %vm927_vm1, %v1251_v3 }
 0x584   : > { %v1074_v5 = vpop.f32.mrf.mxu1 }
 0x585   : > { %v1098_v7 = vadd.f32 %v1097_v34, %v1074_v5  ;;  %v1322_v34 = vld [vmem:[%s3271_s8] sm:$0xff] }
 0x586   : > { %1348 = vmatpush.msrb.mxu1 %v1322_v34 }
 0x58c   : > { %v1185_v6 = vpop.f32.mrf.mxu1 }
 0x58d   : > { %v1188_v8 = vadd.f32 %v1185_v6, %v1098_v7 }
 0x5e9   : > { %v1274_v10 = vpop.f32.mrf.mxu2 }
 0x5ea   : > { %v1277_v11 = vadd.f32 %v1274_v10, %v1188_v8 }
 0x5ec   : > { %v1281_v12 = vadd.f32 %v2296_v9, %v1277_v11 }
 0x5ee   : > { %v1282_v13 = vadd.f32 %v1281_v12, %v3052_v4  ;;  %v1384_v12 = vld [vmem:[%s3275_s12] sm:$0xff] }
 0x5f0   : > { %v1285_v14 = vsel %vm895_vm0, %v1282_v13, 0.0 }
 0x5f1   : > { %1286 = vadd.xlane.f32.xlu0 %v1285_v14 }
 0x664   : > { %v1287_v22 = vpop.xlane.xlu0 %1286 }
 0x665   : > { %v1295_v23 = vmul.f32 %v3115_v21, %v1287_v22 }
 0x667   : > { %v1296_v24 = vsub.f32 %v1282_v13, %v1295_v23 }
 0x669   : > { %v1297_v25 = vmul.f32 %v1296_v24, %v1296_v24 }
 0x66b   : > { %v1298_v4 = vsel %vm895_vm0, %v1297_v25, 0.0 }
 0x66c   : > { %1299 = vadd.xlane.f32.xlu1 %v1298_v4 }
 0x685   : > { %1454 = vrot.lane.b32.xlu1 %v3153_v52, %s2789_s5 }
 0x68d   : > { %1565 = vrot.lane.b32.xlu1 %v3153_v52, %s2794_s14 }
 0x6df   : > { %v1300_v35 = vpop.xlane.xlu1 %1299 }
 0x6e0   : > { %v1301_v36 = vmul.f32 %v1300_v35, %v3115_v21 }
 0x6e2   : > { %v1302_v37 = vadd.f32 1e-05, %v1301_v36 }
 0x6e4   : > { %2326 = vrsqrt.f32 %v1302_v37  ;;  %vm1309_vm4 = vweird.f32 %v1302_v37 }
 0x6ea   : > { %v2327_v38 = vpop.eup %2326 }
 0x6eb   : > { %v1304_v39 = vmul.f32 %v2327_v38, %v1302_v37  ;;  %vm1310_vm3 = vweird.f32 %v2327_v38 }
 0x6ec   : > { %vm1311_vm5 = vmor %vm1309_vm4, %vm1310_vm3 }
 0x6ed   : > { %v1305_v40 = vmul.f32 %v2327_v38, %v1304_v39 }
 0x6ef   : > { %v1306_v41 = vmul.f32 0.5, %v1305_v40 }
 0x6f1   : > { %v1307_v42 = vsub.f32 1.5, %v1306_v41 }
 0x6f3   : > { %v1308_v43 = vmul.f32 %v2327_v38, %v1307_v42  ;;  %v1385_v42 = vld [vmem:[%s3275_s12 + $0x8] sm:$0xff] }
 0x6f4   : > { %1535 = vmatpush.msra.mxu0 %v1385_v42 }
 0x6f5   : > { %v1312_v45 = vsel %vm1311_vm5, %v2327_v38, %v1308_v43  ;;  %v1386_v43 = vld [vmem:[%s3275_s12 + $0x10] sm:$0xff] }
 0x6f6   : > { %v1313_v46 = vmul.f32 %v1312_v45, %v1296_v24 }
 0x6f7   : > { %v1455_v56 = vpop.permute.xlu1 %1454 }
 0x6f8   : > { %v1317_v48 = vmul.f32 %v2297_v44, %v1313_v46  ;;  %2127 = vmatpush.xpose.msk.msra.mxu1 %vm927_vm1, %v1455_v56 }
 0x6fa   : > { %v3149_v49 = vadd.f32 %v2298_v47, %v1317_v48 }
 0x6fc   : > { %2122 = vmatmul.msk.f32.vlgmr.msrb.gmra.mxu1 %vm895_vm0, %v3149_v49 }
 0x6ff   : > { %v1566_v57 = vpop.permute.xlu1 %1565 }
 0x700   : > { %2132 = vmatpush.xpose.msk.msrb.mxu1 %vm927_vm1, %v1566_v57  ;;  %v2301_v57 = vld [vmem:[#allocation12] ss:$0 sm:$0xff] }
 0x779   : > { %v1350_v54 = vpop.f32.mrf.mxu1 }
 0x77a   : > { %v1351_v55 = vadd.f32 %v2300_v53, %v1350_v54 }
 0x77c   : > { %2125 = vmatmul.msk.f32.vlgmr.msrb.gmra.mxu0 %vm927_vm1, %v1351_v55 }
 0x77d   : > { %1646 = vmatpush.msrb.mxu0 %v1386_v43 }
 0x7f9   : > { %v1412_v58 = vpop.f32.mrf.mxu0 }
 0x7fa   : > { %v1415_v59 = vsel %vm927_vm1, %v1412_v58, -inf }
 0x7fb   : > { %1416 = vmax.xlane.f32.xlu2 %v1415_v59 }
 0x813   : > { %1452 = vrot.lane.b32.xlu2 %v1351_v55, %s2789_s5 }
 0x81b   : > { %1563 = vrot.lane.b32.xlu2 %v1351_v55, %s2794_s14  ;;  %s3318_s14 = smov 80  }
 0x86e   : > { %v1417_v60 = vpop.xlane.xlu2 %1416 }
 0x86f   : > { %v1418_v61 = vsub.f32 %v1412_v58, %v1417_v60 }
 0x871   : > { %v1419_v62 = vmul.f32 1.442695, %v1418_v61 }
 0x873   : > { %2328 = vpow2.f32 %v1419_v62 }
 0x876   : > { %v1453_v63 = vpop.permute.xlu2 %1452 }
 0x877   : > { %2128 = vmatmul.msk.f32.vlgmr.msra.gmra.mxu1 %vm927_vm1, %v1453_v63 }
 0x879   : > { %v2329_v0 = vpop.eup %2328 }
 0x87a   : > { %v1421_v1 = vsel %vm927_vm1, %v2329_v0, 0.0 }
 0x87b   : > { %1422 = vadd.xlane.f32.xlu0 %v1421_v1 }
 0x87e   : > { %v1564_v2 = vpop.permute.xlu2 %1563 }
 0x87f   : > { %2133 = vmatmul.msk.f32.vlgmr.msrb.gmra.mxu1 %vm927_vm1, %v1564_v2 }
 0x88f   : > { %1426 = vrot.lane.b32.xlu0 %v3153_v52, %s2788_s26 }
 0x897   : > { %1654 = vrot.lane.b32.xlu0 %v3153_v52, %s3317_s2 }
 0x89f   : > { %1652 = vrot.lane.b32.xlu0 %v1351_v55, %s3317_s2 }
 0x8ee   : > { %v1423_v5 = vpop.xlane.xlu0 %1422 }
 0x8ef   : > { %2330 = vrcp.f32 %v1423_v5  ;;  %v1781_v5 = vld [vmem:[%s3279_s16 + $0x18] sm:$0xff] }
 0x8f4   : > { %v1477_v3 = vpop.f32.mrf.mxu1 }
 0x8f5   : > { %v1480_v6 = vsel %vm927_vm1, %v1477_v3, -inf  ;;  %v2331_v9 = vpop.eup %2330 }
 0x8f6   : > { %1481 = vmax.xlane.f32.xlu0 %v1480_v6  ;;  %v1425_v10 = vmul.f32 %v2331_v9, %v2329_v0  ;;  %v1779_v6 = vld [vmem:[%s3279_s16 + $0x8] sm:$0xff]  ;;  %v1816_v9 = vld [vmem:[%s3281_s18 + $0x30] sm:$0xff] }
 0x8fc   : > { %v1588_v7 = vpop.f32.mrf.mxu1 }
 0x8fd   : > { %v1591_v8 = vsel %vm927_vm1, %v1588_v7, -inf }
 0x8fe   : > { %1592 = vmax.xlane.f32.xlu1 %v1591_v8  ;;  %v1817_v8 = vld [vmem:[%s3281_s18 + $0x38] sm:$0xff] }
 0x901   : > { %v1427_v11 = vpop.permute.xlu0 %1426 }
 0x902   : > { %1447 = vmatpush.msrb.mxu2 %v1427_v11 }
 0x903   : > { %2126 = vmatmul.msk.f32.vlgmr.msrb.gmra.mxu2 %vm927_vm1, %v1425_v10  ;;  %v1815_v10 = vld [vmem:[%s3281_s18 + $0x28] sm:$0xff] }
 0x904   : > { %1558 = vmatpush.msra.mxu2 %v1384_v12 }
 0x909   : > { %v1655_v13 = vpop.permute.xlu0 %1654 }
 0x90a   : > { %2136 = vmatpush.xpose.msk.msrb.mxu2 %vm927_vm1, %v1655_v13  ;;  %v1814_v13 = vld [vmem:[%s3281_s18 + $0x20] sm:$0xff] }
 0x911   : > { %v1653_v14 = vpop.permute.xlu0 %1652 }
 0x969   : > { %v1482_v15 = vpop.xlane.xlu0 %1481 }
 0x96a   : > { %v1483_v16 = vsub.f32 %v1477_v3, %v1482_v15  ;;  %v1813_v15 = vld [vmem:[%s3281_s18 + $0x18] sm:$0xff] }
 0x96c   : > { %v1484_v17 = vmul.f32 1.442695, %v1483_v16 }
 0x96e   : > { %2332 = vpow2.f32 %v1484_v17 }
 0x971   : > { %v1593_v18 = vpop.xlane.xlu1 %1592 }
 0x972   : > { %v1594_v19 = vsub.f32 %v1588_v7, %v1593_v18  ;;  %v1778_v7 = vld [vmem:[%s3279_s16] sm:$0xff] }
 0x974   : > { %v2333_v20 = vpop.eup %2332  ;;  %v1595_v22 = vmul.f32 1.442695, %v1594_v19 }
 0x975   : > { %v1486_v23 = vsel %vm927_vm1, %v2333_v20, 0.0 }
 0x976   : > { %2334 = vpow2.f32 %v1595_v22  ;;  %1487 = vadd.xlane.f32.xlu0 %v1486_v23  ;;  %v2302_v23 = vld [vmem:[#allocation13] ss:$0 sm:$0xff] }
 0x97c   : > { %v2335_v24 = vpop.eup %2334 }
 0x97d   : > { %v1597_v25 = vsel %vm927_vm1, %v2335_v24, 0.0 }
 0x97e   : > { %1598 = vadd.xlane.f32.xlu1 %v1597_v25 }
 0x986   : > { %v1449_v4 = vpop.f32.mrf.mxu2 }
 0x987   : > { %2131 = vmatmul.msk.f32.vlgmr.msra.gmra.mxu2 %vm927_vm1, %v1449_v4  ;;  %v2303_v4 = vld [vmem:[#allocation15] ss:$0 sm:$0xff] }
 0x988   : > { %1834 = vmatpush.msra.mxu2 %v1817_v8 }
 0x98a   : > { %1835 = vmatpush.msra.mxu2 %v1816_v9 }
 0x98c   : > { %1836 = vmatpush.msra.mxu2 %v1815_v10 }
 0x98e   : > { %1837 = vmatpush.msra.mxu2 %v1814_v13 }
 0x98f   : > { %2137 = vmatmul.msk.f32.vlgmr.msrb.gmra.mxu2 %vm927_vm1, %v1653_v14 }
 0x990   : > { %1838 = vmatpush.msra.mxu2 %v1813_v15 }
 0x997   : > { %1602 = vrot.lane.b32.xlu1 %v3153_v52, %s3318_s14 }
 0x9e9   : > { %v1488_v29 = vpop.xlane.xlu0 %1487 }
 0x9ea   : > { %2336 = vrcp.f32 %v1488_v29  ;;  %v1811_v29 = vld [vmem:[%s3281_s18 + $0x8] sm:$0xff] }
 0x9f0   : > { %v2337_v34 = vpop.eup %2336 }
 0x9f1   : > { %v1599_v32 = vpop.xlane.xlu1 %1598  ;;  %v1490_v35 = vmul.f32 %v2337_v34, %v2333_v20 }
 0xa09   : > { %v1603_v37 = vpop.permute.xlu1 %1602 }
 0xa0a   : > { %v1560_v26 = vpop.f32.mrf.mxu2 }
 0xa12   : > { %v1677_v27 = vpop.f32.mrf.mxu2 }
 0xa13   : > { %v1680_v28 = vsel %vm927_vm1, %v1677_v27, -inf }
 0xa14   : > { %1681 = vmax.xlane.f32.xlu2 %v1680_v28  ;;  %v1812_v28 = vld [vmem:[%s3281_s18 + $0x10] sm:$0xff] }
 0xa15   : > { %1839 = vmatpush.msra.mxu2 %v1812_v28 }
 0xa17   : > { %1840 = vmatpush.msra.mxu2 %v1811_v29 }
 0xa2c   : > { %1491 = vrot.lane.b32.xlu2 %v3153_v52, %s3319_s25 }
 0xa87   : > { %v1682_v30 = vpop.xlane.xlu2 %1681 }
 0xa88   : > { %v1683_v31 = vsub.f32 %v1677_v27, %v1682_v30  ;;  %v1810_v30 = vld [vmem:[%s3281_s18] sm:$0xff] }
 0xa89   : > { %1841 = vmatpush.msra.mxu2 %v1810_v30 }
 0xa8a   : > { %v1684_v33 = vmul.f32 1.442695, %v1683_v31  ;;  %v2304_v31 = vld [vmem:[#allocation16] ss:$0 sm:$0xff] }
 0xa8c   : > { %2338 = vpow2.f32 %v1684_v33 }
 0xa8d   : > { %2340 = vrcp.f32 %v1599_v32 }
 0xa8f   : > { %v1492_v36 = vpop.permute.xlu2 %1491 }
 0xa90   : > { %1512 = vmatpush.msrb.mxu3 %v1492_v36 }
 0xa91   : > { %2129 = vmatmul.msk.f32.vlgmr.msrb.gmra.mxu3 %vm927_vm1, %v1490_v35  ;;  %v2305_v35 = vld [vmem:[#allocation18] ss:$0 sm:$0xff] }
 0xa92   : > { %v2339_v38 = vpop.eup %2338  ;;  %1623 = vmatpush.msra.mxu3 %v1603_v37 }
 0xa93   : > { %v1686_v39 = vsel %vm927_vm1, %v2339_v38, 0.0  ;;  %v2341_v40 = vpop.eup %2340 }
 0xa94   : > { %1687 = vadd.xlane.f32.xlu0 %v1686_v39  ;;  %v1601_v41 = vmul.f32 %v2341_v40, %v2335_v24  ;;  %1735 = vmatpush.msrb.mxu3 %v1387_v51 }
 0xa99   : > { %2134 = vmatmul.msk.f32.vlgmr.msra.gmra.mxu3 %vm927_vm1, %v1601_v41 }
 0xaa8   : > { %1691 = vrot.lane.b32.xlu0 %v3153_v52, %s3320_s27 }
 0xb07   : > { %v1688_v44 = vpop.xlane.xlu0 %1687 }
 0xb08   : > { %2342 = vrcp.f32 %v1688_v44 }
 0xb0e   : > { %v2343_v46 = vpop.eup %2342 }
 0xb0f   : > { %v1690_v47 = vmul.f32 %v2343_v46, %v2339_v38 }
 0xb14   : > { %v1514_v45 = vpop.f32.mrf.mxu3 }
 0xb15   : > { %2130 = vmatmul.msk.f32.vlgmr.msra.gmra.mxu0 %vm927_vm1, %v1514_v45 }
 0xb16   : > { %1801 = vmatpush.msra.mxu0 %v1781_v5 }
 0xb1a   : > { %v1692_v48 = vpop.permute.xlu0 %1691 }
 0xb1b   : > { %1712 = vmatpush.msra.mxu1 %v1692_v48 }
 0xb1c   : > { %v1625_v50 = vpop.f32.mrf.mxu3  ;;  %2138 = vmatmul.msk.f32.vlgmr.msra.gmra.mxu1 %vm927_vm1, %v1690_v47 }
 0xb1d   : > { %2135 = vmatmul.msk.f32.vlgmr.msrb.gmra.mxu0 %vm927_vm1, %v1625_v50 }
 0xb92   : > { %v1537_v53 = vpop.f32.mrf.mxu0 }
 0xb93   : > { %v1561_v55 = vadd.f32 %v1560_v26, %v1537_v53 }
 0xb99   : > { %v1714_v52 = vpop.f32.mrf.mxu1 }
 0xb9a   : > { %2139 = vmatmul.msk.f32.vlgmr.msrb.gmra.mxu3 %vm927_vm1, %v1714_v52  ;;  %v1648_v54 = vpop.f32.mrf.mxu0 }
 0xb9b   : > { %v1651_v56 = vadd.f32 %v1648_v54, %v1561_v55  ;;  %v2306_v55 = vld [vmem:[#allocation19] ss:$0 sm:$0xff] }
 0xc1d   : > { %v1737_v58 = vpop.f32.mrf.mxu3 }
 0xc1e   : > { %v1740_v59 = vadd.f32 %v1737_v58, %v1651_v56 }
 0xc20   : > { %v1744_v60 = vadd.f32 %v2301_v57, %v1740_v59  ;;  %v2307_v57 = vld [vmem:[#allocation21] ss:$0 sm:$0xff] }
 0xc22   : > { %v1745_v61 = vadd.f32 %v1744_v60, %v3149_v49  ;;  %v1780_v49 = vld [vmem:[%s3279_s16 + $0x10] sm:$0xff] }
 0xc23   : > { %1802 = vmatpush.msra.mxu0 %v1780_v49 }
 0xc24   : > { %v1748_v62 = vsel %vm895_vm0, %v1745_v61, 0.0 }
 0xc25   : > { %1749 = vadd.xlane.f32.xlu2 %v1748_v62  ;;  %1803 = vmatpush.msra.mxu0 %v1779_v6 }
 0xc27   : > { %1804 = vmatpush.msra.mxu0 %v1778_v7 }
 0xc98   : > { %v1750_v63 = vpop.xlane.xlu2 %1749 }
 0xc99   : > { %v1751_v0 = vmul.f32 %v1750_v63, %v3115_v21 }
 0xc9b   : > { %v1752_v1 = vsub.f32 %v1745_v61, %v1751_v0 }
 0xc9d   : > { %v1753_v2 = vmul.f32 %v1752_v1, %v1752_v1 }
 0xc9f   : > { %v1754_v3 = vsel %vm895_vm0, %v1753_v2, 0.0 }
 0xca0   : > { %1755 = vadd.xlane.f32.xlu0 %v1754_v3 }
 0xd13   : > { %v1756_v11 = vpop.xlane.xlu0 %1755 }
 0xd14   : > { %v1757_v12 = vmul.f32 %v1756_v11, %v3115_v21 }
 0xd16   : > { %v1758_v14 = vadd.f32 1e-05, %v1757_v12 }
 0xd18   : > { %2344 = vrsqrt.f32 %v1758_v14  ;;  %vm1765_vm7 = vweird.f32 %v1758_v14 }
 0xd1e   : > { %v2345_v16 = vpop.eup %2344 }
 0xd1f   : > { %v1760_v17 = vmul.f32 %v2345_v16, %v1758_v14  ;;  %vm1766_vm6 = vweird.f32 %v2345_v16 }
 0xd20   : > { %vm1767_vm8 = vmor %vm1765_vm7, %vm1766_vm6 }
 0xd21   : > { %v1761_v18 = vmul.f32 %v2345_v16, %v1760_v17 }
 0xd23   : > { %v1762_v19 = vmul.f32 0.5, %v1761_v18 }
 0xd25   : > { %v1763_v20 = vsub.f32 1.5, %v1762_v19 }
 0xd27   : > { %v1764_v22 = vmul.f32 %v2345_v16, %v1763_v20 }
 0xd29   : > { %v1768_v24 = vsel %vm1767_vm8, %v2345_v16, %v1764_v22 }
 0xd2a   : > { %v1769_v25 = vmul.f32 %v1768_v24, %v1752_v1 }
 0xd2c   : > { %v1773_v26 = vmul.f32 %v2302_v23, %v1769_v25 }
 0xd2e   : > { %v1777_v27 = vadd.f32 %v2303_v4, %v1773_v26 }
 0xd30   : > { %2140 = vmatmul.msk.f32.vlgmr.msra.gmra.mxu0 %vm895_vm0, %v1777_v27 }
 0xdad   : > { %v1806_v32 = vpop.f32.mrf.mxu0 }
 0xdae   : > { %v1807_v33 = vadd.f32 %v2304_v31, %v1806_v32 }
 0xdb0   : > { %v1809_v34 = vmax.f32 %v1807_v33, 0.0 }
 0xdb2   : > { %2141 = vmatmul.msk.f32.vlgmr.msra.gmra.mxu2 %vm1822_vm9, %v1809_v34 }
 0xe35   : > { %v1843_v36 = vpop.f32.mrf.mxu2 }
 0xe36   : > { %v1844_v37 = vadd.f32 %v2305_v35, %v1843_v36 }
 0xe38   : > { %v1846_v38 = vadd.f32 %v1844_v37, %v1777_v27 }
 0xe3a   : > { %v1849_v39 = vsel %vm895_vm0, %v1846_v38, 0.0 }
 0xe3b   : > { %1850 = vadd.xlane.f32.xlu1 %v1849_v39 }
 0xeae   : > { %v1851_v40 = vpop.xlane.xlu1 %1850 }
 0xeaf   : > { %v1852_v41 = vmul.f32 %v1851_v40, %v3115_v21 }
 0xeb1   : > { %v1853_v42 = vsub.f32 %v1846_v38, %v1852_v41 }
 0xeb3   : > { %v1854_v43 = vmul.f32 %v1853_v42, %v1853_v42 }
 0xeb5   : > { %v1855_v44 = vsel %vm895_vm0, %v1854_v43, 0.0 }
 0xeb6   : > { %1856 = vadd.xlane.f32.xlu2 %v1855_v44 }
 0xf29   : > { %v1857_v45 = vpop.xlane.xlu2 %1856 }
 0xf2a   : > { %v1858_v46 = vmul.f32 %v1857_v45, %v3115_v21 }
 0xf2c   : > { %v1859_v47 = vadd.f32 1e-05, %v1858_v46 }
 0xf2e   : > { %2346 = vrsqrt.f32 %v1859_v47  ;;  %vm1866_vm11 = vweird.f32 %v1859_v47 }
 0xf34   : > { %v2347_v48 = vpop.eup %2346 }
 0xf35   : > { %v1861_v50 = vmul.f32 %v2347_v48, %v1859_v47  ;;  %vm1867_vm10 = vweird.f32 %v2347_v48 }
 0xf36   : > { %vm1868_vm12 = vmor %vm1866_vm11, %vm1867_vm10 }
 0xf37   : > { %v1862_v51 = vmul.f32 %v2347_v48, %v1861_v50 }
 0xf39   : > { %v1863_v52 = vmul.f32 0.5, %v1862_v51 }
 0xf3b   : > { %v1864_v53 = vsub.f32 1.5, %v1863_v52 }
 0xf3d   : > { %v1865_v54 = vmul.f32 %v2347_v48, %v1864_v53 }
 0xf3f   : > { %v1869_v56 = vsel %vm1868_vm12, %v2347_v48, %v1865_v54 }
 0xf40   : > { %v1870_v58 = vmul.f32 %v1869_v56, %v1853_v42 }
 0xf42   : > { %v1874_v59 = vmul.f32 %v2306_v55, %v1870_v58 }
 0xf44   : > { %v1878_v21 = vadd.f32 %v2307_v57, %v1874_v59 }
 0xf46   : > { %1879 = vst.msk [vmem:[%s884_s3] sm:$0xff] %vm895_vm0, %v1878_v21 }
 0xf47 PF: > { %s3321_s0 = sld [smem:[#allocation29_spill]] }
 0xf4d   : > { %s39_s3 = sadd.s32 1, %s3321_s0  }
 0xf4e   : > { %p36_p7 = scmp.ge.s32.totalorder %s39_s3, 4  }
 0xf50   :  { %38 = sbr.rel (!%p36_p7) target bundleno = 18 (0x12), region = 194 }
 0xf55   :  { %1899 = vsyncpa [#allocation3], 1 }
 0xf56   :  { %1901 = vsyncpa [#allocation3 + $0x1], 1 }
 0xf57   :  { %1902 = vsyncpa [#allocation5], 1 }
 0xf58   :  { %1903 = vsyncpa [#allocation8], 1 }
 0xf59   :  { %1904 = vsyncpa [#allocation11], 1 }
 0xf5a   :  { %1905 = vsyncpa [#allocation14], 1 }
 0xf5b   :  { %1906 = vsyncpa [#allocation17], 1 }
 0xf5c   :  { %1907 = vsyncpa [#allocation20], 1 }

</bundles_post_ra>
